<compile_context>
chip_gen: v6e
topology: v6e:2x2x1
jax: 0.10.0
libtpu: 0.0.40
codegen_flags: <defaults>
</compile_context>

<pallas_src>
import functools

import jax
import jax.numpy as jnp
from jax.experimental import pallas as pl
from jax.experimental.pallas import tpu as pltpu

IMG_DIM = 2048
REV_DIM = 768
PROJ_DIM = 512
FUSE_HID = 512
OUT_DIM = 128

# Actual VMEM budget at bm=512 with f32 inputs:
#   fused weights bf16, single-buffered .................. ~2.9 MiB
#   2x (bm,2048) + 2x (bm,768) f32 input tiles ........... ~11  MiB
#   2x (bm,128) f32 output tiles + (bm,512) intermediates . ~1.5 MiB
# -> well under 16 MiB; 32 MiB leaves headroom for Mosaic internal scratch
#    while staying inside v7x's 64 MiB physical VMEM.
_VMEM_LIMIT_BYTES = 32 * 1024 * 1024


def _round_up(x, m):
    return (x + m - 1) // m * m


def _kernel_full(img_ref, rev_ref, wif_ref, wrf_ref, bf_ref, w2_ref, b2_ref,
                 out_ref, *, compute_dtype):
    """General path: one review row per image row (folded Linears)."""
    img = img_ref[...].astype(compute_dtype)       # in-kernel cast (VPU filler)
    rev = rev_ref[...].astype(compute_dtype)
    # fused layer 1:  img @ (Wi W1a) + rev @ (Wr W1b) + b_fused   [f32 acc]
    h = (jnp.dot(img, wif_ref[...], preferred_element_type=jnp.float32)
         + jnp.dot(rev, wrf_ref[...], preferred_element_type=jnp.float32)
         + bf_ref[...])
    h = jnp.maximum(h, 0.0)                         # fusion[1]: ReLU
    # fusion[2]: Linear(512 -> 128)
    out_ref[...] = (jnp.dot(h.astype(compute_dtype), w2_ref[...],
                            preferred_element_type=jnp.float32) + b2_ref[...])


def _kernel_bcast(img_ref, wif_ref, bf_ref, w2_ref, b2_ref,
                  out_ref, *, compute_dtype):
    """Broadcast path: the single review row is folded into the bias."""
    img = img_ref[...].astype(compute_dtype)
    h = jnp.dot(img, wif_ref[...],
                preferred_element_type=jnp.float32) + bf_ref[...]
    h = jnp.maximum(h, 0.0)
    out_ref[...] = (jnp.dot(h.astype(compute_dtype), w2_ref[...],
                            preferred_element_type=jnp.float32) + b2_ref[...])


def hybrid_recommender_forward(img_feat, review_feat, params, *,
                               block_b=256, compute_dtype=jnp.bfloat16):
    """Forward pass of HybridRecommender(fusion_type='concat').

    block_b: batch rows per grid step.  128 saturates v5e's 128-wide MXU;
    256+ is preferable on v6e/v7x (256-wide MXU).  On v7x pick block_b so the
    step count is even and >= 4 (two TensorCores share the 'parallel' axis).
    Ragged batches are handled by a partial final block (no padding copy).
    """
    wi, bi, wr, br, w1, b1, w2, b2 = params
    B = img_feat.shape[0]
    broadcast_review = (review_feat.shape[0] != B)
    cd = compute_dtype

    # ---- host-side weight fold (f32 math, one bf16 cast of fused weights) ----
    # fusion0(concat(img @ Wi + bi, rev @ Wr + br))
    #   = img @ (Wi W1a) + rev @ (Wr W1b) + (bi W1a + br W1b + b1)
    w1a = w1[:PROJ_DIM, :]
    w1b = w1[PROJ_DIM:, :]
    wif = jnp.dot(wi, w1a).astype(cd)                     # (2048, 512) bf16
    wrf_f32 = jnp.dot(wr, w1b)                            # (768, 512)  f32
    bf = (jnp.dot(bi, w1a) + jnp.dot(br, w1b) + b1).astype(jnp.float32)
    w2_c = w2.astype(cd)
    b2_f = b2.astype(jnp.float32)

    # Batch tiling: partial final block handles ragged B (no jnp.pad).
    bm = min(block_b, _round_up(B, 8))
    bm = max(8, bm - bm % 8)
    n_steps = pl.cdiv(B, bm)

    def tile_spec(feat):
        return pl.BlockSpec((bm, feat), lambda i: (i, 0))

    def const_spec(shape):
        # Constant across the grid -> single buffer; double-buffering would
        # only waste VMEM on dead copies.
        return pl.BlockSpec(shape, lambda i: (0, 0), pipeline_mode=pl.Buffered(1))

    compiler_params = pltpu.CompilerParams(
        dimension_semantics=("parallel",),
        vmem_limit_bytes=_VMEM_LIMIT_BYTES)

    img = img_feat.astype(jnp.float32)

    if broadcast_review:
        # Fold the single review row into the fused bias (f32, host-side).
        bf_eff = bf + jnp.dot(review_feat.astype(jnp.float32), wrf_f32)

        flops = 2 * B * (IMG_DIM * FUSE_HID + FUSE_HID * OUT_DIM)
        bytes_accessed = (B * IMG_DIM * 4
                          + (IMG_DIM * FUSE_HID + FUSE_HID * OUT_DIM) * 2
                          + (FUSE_HID + OUT_DIM) * 4
                          + B * OUT_DIM * 4)

        out = pl.pallas_call(
            functools.partial(_kernel_bcast, compute_dtype=cd),
            out_shape=jax.ShapeDtypeStruct((B, OUT_DIM), jnp.float32),
            grid_spec=pltpu.PrefetchScalarGridSpec(
                num_scalar_prefetch=0,
                grid=(n_steps,),
                in_specs=[
                    tile_spec(IMG_DIM),                   # img tile (bm, 2048) f32
                    const_spec((IMG_DIM, FUSE_HID)),      # W_img_fused (bf16)
                    const_spec((1, FUSE_HID)),            # fused bias (+review)
                    const_spec((FUSE_HID, OUT_DIM)),      # W fusion2
                    const_spec((1, OUT_DIM)),             # b fusion2
                ],
                out_specs=pl.BlockSpec((bm, OUT_DIM), lambda i: (i, 0)),
            ),
            compiler_params=compiler_params,
            cost_estimate=pl.CostEstimate(flops=flops, transcendentals=0,
                                          bytes_accessed=bytes_accessed),
        )(img, wif, bf_eff, w2_c, b2_f)
    else:
        rev = review_feat.astype(jnp.float32)
        wrf = wrf_f32.astype(cd)

        flops = 2 * B * (IMG_DIM * FUSE_HID + REV_DIM * FUSE_HID
                         + FUSE_HID * OUT_DIM)
        bytes_accessed = (B * (IMG_DIM + REV_DIM) * 4
                          + (IMG_DIM * FUSE_HID + REV_DIM * FUSE_HID
                             + FUSE_HID * OUT_DIM) * 2
                          + (FUSE_HID + OUT_DIM) * 4
                          + B * OUT_DIM * 4)

        out = pl.pallas_call(
            functools.partial(_kernel_full, compute_dtype=cd),
            out_shape=jax.ShapeDtypeStruct((B, OUT_DIM), jnp.float32),
            grid_spec=pltpu.PrefetchScalarGridSpec(
                num_scalar_prefetch=0,
                grid=(n_steps,),
                in_specs=[
                    tile_spec(IMG_DIM),                   # img tile (bm, 2048) f32
                    tile_spec(REV_DIM),                   # rev tile (bm, 768)  f32
                    const_spec((IMG_DIM, FUSE_HID)),      # W_img_fused (bf16)
                    const_spec((REV_DIM, FUSE_HID)),      # W_rev_fused (bf16)
                    const_spec((1, FUSE_HID)),            # fused bias
                    const_spec((FUSE_HID, OUT_DIM)),      # W fusion2
                    const_spec((1, OUT_DIM)),             # b fusion2
                ],
                out_specs=pl.BlockSpec((bm, OUT_DIM), lambda i: (i, 0)),
            ),
            compiler_params=compiler_params,
            cost_estimate=pl.CostEstimate(flops=flops, transcendentals=0,
                                          bytes_accessed=bytes_accessed),
        )(img, rev, wif, wrf, bf, w2_c, b2_f)

    return out


def init_params(key):
    """Deterministic synthetic parameters (PyTorch Linear shapes, pre-transposed)."""
    ks = jax.random.split(key, 8)

    def lin(kw, kb, fan_in, fan_out):
        bound = 1.0 / (fan_in ** 0.5)
        w = jax.random.uniform(kw, (fan_in, fan_out), jnp.float32, -bound, bound)
        b = jax.random.uniform(kb, (1, fan_out), jnp.float32, -bound, bound)
        return w, b

    wi, bi = lin(ks[0], ks[1], IMG_DIM, PROJ_DIM)        # image_proj
    wr, br = lin(ks[2], ks[3], REV_DIM, PROJ_DIM)        # review_proj
    w1, b1 = lin(ks[4], ks[5], 2 * PROJ_DIM, FUSE_HID)   # fusion[0]
    w2, b2 = lin(ks[6], ks[7], FUSE_HID, OUT_DIM)        # fusion[2]
    return (wi, bi, wr, br, w1, b1, w2, b2)


def reference_forward(img_feat, review_feat, params):
    """Plain-JAX f32 reference matching the PyTorch module semantics."""
    wi, bi, wr, br, w1, b1, w2, b2 = params
    if img_feat.shape[0] != review_feat.shape[0]:
        review_feat = jnp.broadcast_to(
            review_feat, (img_feat.shape[0], review_feat.shape[-1]))
    img_proj = jnp.dot(img_feat, wi) + bi
    rev_proj = jnp.dot(review_feat, wr) + br
    x = jnp.concatenate([img_proj, rev_proj], axis=1)
    h = jnp.maximum(jnp.dot(x, w1) + b1, 0.0)
    return jnp.dot(h, w2) + b2


if __name__ == "__main__":
    key = jax.random.PRNGKey(0)
    k_img, k_rev, k_par = jax.random.split(key, 3)

    # Small, deliberately ragged batch: with block_b=16 this gives a 2-step
    # grid whose final block is partial (exercises masked OOB output writes).
    B = 20
    img_feat = jax.random.normal(k_img, (B, IMG_DIM), jnp.float32)
    review_full = jax.random.normal(k_rev, (B, REV_DIM), jnp.float32)
    review_row = review_full[:1]                      # broadcast case (1, 768)
    params = init_params(k_par)

    # General path: per-row review features.
    out_full = hybrid_recommender_forward(img_feat, review_full, params, block_b=16)
    out_full = jax.block_until_ready(out_full)
    ref_full = reference_forward(img_feat, review_full, params)
    assert out_full.shape == (B, OUT_DIM)
    assert jnp.allclose(out_full, ref_full, atol=2e-2, rtol=2e-2), \
        "mismatch vs. reference (full path)"

    # Broadcast path: single review row expanded across the batch.
    out_bc = hybrid_recommender_forward(img_feat, review_row, params, block_b=16)
    out_bc = jax.block_until_ready(out_bc)
    ref_bc = reference_forward(img_feat, review_row, params)
    assert out_bc.shape == (B, OUT_DIM)
    assert jnp.allclose(out_bc, ref_bc, atol=2e-2, rtol=2e-2), \
        "mismatch vs. reference (broadcast path)"

    print("KERNEL_OK")
</pallas_src>

<mosaic_0001>
module attributes {stable_mosaic.version = 11 : i64} {
  func.func @_kernel_full(%arg0: i32, %arg1: memref<16x2048xf32, #tpu.memory_space<vmem>>, %arg2: memref<16x768xf32, #tpu.memory_space<vmem>>, %arg3: memref<2048x512xbf16, #tpu.memory_space<vmem>>, %arg4: memref<768x512xbf16, #tpu.memory_space<vmem>>, %arg5: memref<1x512xf32, #tpu.memory_space<vmem>>, %arg6: memref<512x128xbf16, #tpu.memory_space<vmem>>, %arg7: memref<1x128xf32, #tpu.memory_space<vmem>>, %arg8: memref<16x128xf32, #tpu.memory_space<vmem>>) attributes {dimension_semantics = [#tpu.dimension_semantics<parallel>], iteration_bounds = array<i64: 2>, scalar_prefetch = 0 : i64, scratch_operands = 0 : i64, tpu.core_type = #tpu.core_type<tc>, window_params = [{transform_indices = @transform_0, window_bounds = array<i64: 16, 2048>}, {transform_indices = @transform_1, window_bounds = array<i64: 16, 768>}, {pipeline_mode = #tpu.pipeline_mode<synchronous>, transform_indices = @transform_2, window_bounds = array<i64: 2048, 512>}, {pipeline_mode = #tpu.pipeline_mode<synchronous>, transform_indices = @transform_3, window_bounds = array<i64: 768, 512>}, {pipeline_mode = #tpu.pipeline_mode<synchronous>, transform_indices = @transform_4, window_bounds = array<i64: 1, 512>}, {pipeline_mode = #tpu.pipeline_mode<synchronous>, transform_indices = @transform_5, window_bounds = array<i64: 512, 128>}, {pipeline_mode = #tpu.pipeline_mode<synchronous>, transform_indices = @transform_6, window_bounds = array<i64: 1, 128>}, {transform_indices = @transform_7, window_bounds = array<i64: 16, 128>}]} {
    %c0 = arith.constant 0 : index
    %c0_0 = arith.constant 0 : index
    %0 = vector.load %arg1[%c0, %c0_0] : memref<16x2048xf32, #tpu.memory_space<vmem>>, vector<16x2048xf32>
    %1 = arith.truncf %0 : vector<16x2048xf32> to vector<16x2048xbf16>
    %c0_1 = arith.constant 0 : index
    %c0_2 = arith.constant 0 : index
    %2 = vector.load %arg2[%c0_1, %c0_2] : memref<16x768xf32, #tpu.memory_space<vmem>>, vector<16x768xf32>
    %3 = arith.truncf %2 : vector<16x768xf32> to vector<16x768xbf16>
    %c0_3 = arith.constant 0 : index
    %c0_4 = arith.constant 0 : index
    %4 = vector.load %arg3[%c0_3, %c0_4] : memref<2048x512xbf16, #tpu.memory_space<vmem>>, vector<2048x512xbf16>
    %cst = arith.constant dense<0.000000e+00> : vector<16x512xf32>
    %5 = tpu.matmul %1, %4, %cst {dimension_numbers = #tpu.dot_dimension_numbers<[1], [0], [0], [1], [0, 0, 1, 1], [], []>} : vector<16x2048xbf16>, vector<2048x512xbf16>, vector<16x512xf32> -> vector<16x512xf32>
    %c0_5 = arith.constant 0 : index
    %c0_6 = arith.constant 0 : index
    %6 = vector.load %arg4[%c0_5, %c0_6] : memref<768x512xbf16, #tpu.memory_space<vmem>>, vector<768x512xbf16>
    %cst_7 = arith.constant dense<0.000000e+00> : vector<16x512xf32>
    %7 = tpu.matmul %3, %6, %cst_7 {dimension_numbers = #tpu.dot_dimension_numbers<[1], [0], [0], [1], [0, 0, 1, 1], [], []>} : vector<16x768xbf16>, vector<768x512xbf16>, vector<16x512xf32> -> vector<16x512xf32>
    %8 = arith.addf %5, %7 : vector<16x512xf32>
    %c0_8 = arith.constant 0 : index
    %c0_9 = arith.constant 0 : index
    %9 = vector.load %arg5[%c0_8, %c0_9] : memref<1x512xf32, #tpu.memory_space<vmem>>, vector<1x512xf32>
    %10 = vector.broadcast %9 : vector<1x512xf32> to vector<16x512xf32>
    %11 = arith.addf %8, %10 : vector<16x512xf32>
    %cst_10 = arith.constant 0.000000e+00 : f32
    %12 = vector.broadcast %cst_10 : f32 to vector<16x512xf32>
    %13 = arith.maximumf %11, %12 : vector<16x512xf32>
    %14 = arith.truncf %13 : vector<16x512xf32> to vector<16x512xbf16>
    %c0_11 = arith.constant 0 : index
    %c0_12 = arith.constant 0 : index
    %15 = vector.load %arg6[%c0_11, %c0_12] : memref<512x128xbf16, #tpu.memory_space<vmem>>, vector<512x128xbf16>
    %cst_13 = arith.constant dense<0.000000e+00> : vector<16x128xf32>
    %16 = tpu.matmul %14, %15, %cst_13 {dimension_numbers = #tpu.dot_dimension_numbers<[1], [0], [0], [1], [0, 0, 1, 1], [], []>} : vector<16x512xbf16>, vector<512x128xbf16>, vector<16x128xf32> -> vector<16x128xf32>
    %c0_14 = arith.constant 0 : index
    %c0_15 = arith.constant 0 : index
    %17 = vector.load %arg7[%c0_14, %c0_15] : memref<1x128xf32, #tpu.memory_space<vmem>>, vector<1x128xf32>
    %18 = vector.broadcast %17 : vector<1x128xf32> to vector<16x128xf32>
    %19 = arith.addf %16, %18 : vector<16x128xf32>
    %c0_16 = arith.constant 0 : index
    %c0_17 = arith.constant 0 : index
    %20 = vector.load %arg8[%c0_16, %c0_17] : memref<16x128xf32, #tpu.memory_space<vmem>>, vector<16x128xf32>
    tpu.vector_store %arg8[%c0_16, %c0_17], %19 {strides = array<i32>} : memref<16x128xf32, #tpu.memory_space<vmem>>, vector<16x128xf32>,
    return
  }
  func.func @transform_0(%arg0: i32) -> (i32, i32) {
    %c0_i32 = arith.constant 0 : i32
    %c0_i32_0 = arith.constant 0 : i32
    return %arg0, %c0_i32 : i32, i32
  }
  func.func @transform_1(%arg0: i32) -> (i32, i32) {
    %c0_i32 = arith.constant 0 : i32
    %c0_i32_0 = arith.constant 0 : i32
    return %arg0, %c0_i32 : i32, i32
  }
  func.func @transform_2(%arg0: i32) -> (i32, i32) {
    %c0_i32 = arith.constant 0 : i32
    %c0_i32_0 = arith.constant 0 : i32
    %c0_i32_1 = arith.constant 0 : i32
    return %c0_i32, %c0_i32_0 : i32, i32
  }
  func.func @transform_3(%arg0: i32) -> (i32, i32) {
    %c0_i32 = arith.constant 0 : i32
    %c0_i32_0 = arith.constant 0 : i32
    %c0_i32_1 = arith.constant 0 : i32
    return %c0_i32, %c0_i32_0 : i32, i32
  }
  func.func @transform_4(%arg0: i32) -> (i32, i32) {
    %c0_i32 = arith.constant 0 : i32
    %c0_i32_0 = arith.constant 0 : i32
    %c0_i32_1 = arith.constant 0 : i32
    return %c0_i32, %c0_i32_0 : i32, i32
  }
  func.func @transform_5(%arg0: i32) -> (i32, i32) {
    %c0_i32 = arith.constant 0 : i32
    %c0_i32_0 = arith.constant 0 : i32
    %c0_i32_1 = arith.constant 0 : i32
    return %c0_i32, %c0_i32_0 : i32, i32
  }
  func.func @transform_6(%arg0: i32) -> (i32, i32) {
    %c0_i32 = arith.constant 0 : i32
    %c0_i32_0 = arith.constant 0 : i32
    %c0_i32_1 = arith.constant 0 : i32
    return %c0_i32, %c0_i32_0 : i32, i32
  }
  func.func @transform_7(%arg0: i32) -> (i32, i32) {
    %c0_i32 = arith.constant 0 : i32
    %c0_i32_0 = arith.constant 0 : i32
    return %arg0, %c0_i32 : i32, i32
  }
}

</mosaic_0001>

<bundles_post_ra>
// kernel: tpu_custom_call.1
= control target key start
LH: loop header
LB: loop body
LE: loop exit
PB: predicated region body
PF: predicated region fallthrough
CT: control target
= control target key end

     0   :  { %s9113_s0 = inlined_call_operand.hbm [shape: f32[20,2048], index: 0, kind: input, shape index: {}]   ;;  %s9114_s1 = inlined_call_operand.hbm [shape: f32[20,768], index: 1, kind: input, shape index: {}]   ;;  %s9115_s2 = inlined_call_operand.hbm [shape: bf16[2048,512], index: 2, kind: input, shape index: {}]   ;;  %s9116_s3 = inlined_call_operand.hbm [shape: bf16[768,512], index: 3, kind: input, shape index: {}]   ;;  %s9117_s4 = inlined_call_operand.hbm [shape: f32[1,512], index: 4, kind: input, shape index: {}]   ;;  %s9118_s5 = inlined_call_operand.hbm [shape: bf16[512,128], index: 5, kind: input, shape index: {}]   ;;  %s9119_s6 = inlined_call_operand.hbm [shape: f32[1,128], index: 6, kind: input, shape index: {}]   ;;  %s9120_s7 = inlined_call_operand.hbm [shape: f32[20,128], index: 7, kind: output, shape index: {}]  }
   0x1   :  { %9128 = sst [smem:[#allocation23_spill]] %s9115_s2 }
   0x2   :  { %12 = vsyncpa [#allocation3], 0 }
   0x3   :  { %14 = vsyncpa [#allocation3 + $0x1], 0 }
   0x4   :  { %15 = vsyncpa [#allocation6], 0 }
   0x5   :  { %17 = vsyncpa [#allocation6 + $0x1], 0 }
   0x6   :  { %18 = vsyncpa [#allocation9], 0 }
   0x7   :  { %19 = vsyncpa [#allocation12], 0 }
   0x8   :  { %20 = vsyncpa [#allocation4], 0 }
   0x9   :  { %22 = vsyncpa [#allocation4 + $0x1], 0  ;;  %s8567_s24 = smov 0   ;;  %s8569_s25 = smov 0  }
   0xa   :  { %s8571_s26 = smov 0   ;;  %s8573_s27 = smov 0  }
   0xb LB: > { %s8588_s28 = sadd.s32 4294967295, %s8507_s27   ;;  %s6227_s29 = sadd.s32 4294967294, %s8507_s27   ;;  %s8507_s27 = sphi %s8573_s27, %s9151_s27   ;;  %s8503_s26 = sphi %s8571_s26, %s9155_s26   ;;  %s8499_s25 = sphi %s8569_s25, %s9154_s25   ;;  %s8495_s24 = sphi %s8567_s24, %s9153_s24  }
   0xc   : > { %s8592_s30 = sadd.s32 1, %s8507_s27   ;;  %s35_s8 = sadd.s32 1, %s8503_s26 }
   0xd   : > { %9129 = sst [smem:[#allocation21_spill]] %s8592_s30  ;;  %s32_s9 = ssub.s32 %s8507_s27, %s8592_s30 }
   0xe   : > { %p42_p0 = scmp.ne.s32.totalorder %s8503_s26, %s8499_s25  ;;  %p33_p1 = scmp.eq.s32.totalorder %s32_s9, 0 }
   0xf   : > { %p43_p2 = scmp.eq.s32.totalorder %s8507_s27, 0  ;;  %p48_p3 = scmp.ne.s32.totalorder %s8499_s25, %s8495_s24 }
  0x10   : > { %p9121_p4 = scmp.eq.s32.totalorder %s8588_s28, 0  ;;  %p203_p7 = scmp.eq.s32.totalorder %s8588_s28, 1 }
  0x11   : > { %s8604_s10 = scalar_select %p33_p1, %s8503_s26, %s35_s8  }
  0x12   : > { %p8606_p5 = por %p43_p2, %p42_p0  ;;  %p8612_p6 = por %p9121_p4, %p48_p3 }
  0x13   : > { %9130 = sst [smem:[#allocation22_spill]] %s8604_s10  ;;  %p209_p8 = scmp.eq.s32.totalorder %s6227_s29, 1 }
  0x14   : > { %s9132_s12 = scalar_select %p8612_p6, 1, 0 }
  0x15   : > { %p6228_p9 = scmp.ge.s32.totalorder %s8507_s27, 1  ;;  %p216_p10 = scmp.lt.s32.totalorder %s8507_s27, 3 }
  0x16   : > { %p8619_p11 = por %p203_p7, %p42_p0  ;;  %p8623_p12 = por %p209_p8, %p48_p3 }
  0x17   : > { %p8627_p13 = pnand %p6228_p9, %p216_p10  ;;  %s8509_s16 = smov [#allocation8]  }
  0x18   : > { %s9133_s13 = scalar_select %p8619_p11, 1, 0 }
  0x19   : > { %s9134_s14 = scalar_select %p8623_p12, 1, 0 }
  0x1a   : > { %p7079_p1 = pneg %p8627_p13  ;;  %s241_s17 = sshll.u32 %s8509_s16, 4  ;;  %s242_s17 = int_to_ptr.vmem [resolvable:$true] %s241_s17 }
  0x1b   : > { %s8510_s19 = smov [#allocation11]   ;;  %s8256_s22 = scalar_lea.vmem %s242_s17, 24576 }
  0x1c   : > { %p8635_p2 = pnand %p7079_p1, %p9121_p4  ;;  %s265_s20 = sshll.u32 %s8510_s19, 4  ;;  %s266_s20 = int_to_ptr.vmem [resolvable:$true] %s265_s20 }
  0x1d   : > { %p8257_p3 = scmp.ne.s32.totalorder %s242_s17, %s8256_s22  ;;  %p8264_p9 = scmp.lt.s32.totalorder %s242_s17, %s242_s17 }
  0x1e   : > { %p8641_p0 = pneg %p8635_p2  ;;  %p8265_p10 = scmp.lt.s32.totalorder %s8256_s22, %s8256_s22 }
  0x20   : > { %p8259_p7 = pnand %p8257_p3, %p8641_p0  ;;  %p8266_p1 = por %p8265_p10, %p8264_p9 }
  0x22   : > { %p8260_p8 = pneg %p8259_p7 }
  0x24   : > { %p8267_p4 = pnand %p8266_p1, %p8260_p8 }
  0x26   : > { %8270 = shalt.err (!%p8267_p4)
}
  0x27   : > { %s9124_s23 = smov 256   ;;  %s9125_s29 = smov 16  }
  0x28   : > { %7085 = dma.hbm_to_vmem [thread:$0]  (!%p8635_p2), %s9116_s3, 24576, %s242_s17, [#allocation9], %s9124_s23, %s9124_s23, %s9125_s29  }
  0x29   : > { %s8282_s16 = scalar_lea.vmem %s266_s20, 4096  ;;  %p8290_p9 = scmp.lt.s32.totalorder %s266_s20, %s266_s20 }
  0x2a   : > { %p8283_p3 = scmp.ne.s32.totalorder %s266_s20, %s8282_s16  ;;  %p8291_p8 = scmp.lt.s32.totalorder %s8282_s16, %s8282_s16 }
  0x2c   : > { %p8285_p7 = pnand %p8283_p3, %p8641_p0  ;;  %p8292_p4 = por %p8291_p8, %p8290_p9 }
  0x2e   : > { %p8286_p12 = pneg %p8285_p7 }
  0x30   : > { %p8293_p10 = pnand %p8292_p4, %p8286_p12 }
  0x32   : > { %8296 = shalt.err (!%p8293_p10)
}
  0x33   : > { %s8513_s19 = smov 64   ;;  %s8514_s22 = smov 4  }
  0x34   : > { %7091 = dma.hbm_to_vmem [thread:$0]  (!%p8635_p2), %s9118_s5, 4096, %s266_s20, [#allocation12], %s8513_s19, %s8513_s19, %s8514_s22  }
  0x35   : > { %s8515_s17 = smov [#allocation7]   ;;  %s8516_s9 = smov [#allocation10]  }
  0x36   : > { %s228_s8 = sshll.u32 %s8515_s17, 4  ;;  %s255_s23 = sshll.u32 %s8516_s9, 4  ;;  %s229_s8 = int_to_ptr.vmem [resolvable:$true] %s228_s8  ;;  %s256_s23 = int_to_ptr.vmem [resolvable:$true] %s255_s23 }
  0x37   : > { %s8308_s29 = scalar_lea.vmem %s229_s8, 65536  ;;  %p8316_p7 = scmp.lt.s32.totalorder %s229_s8, %s229_s8 }
  0x38   : > { %p8309_p1 = scmp.ne.s32.totalorder %s229_s8, %s8308_s29  ;;  %p8317_p9 = scmp.lt.s32.totalorder %s8308_s29, %s8308_s29 }
  0x3a   : > { %p8311_p3 = pnand %p8309_p1, %p8641_p0  ;;  %p8318_p8 = por %p8317_p9, %p8316_p7 }
  0x3c   : > { %p8312_p12 = pneg %p8311_p3 }
  0x3e   : > { %p8319_p4 = pnand %p8318_p8, %p8312_p12 }
  0x40   : > { %8322 = shalt.err (!%p8319_p4)
}
  0x41   : > { %s9138_s16 = smov 16   ;;  %s9139_s30 = smov 256  }
  0x42   : > { %s9140_s2 = sld [smem:[#allocation23_spill]]  ;;  %s8334_s19 = scalar_lea.vmem %s256_s23, 64 }
  0x43   : > { %p8335_p10 = scmp.ne.s32.totalorder %s256_s23, %s8334_s19  ;;  %p8342_p11 = scmp.lt.s32.totalorder %s256_s23, %s256_s23 }
  0x44   : > { %p8343_p7 = scmp.lt.s32.totalorder %s8334_s19, %s8334_s19 }
  0x45   : > { %p8337_p1 = pnand %p8335_p10, %p8641_p0 }
  0x46   : > { %p8344_p12 = por %p8343_p7, %p8342_p11 }
  0x47   : > { %p8338_p3 = pneg %p8337_p1 }
  0x48   : > { %7082 = dma.hbm_to_vmem [thread:$0]  (!%p8635_p2), %s9140_s2, 65536, %s229_s8, [#allocation6], %s9139_s30, %s9139_s30, %s9138_s16  }
  0x49   : > { %p8345_p9 = pnand %p8344_p12, %p8338_p3 }
  0x4b   : > { %8348 = shalt.err (!%p8345_p9)
}
  0x4c   : > { %7088 = dma.hbm_to_vmem [thread:$0]  (!%p8635_p2), %s9117_s4, 64, %s256_s23, [#allocation9]  }
  0x4d   : > { %s8517_s17 = smov [#allocation13]  }
  0x4e   : > { %s279_s8 = sshll.u32 %s8517_s17, 4  ;;  %s280_s8 = int_to_ptr.vmem [resolvable:$true] %s279_s8 }
  0x4f   : > { %s8360_s9 = scalar_lea.vmem %s280_s8, 16  ;;  %s8367_s16 = scalar_lea.vmem %s280_s8, 32 }
  0x50   : > { %p8361_p8 = scmp.ne.s32.totalorder %s280_s8, %s8360_s9  ;;  %p8368_p1 = scmp.lt.s32.totalorder %s280_s8, %s280_s8 }
  0x51   : > { %p8369_p11 = scmp.lt.s32.totalorder %s8367_s16, %s8360_s9 }
  0x52   : > { %p8363_p4 = pnand %p8361_p8, %p8641_p0 }
  0x53   : > { %p8370_p3 = por %p8369_p11, %p8368_p1 }
  0x54   : > { %p8364_p10 = pneg %p8363_p4 }
  0x56   : > { %p8371_p7 = pnand %p8370_p3, %p8364_p10 }
  0x58   : > { %8374 = shalt.err (!%p8371_p7)
}
  0x59   : > { %7094 = dma.hbm_to_vmem [thread:$0]  (!%p8635_p2), %s9119_s6, 16, %s280_s8, [#allocation12]  }
  0x5a   : > { %p9126_p12 = scmp.ge.s32.totalorder %s8507_s27, 2 }
  0x5c   : > { %286 = sbr.rel (%p9126_p12) target bundleno = 163 (0xa3), region = 36 }
  0x61   : > { %289 = sbr.rel (!%p8606_p5) target bundleno = 129 (0x81), region = 40  ;;  %s290_s21 = sand.u32 (%p8606_p5), 1, %s8503_s26  }
  0x62   : > { %s6236_s23 = sshll.u32 (%p8606_p5), %s8507_s27, 1  ;;  %s6235_s20 = sshll.u32 (%p8606_p5), %s290_s21, 8 }
  0x63   : > { %s296_s19 = ssub.s32 (%p8606_p5), 3, %s6236_s23  ;;  %s8696_s22 = scalar_lea.sflag (%p8606_p5), [#allocation3], %s290_s21 }
  0x64   : > { %p297_p0 = scmp.lt.s32.totalorder (%p8606_p5), %s296_s19, 2  ;;  %s294_s17 = scalar_lea.vmem (%p8606_p5), [#allocation2], %s6235_s20 }
  0x66   : > { %s9157_s19 = smov (!%p297_p0, %s296_s19), 2 }
  0x67   : > { %s8693_s18 = sshll.u32 %s9157_s19, 11 }
  0x68   : > { %s302_s29 = ssub.s32 4096, %s8693_s18 }
  0x69   : > { %303 = vsyncadd %s8696_s22, %s302_s29  ;;  %p6239_p2 = scmp.ne.s32.totalorder %s8693_s18, 0  ;;  %s7007_s8 = sshll.u32 %s8507_s27, 12 }
  0x6a   : > { %s8704_s30 = scalar_lea.hbm %s9113_s0, %s7007_s8  ;;  %s309_s10 = sshll.u32 %s294_s17, 4  ;;  %s8706_s10 = int_to_ptr.vmem [resolvable:$true] %s309_s10 }
  0x6b   : > { %s8375_s21 = scalar_lea.hbm %s8704_s30, %s8693_s18  ;;  %s8379_s19 = scalar_lea.hbm %s9113_s0, 6144 }
  0x6c   : > { %p8376_p9 = scmp.ne.s32.totalorder %s8704_s30, %s8375_s21  ;;  %p8380_p10 = scmp.lt.s32.totalorder %s8704_s30, %s9113_s0 }
  0x6d   : > { %p8381_p1 = scmp.lt.s32.totalorder %s8379_s19, %s8375_s21 }
  0x6e   : > { %p8377_p8 = pnand %p8376_p9, %p6239_p2 }
  0x6f   : > { %p8382_p11 = por %p8381_p1, %p8380_p10 }
  0x70   : > { %p8378_p4 = pneg %p8377_p8 }
  0x72   : > { %p8383_p3 = pnand %p8382_p11, %p8378_p4 }
  0x74   : > { %8386 = shalt.err (!%p8383_p3)
}
  0x75   : > { %s8387_s17 = scalar_lea.vmem %s8706_s10, %s8693_s18  ;;  %s8518_s8 = smov [#allocation2]  }
  0x76   : > { %p8388_p7 = scmp.ne.s32.totalorder %s8706_s10, %s8387_s17  ;;  %s8391_s9 = sshll.u32 %s8518_s8, 4  ;;  %s8392_s9 = int_to_ptr.vmem [resolvable:$false] %s8391_s9 }
  0x77   : > { %s8393_s16 = scalar_lea.vmem %s8392_s9, 8192  ;;  %p8394_p8 = scmp.lt.s32.totalorder %s8706_s10, %s8392_s9 }
  0x78   : > { %p8389_p0 = pnand %p8388_p7, %p6239_p2  ;;  %p8395_p12 = scmp.lt.s32.totalorder %s8393_s16, %s8387_s17 }
  0x7a   : > { %p8390_p9 = pneg %p8389_p0  ;;  %p8396_p6 = por %p8395_p12, %p8394_p8 }
  0x7c   : > { %p8397_p10 = pnand %p8396_p6, %p8390_p9 }
  0x7e   : > { %8400 = shalt.err (!%p8397_p10)
}
  0x7f   : > { %s8519_s2 = smov 2048   ;;  %s8520_s21 = smov 128  }
  0x80   : > { %315 = dma.hbm_to_vmem [thread:$0]  (%p6239_p2), %s8704_s30, %s8693_s18, %s8706_s10, %s8696_s22, %s8519_s2, %s8519_s2, %s8520_s21  }
  0x81 PF: > { %318 = sbr.rel (!%p8606_p5) target bundleno = 163 (0xa3), region = 44  ;;  %s319_s23 = sand.u32 (%p8606_p5), 1, %s8507_s27  }
  0x82   : > { %s321_s20 = sand.u32 (%p8606_p5), 1, %s8503_s26   ;;  %s6244_s29 = sshll.u32 (%p8606_p5), %s8507_s27, 1 }
  0x83   : > { %s7053_s19 = smul.u32 (%p8606_p5), 96, %s321_s20  ;;  %s325_s17 = ssub.s32 (%p8606_p5), 3, %s6244_s29 }
  0x84   : > { %p326_p6 = scmp.lt.s32.totalorder (%p8606_p5), %s325_s17, 2  ;;  %s8740_s16 = scalar_lea.sflag (%p8606_p5), [#allocation6], %s319_s23 }
  0x85   : > { %s323_s18 = scalar_lea.vmem (%p8606_p5), [#allocation5], %s7053_s19 }
  0x86   : > { %s9159_s17 = smov (!%p326_p6, %s325_s17), 2 }
  0x87   : > { %s8737_s8 = smul.u32 768, %s9159_s17 }
  0x89   : > { %s331_s9 = ssub.s32 1536, %s8737_s8 }
  0x8a   : > { %332 = vsyncadd %s8740_s16, %s331_s9  ;;  %p6247_p5 = scmp.ne.s32.totalorder %s8737_s8, 0  ;;  %s7054_s11 = smul.u32 1536, %s8507_s27 }
  0x8b   : > { %s338_s22 = sshll.u32 %s323_s18, 4  ;;  %s8405_s19 = scalar_lea.hbm %s9114_s1, 2304  ;;  %s8750_s22 = int_to_ptr.vmem [resolvable:$true] %s338_s22 }
  0x8c   : > { %s8748_s2 = scalar_lea.hbm %s9114_s1, %s7054_s11 }
  0x8d   : > { %s8401_s21 = scalar_lea.hbm %s8748_s2, %s8737_s8  ;;  %p8406_p1 = scmp.lt.s32.totalorder %s8748_s2, %s9114_s1 }
  0x8e   : > { %p8402_p12 = scmp.ne.s32.totalorder %s8748_s2, %s8401_s21  ;;  %p8407_p11 = scmp.lt.s32.totalorder %s8405_s19, %s8401_s21 }
  0x90   : > { %p8403_p2 = pnand %p8402_p12, %p6247_p5  ;;  %p8408_p3 = por %p8407_p11, %p8406_p1 }
  0x92   : > { %p8404_p4 = pneg %p8403_p2 }
  0x94   : > { %p8409_p7 = pnand %p8408_p3, %p8404_p4 }
  0x96   : > { %8412 = shalt.err (!%p8409_p7)
}
  0x97   : > { %s8413_s9 = scalar_lea.vmem %s8750_s22, %s8737_s8  ;;  %s8521_s18 = smov [#allocation5]  }
  0x98   : > { %p8414_p0 = scmp.ne.s32.totalorder %s8750_s22, %s8413_s9  ;;  %s8417_s11 = sshll.u32 %s8521_s18, 4  ;;  %s8418_s11 = int_to_ptr.vmem [resolvable:$false] %s8417_s11 }
  0x99   : > { %s8419_s30 = scalar_lea.vmem %s8418_s11, 3072  ;;  %p8420_p10 = scmp.lt.s32.totalorder %s8750_s22, %s8418_s11 }
  0x9a   : > { %p8415_p9 = pnand %p8414_p0, %p6247_p5  ;;  %p8421_p6 = scmp.lt.s32.totalorder %s8419_s30, %s8413_s9 }
  0x9c   : > { %p8416_p8 = pneg %p8415_p9  ;;  %p8422_p12 = por %p8421_p6, %p8420_p10 }
  0x9e   : > { %p8423_p2 = pnand %p8422_p12, %p8416_p8 }
  0xa0   : > { %8426 = shalt.err (!%p8423_p2)
}
  0xa1   : > { %s8522_s10 = smov 768   ;;  %s8523_s21 = smov 48  }
  0xa2   : > { %344 = dma.hbm_to_vmem [thread:$0]  (%p6247_p5), %s8748_s2, %s8737_s8, %s8750_s22, %s8740_s16, %s8522_s10, %s8522_s10, %s8523_s21  }
  0xa3 PF: > { %350 = sbr.rel (%p8627_p13) target bundleno = 1329 (0x531), region = 48  ;;  %s8779_s23 = sand.u32 (!%p8627_p13), 1, %s8499_s25  }
  0xa4   : > { %s6252_s20 = sshll.u32 (!%p8627_p13), %s8779_s23, 8  ;;  %s353_s19 = scalar_lea.sflag (!%p8627_p13), [#allocation3], %s8779_s23 }
  0xa5   : > { %s8783_s29 = scalar_lea.vmem (!%p8627_p13), [#allocation2], %s6252_s20  ;;  %p9141_p4 = scmp.ne.s32.totalorder (!%p8627_p13), %s9132_s12, 0 }
  0xa8   : > { %8470 = dma.done.wait (%p9141_p4), %s353_s19, 4096  }
  0xa9   : > { %8472 = vsyncadd (%p9141_p4), %s353_s19, 4294963200  ;;  %s361_s15 = sand.u32 1, %s8588_s28   ;;  %s7055_s8 = smul.u32 96, %s8779_s23 }
  0xaa   : > { %s362_s16 = scalar_lea.sflag [#allocation6], %s361_s15 }
  0xab   : > { %s8791_s22 = scalar_lea.vmem [#allocation5], %s7055_s8 }
  0xac   : > { %8474 = dma.done.wait (%p9141_p4), %s362_s16, 1536  }
  0xad   : > { %8476 = vsyncadd (%p9141_p4), %s362_s16, 4294965760  ;;  %p9142_p13 = scmp.eq.s32.totalorder %s8588_s28, 0 }
  0xaf   : > { %8478 = dma.done.wait (%p9142_p13), [#allocation6], 65536   ;;  %p9143_p5 = pmov %p9142_p13 }
  0xb1   : > { %8480 = vsyncadd (%p9143_p5), [#allocation6], 4294901760  ;;  %p9144_p1 = pmov %p9143_p5 }
  0xb3   : > { %8482 = dma.done.wait (%p9144_p1), [#allocation9], 24640   ;;  %p9145_p11 = pmov %p9144_p1 }
  0xb4   : > { %p9146_p3 = pmov %p9144_p1 }
  0xb5   : > { %8484 = vsyncadd (%p9145_p11), [#allocation9], 4294942656 }
  0xb6   : > { %8486 = dma.done.wait (%p9146_p3), [#allocation12], 4112   ;;  %p9147_p7 = pmov %p9144_p1 }
  0xb7   : > { %v7157_v0 = vld [vmem:[#allocation8 + $0xe4] ss:$16 sps:$4 sm:$0xff]   ;;  %v7161_v2 = vld [vmem:[#allocation8 + $0xe0] ss:$16 sps:$4 sm:$0xff]   ;;  %v488_v46 = vld [vmem:[%s8791_s22 + $0x8] sm:$0xff]  ;;  %s6258_s12 = sshll.u32 %s8779_s23, 4 }
  0xb8   : > { %8488 = vsyncadd (%p9147_p7), [#allocation12], 4294963184  ;;  %v7159_v1 = vld [vmem:[#allocation8 + $0x2e4] ss:$16 sps:$4 sm:$0xff]   ;;  %2169 = vmatprep.subr.bf16.mxu0 %v7157_v0  ;;  %v7162_v3 = vld [vmem:[#allocation8 + $0x2e0] ss:$16 sps:$4 sm:$0xff]  }
  0xb9   : > { %2212 = vmatprep.subr.bf16.mxu1 %v7159_v1  ;;  %v7163_v4 = vld [vmem:[#allocation8 + $0xc4] ss:$16 sps:$4 sm:$0xff]   ;;  %2170 = vmatpush1.bf16.msra.mxu0 %v7161_v2  ;;  %v7167_v6 = vld [vmem:[#allocation8 + $0xc0] ss:$16 sps:$4 sm:$0xff]   ;;  %v494_v47 = vld [vmem:[%s8791_s22 + $0x38] sm:$0xff]  ;;  %s420_s2 = scalar_lea.vmem [#allocation14], %s6258_s12 }
  0xba   : > { %2213 = vmatpush1.bf16.msra.mxu1 %v7162_v3  ;;  %v7165_v5 = vld [vmem:[#allocation8 + $0x2c4] ss:$16 sps:$4 sm:$0xff]   ;;  %2171 = vmatprep.subr.bf16.mxu0 %v7163_v4  ;;  %v7168_v7 = vld [vmem:[#allocation8 + $0x2c0] ss:$16 sps:$4 sm:$0xff]   ;;  %v490_v48 = vld [vmem:[%s8791_s22 + $0x18] sm:$0xff]  ;;  %v500_v53 = vpack.c.bf16 %v494_v47, %v488_v46  ;;  %s6065_s17 = scalar_lea.sflag [#allocation4], %s8779_s23 }
  0xbb   : > { %2214 = vmatprep.subr.bf16.mxu1 %v7165_v5  ;;  %v7169_v8 = vld [vmem:[#allocation8 + $0xa4] ss:$16 sps:$4 sm:$0xff]   ;;  %v7173_v10 = vld [vmem:[#allocation8 + $0xa0] ss:$16 sps:$4 sm:$0xff]   ;;  %v496_v49 = vld [vmem:[%s8791_s22 + $0x48] sm:$0xff]  ;;  %p9148_p0 = scmp.ne.s32.totalorder %s9133_s13, 0 }
  0xbc   : > { %v7171_v9 = vld [vmem:[#allocation8 + $0x2a4] ss:$16 sps:$4 sm:$0xff]   ;;  %v7174_v11 = vld [vmem:[#allocation8 + $0x2a0] ss:$16 sps:$4 sm:$0xff]   ;;  %v8813_v54 = vpack.c.bf16 %v496_v49, %v490_v48  ;;  %2201 = vmatprep.mubr.bf16.mxu0 %v500_v53  ;;  %v7298_v46 = vld [vmem:[#allocation8 + $0x8] ss:$16 sps:$4 sm:$0xff]  }
  0xbd   : > { %2172 = vmatpush1.bf16.msra.mxu0 %v7167_v6  ;;  %v7175_v12 = vld [vmem:[#allocation8 + $0x84] ss:$16 sps:$4 sm:$0xff]   ;;  %v7179_v14 = vld [vmem:[#allocation8 + $0x80] ss:$16 sps:$4 sm:$0xff]   ;;  %v7306_v48 = vld [vmem:[#allocation8 + $0x1ec] ss:$16 sps:$4 sm:$0xff]  }
  0xbe   : > { %2215 = vmatpush1.bf16.msra.mxu1 %v7168_v7  ;;  %2173 = vmatprep.subr.bf16.mxu0 %v7169_v8  ;;  %v7177_v13 = vld [vmem:[#allocation8 + $0x284] ss:$16 sps:$4 sm:$0xff]   ;;  %v7180_v15 = vld [vmem:[#allocation8 + $0x280] ss:$16 sps:$4 sm:$0xff]   ;;  %s6997_s9 = sshll.u32 (%p9148_p0), %s8588_s28, 1 }
  0xbf   : > { %2216 = vmatprep.subr.bf16.mxu1 %v7171_v9  ;;  %v7181_v16 = vld [vmem:[#allocation8 + $0x64] ss:$16 sps:$4 sm:$0xff]   ;;  %v7185_v18 = vld [vmem:[#allocation8 + $0x60] ss:$16 sps:$4 sm:$0xff]   ;;  %2244 = vmatprep.mubr.bf16.mxu1 %v8813_v54  ;;  %s6073_s18 = ssub.s32 (%p9148_p0), 3, %s6997_s9 }
  0xc0   : > { %v7183_v17 = vld [vmem:[#allocation8 + $0x264] ss:$16 sps:$4 sm:$0xff]   ;;  %v7186_v19 = vld [vmem:[#allocation8 + $0x260] ss:$16 sps:$4 sm:$0xff]   ;;  %p6074_p9 = scmp.lt.s32.totalorder (%p9148_p0), %s6073_s18, 2 }
  0xc1   : > { %2174 = vmatpush1.bf16.msra.mxu0 %v7173_v10  ;;  %v7187_v20 = vld [vmem:[#allocation8 + $0x44] ss:$16 sps:$4 sm:$0xff]   ;;  %v7191_v22 = vld [vmem:[#allocation8 + $0x40] ss:$16 sps:$4 sm:$0xff]  }
  0xc2   : > { %2217 = vmatpush1.bf16.msra.mxu1 %v7174_v11  ;;  %2175 = vmatprep.subr.bf16.mxu0 %v7175_v12  ;;  %v7189_v21 = vld [vmem:[#allocation8 + $0x244] ss:$16 sps:$4 sm:$0xff]   ;;  %v7192_v23 = vld [vmem:[#allocation8 + $0x240] ss:$16 sps:$4 sm:$0xff]   ;;  %v7258_v11 = vld [vmem:[#allocation8 + $0xec] ss:$16 sps:$4 sm:$0xff]  }
  0xc3   : > { %2218 = vmatprep.subr.bf16.mxu1 %v7177_v13  ;;  %v7193_v24 = vld [vmem:[#allocation8 + $0x24] ss:$16 sps:$4 sm:$0xff]   ;;  %v7197_v26 = vld [vmem:[#allocation8 + $0x20] ss:$16 sps:$4 sm:$0xff]  }
  0xc4   : > { %v7195_v25 = vld [vmem:[#allocation8 + $0x224] ss:$16 sps:$4 sm:$0xff]   ;;  %v7198_v27 = vld [vmem:[#allocation8 + $0x220] ss:$16 sps:$4 sm:$0xff]  }
  0xc5   : > { %2176 = vmatpush1.bf16.msra.mxu0 %v7179_v14  ;;  %v7199_v28 = vld [vmem:[#allocation8 + $0x4] ss:$16 sps:$4 sm:$0xff]   ;;  %v7203_v30 = vld [vmem:[#allocation8] ss:$16 sps:$4 sm:$0xff]  }
  0xc6   : > { %2219 = vmatpush1.bf16.msra.mxu1 %v7180_v15  ;;  %2177 = vmatprep.subr.bf16.mxu0 %v7181_v16  ;;  %v7201_v29 = vld [vmem:[#allocation8 + $0x204] ss:$16 sps:$4 sm:$0xff]   ;;  %v7204_v31 = vld [vmem:[#allocation8 + $0x200] ss:$16 sps:$4 sm:$0xff]   ;;  %v7256_v15 = vld [vmem:[#allocation8 + $0xe8] ss:$16 sps:$4 sm:$0xff]  }
  0xc7   : > { %2220 = vmatprep.subr.bf16.mxu1 %v7183_v17  ;;  %v7205_v32 = vld [vmem:[#allocation8 + $0x1e4] ss:$16 sps:$4 sm:$0xff]   ;;  %v7209_v34 = vld [vmem:[#allocation8 + $0x1e0] ss:$16 sps:$4 sm:$0xff]   ;;  %v7264_v17 = vld [vmem:[#allocation8 + $0xcc] ss:$16 sps:$4 sm:$0xff]  }
  0xc8   : > { %v7207_v33 = vld [vmem:[#allocation8 + $0x3e4] ss:$16 sps:$4 sm:$0xff]   ;;  %v7210_v35 = vld [vmem:[#allocation8 + $0x3e0] ss:$16 sps:$4 sm:$0xff]  }
  0xc9   : > { %2178 = vmatpush1.bf16.msra.mxu0 %v7185_v18  ;;  %v7211_v36 = vld [vmem:[#allocation8 + $0x1c4] ss:$16 sps:$4 sm:$0xff]   ;;  %v7215_v38 = vld [vmem:[#allocation8 + $0x1c0] ss:$16 sps:$4 sm:$0xff]  }
  0xca   : > { %2221 = vmatpush1.bf16.msra.mxu1 %v7186_v19  ;;  %2179 = vmatprep.subr.bf16.mxu0 %v7187_v20  ;;  %v7213_v37 = vld [vmem:[#allocation8 + $0x3c4] ss:$16 sps:$4 sm:$0xff]   ;;  %v7216_v39 = vld [vmem:[#allocation8 + $0x3c0] ss:$16 sps:$4 sm:$0xff]   ;;  %v7262_v19 = vld [vmem:[#allocation8 + $0xc8] ss:$16 sps:$4 sm:$0xff]  }
  0xcb   : > { %2222 = vmatprep.subr.bf16.mxu1 %v7189_v21  ;;  %v7217_v40 = vld [vmem:[#allocation8 + $0x1a4] ss:$16 sps:$4 sm:$0xff]   ;;  %v7221_v42 = vld [vmem:[#allocation8 + $0x1a0] ss:$16 sps:$4 sm:$0xff]   ;;  %v7270_v21 = vld [vmem:[#allocation8 + $0xac] ss:$16 sps:$4 sm:$0xff]  }
  0xcc   : > { %v7219_v41 = vld [vmem:[#allocation8 + $0x3a4] ss:$16 sps:$4 sm:$0xff]   ;;  %v7222_v43 = vld [vmem:[#allocation8 + $0x3a0] ss:$16 sps:$4 sm:$0xff]  }
  0xcd   : > { %2180 = vmatpush1.bf16.msra.mxu0 %v7191_v22  ;;  %v7223_v44 = vld [vmem:[#allocation8 + $0x184] ss:$16 sps:$4 sm:$0xff]   ;;  %v7227_v50 = vld [vmem:[#allocation8 + $0x180] ss:$16 sps:$4 sm:$0xff]  }
  0xce   : > { %2223 = vmatpush1.bf16.msra.mxu1 %v7192_v23  ;;  %2181 = vmatprep.subr.bf16.mxu0 %v7193_v24  ;;  %v7225_v45 = vld [vmem:[#allocation8 + $0x384] ss:$16 sps:$4 sm:$0xff]   ;;  %v7228_v51 = vld [vmem:[#allocation8 + $0x380] ss:$16 sps:$4 sm:$0xff]   ;;  %v7268_v23 = vld [vmem:[#allocation8 + $0xa8] ss:$16 sps:$4 sm:$0xff]  }
  0xcf   : > { %2224 = vmatprep.subr.bf16.mxu1 %v7195_v25  ;;  %v7229_v52 = vld [vmem:[#allocation8 + $0x164] ss:$16 sps:$4 sm:$0xff]   ;;  %v7233_v56 = vld [vmem:[#allocation8 + $0x160] ss:$16 sps:$4 sm:$0xff]   ;;  %v7276_v25 = vld [vmem:[#allocation8 + $0x8c] ss:$16 sps:$4 sm:$0xff]  }
  0xd0   : > { %v7231_v55 = vld [vmem:[#allocation8 + $0x364] ss:$16 sps:$4 sm:$0xff]   ;;  %v7234_v57 = vld [vmem:[#allocation8 + $0x360] ss:$16 sps:$4 sm:$0xff]  }
  0xd1   : > { %2182 = vmatpush1.bf16.msra.mxu0 %v7197_v26  ;;  %v7235_v58 = vld [vmem:[#allocation8 + $0x144] ss:$16 sps:$4 sm:$0xff]   ;;  %v7239_v60 = vld [vmem:[#allocation8 + $0x140] ss:$16 sps:$4 sm:$0xff]  }
  0xd2   : > { %2225 = vmatpush1.bf16.msra.mxu1 %v7198_v27  ;;  %2183 = vmatprep.subr.bf16.mxu0 %v7199_v28  ;;  %v7237_v59 = vld [vmem:[#allocation8 + $0x344] ss:$16 sps:$4 sm:$0xff]   ;;  %v7240_v61 = vld [vmem:[#allocation8 + $0x340] ss:$16 sps:$4 sm:$0xff]   ;;  %v7274_v27 = vld [vmem:[#allocation8 + $0x88] ss:$16 sps:$4 sm:$0xff]  }
  0xd3   : > { %2226 = vmatprep.subr.bf16.mxu1 %v7201_v29  ;;  %v7241_v62 = vld [vmem:[#allocation8 + $0x124] ss:$16 sps:$4 sm:$0xff]   ;;  %v7245_v0 = vld [vmem:[#allocation8 + $0x120] ss:$16 sps:$4 sm:$0xff]   ;;  %v7282_v29 = vld [vmem:[#allocation8 + $0x6c] ss:$16 sps:$4 sm:$0xff]  }
  0xd4   : > { %v7243_v63 = vld [vmem:[#allocation8 + $0x324] ss:$16 sps:$4 sm:$0xff]   ;;  %v7246_v1 = vld [vmem:[#allocation8 + $0x320] ss:$16 sps:$4 sm:$0xff]  }
  0xd5   : > { %2184 = vmatpush1.bf16.msra.mxu0 %v7203_v30  ;;  %v7247_v2 = vld [vmem:[#allocation8 + $0x104] ss:$16 sps:$4 sm:$0xff]   ;;  %v7251_v4 = vld [vmem:[#allocation8 + $0x100] ss:$16 sps:$4 sm:$0xff]  }
  0xd6   : > { %2227 = vmatpush1.bf16.msra.mxu1 %v7204_v31  ;;  %2185 = vmatprep.subr.bf16.mxu0 %v7205_v32  ;;  %v7249_v3 = vld [vmem:[#allocation8 + $0x304] ss:$16 sps:$4 sm:$0xff]   ;;  %v7252_v5 = vld [vmem:[#allocation8 + $0x300] ss:$16 sps:$4 sm:$0xff]   ;;  %v7280_v31 = vld [vmem:[#allocation8 + $0x68] ss:$16 sps:$4 sm:$0xff]  }
  0xd7   : > { %2228 = vmatprep.subr.bf16.mxu1 %v7207_v33  ;;  %v487_v6 = vld [vmem:[%s8791_s22] sm:$0xff]  ;;  %v493_v7 = vld [vmem:[%s8791_s22 + $0x30] sm:$0xff]  ;;  %v7288_v33 = vld [vmem:[#allocation8 + $0x4c] ss:$16 sps:$4 sm:$0xff]  }
  0xd8   : > { %v489_v8 = vld [vmem:[%s8791_s22 + $0x10] sm:$0xff]  ;;  %v495_v9 = vld [vmem:[%s8791_s22 + $0x40] sm:$0xff]  ;;  %v8820_v12 = vpack.c.bf16 %v493_v7, %v487_v6  ;;  %v7334_v7 = vld [vmem:[#allocation8 + $0x148] ss:$16 sps:$4 sm:$0xff]  }
  0xd9   : > { %2186 = vmatpush2.bf16.msra.mxu0 %v7209_v34  ;;  %v7255_v10 = vld [vmem:[#allocation8 + $0x4e4] ss:$16 sps:$4 sm:$0xff]   ;;  %v8822_v13 = vpack.c.bf16 %v495_v9, %v489_v8  ;;  %v7253_v14 = vld [vmem:[#allocation8 + $0x4e0] ss:$16 sps:$4 sm:$0xff]   ;;  %v7342_v9 = vld [vmem:[#allocation8 + $0x12c] ss:$16 sps:$4 sm:$0xff]  }
  0xda   : > { %2229 = vmatpush2.bf16.msra.mxu1 %v7210_v35  ;;  %2187 = vmatprep.subr.bf16.mxu0 %v7211_v36  ;;  %v7261_v16 = vld [vmem:[#allocation8 + $0x4c4] ss:$16 sps:$4 sm:$0xff]   ;;  %v7259_v18 = vld [vmem:[#allocation8 + $0x4c0] ss:$16 sps:$4 sm:$0xff]   ;;  %v7286_v35 = vld [vmem:[#allocation8 + $0x48] ss:$16 sps:$4 sm:$0xff]  }
  0xdb   : > { %2230 = vmatprep.subr.bf16.mxu1 %v7213_v37  ;;  %v7267_v20 = vld [vmem:[#allocation8 + $0x4a4] ss:$16 sps:$4 sm:$0xff]   ;;  %v7265_v22 = vld [vmem:[#allocation8 + $0x4a0] ss:$16 sps:$4 sm:$0xff]   ;;  %v7294_v37 = vld [vmem:[#allocation8 + $0x2c] ss:$16 sps:$4 sm:$0xff]  }
  0xdc   : > { %v7273_v24 = vld [vmem:[#allocation8 + $0x484] ss:$16 sps:$4 sm:$0xff]   ;;  %v7271_v26 = vld [vmem:[#allocation8 + $0x480] ss:$16 sps:$4 sm:$0xff]  }
  0xdd   : > { %2188 = vmatpush2.bf16.msra.mxu0 %v7215_v38  ;;  %v7279_v28 = vld [vmem:[#allocation8 + $0x464] ss:$16 sps:$4 sm:$0xff]   ;;  %v7277_v30 = vld [vmem:[#allocation8 + $0x460] ss:$16 sps:$4 sm:$0xff]  }
  0xde   : > { %2231 = vmatpush2.bf16.msra.mxu1 %v7216_v39  ;;  %2189 = vmatprep.subr.bf16.mxu0 %v7217_v40  ;;  %v7285_v32 = vld [vmem:[#allocation8 + $0x444] ss:$16 sps:$4 sm:$0xff]   ;;  %v7283_v34 = vld [vmem:[#allocation8 + $0x440] ss:$16 sps:$4 sm:$0xff]   ;;  %v7292_v39 = vld [vmem:[#allocation8 + $0x28] ss:$16 sps:$4 sm:$0xff]  }
  0xdf   : > { %2232 = vmatprep.subr.bf16.mxu1 %v7219_v41  ;;  %v7291_v36 = vld [vmem:[#allocation8 + $0x424] ss:$16 sps:$4 sm:$0xff]   ;;  %v7289_v38 = vld [vmem:[#allocation8 + $0x420] ss:$16 sps:$4 sm:$0xff]   ;;  %v492_v41 = vld [vmem:[%s8791_s22 + $0x28] sm:$0xff] }
  0xe0   : > { %v7297_v40 = vld [vmem:[#allocation8 + $0x404] ss:$16 sps:$4 sm:$0xff]   ;;  %v7301_v49 = vld [vmem:[#allocation8 + $0x5e0] ss:$16 sps:$4 sm:$0xff]  }
  0xe1   : > { %2190 = vmatpush2.bf16.msra.mxu0 %v7221_v42  ;;  %v498_v42 = vld [vmem:[%s8791_s22 + $0x58] sm:$0xff]  ;;  %v7303_v47 = vld [vmem:[#allocation8 + $0x5e4] ss:$16 sps:$4 sm:$0xff]   ;;  %v7331_v6 = vld [vmem:[#allocation8 + $0x540] ss:$16 sps:$4 sm:$0xff]  }
  0xe2   : > { %2233 = vmatpush2.bf16.msra.mxu1 %v7222_v43  ;;  %2191 = vmatprep.subr.bf16.mxu0 %v7223_v44  ;;  %v7300_v43 = vld [vmem:[#allocation8 + $0xc] ss:$16 sps:$4 sm:$0xff]   ;;  %v8828_v44 = vpack.c.bf16 %v498_v42, %v492_v41  ;;  %v7339_v8 = vld [vmem:[#allocation8 + $0x524] ss:$16 sps:$4 sm:$0xff]   ;;  %v7379_v41 = vld [vmem:[#allocation8 + $0x248] ss:$16 sps:$4 sm:$0xff]  }
  0xe3   : > { %2234 = vmatprep.subr.bf16.mxu1 %v7225_v45  ;;  %v7295_v45 = vld [vmem:[#allocation8 + $0x400] ss:$16 sps:$4 sm:$0xff]   ;;  %v7382_v42 = vld [vmem:[#allocation8 + $0x448] ss:$16 sps:$4 sm:$0xff]  }
  0xe5   : > { %2192 = vmatpush2.bf16.msra.mxu0 %v7227_v50  ;;  %v7304_v50 = vld [vmem:[#allocation8 + $0x1e8] ss:$16 sps:$4 sm:$0xff]  }
  0xe6   : > { %2235 = vmatpush2.bf16.msra.mxu1 %v7228_v51  ;;  %2193 = vmatprep.subr.bf16.mxu0 %v7229_v52  ;;  %v7309_v51 = vld [vmem:[#allocation8 + $0x5c4] ss:$16 sps:$4 sm:$0xff]   ;;  %v7312_v52 = vld [vmem:[#allocation8 + $0x1cc] ss:$16 sps:$4 sm:$0xff]  }
  0xe7   : > { %2236 = vmatprep.subr.bf16.mxu1 %v7231_v55  ;;  %v7310_v55 = vld [vmem:[#allocation8 + $0x1c8] ss:$16 sps:$4 sm:$0xff]  }
  0xe9   : > { %2194 = vmatpush2.bf16.msra.mxu0 %v7233_v56  ;;  %v7315_v56 = vld [vmem:[#allocation8 + $0x5a4] ss:$16 sps:$4 sm:$0xff]  }
  0xea   : > { %2237 = vmatpush2.bf16.msra.mxu1 %v7234_v57  ;;  %2195 = vmatprep.subr.bf16.mxu0 %v7235_v58  ;;  %v7318_v57 = vld [vmem:[#allocation8 + $0x1ac] ss:$16 sps:$4 sm:$0xff]   ;;  %v7313_v58 = vld [vmem:[#allocation8 + $0x5a0] ss:$16 sps:$4 sm:$0xff]  }
  0xeb   : > { %2238 = vmatprep.subr.bf16.mxu1 %v7237_v59  ;;  %v7316_v59 = vld [vmem:[#allocation8 + $0x1a8] ss:$16 sps:$4 sm:$0xff]  }
  0xed   : > { %2196 = vmatpush2.bf16.msra.mxu0 %v7239_v60  ;;  %v7321_v60 = vld [vmem:[#allocation8 + $0x584] ss:$16 sps:$4 sm:$0xff]  }
  0xee   : > { %2239 = vmatpush2.bf16.msra.mxu1 %v7240_v61  ;;  %2197 = vmatprep.subr.bf16.mxu0 %v7241_v62  ;;  %v7324_v61 = vld [vmem:[#allocation8 + $0x18c] ss:$16 sps:$4 sm:$0xff]   ;;  %v7319_v62 = vld [vmem:[#allocation8 + $0x580] ss:$16 sps:$4 sm:$0xff]  }
  0xef   : > { %2240 = vmatprep.subr.bf16.mxu1 %v7243_v63  ;;  %v7322_v63 = vld [vmem:[#allocation8 + $0x188] ss:$16 sps:$4 sm:$0xff]  }
  0xf1   : > { %2198 = vmatpush2.bf16.msra.mxu0 %v7245_v0  ;;  %v7327_v0 = vld [vmem:[#allocation8 + $0x564] ss:$16 sps:$4 sm:$0xff]  }
  0xf2   : > { %2241 = vmatpush2.bf16.msra.mxu1 %v7246_v1  ;;  %2199 = vmatprep.subr.bf16.mxu0 %v7247_v2  ;;  %v7330_v1 = vld [vmem:[#allocation8 + $0x16c] ss:$16 sps:$4 sm:$0xff]   ;;  %v7325_v2 = vld [vmem:[#allocation8 + $0x560] ss:$16 sps:$4 sm:$0xff]  }
  0xf3   : > { %2242 = vmatprep.subr.bf16.mxu1 %v7249_v3  ;;  %v7328_v3 = vld [vmem:[#allocation8 + $0x168] ss:$16 sps:$4 sm:$0xff]  }
  0xf5   : > { %2200 = vmatpush2.bf16.msra.mxu0 %v7251_v4  ;;  %v7333_v4 = vld [vmem:[#allocation8 + $0x544] ss:$16 sps:$4 sm:$0xff]  }
  0xf6   : > { %2243 = vmatpush2.bf16.msra.mxu1 %v7252_v5  ;;  %2255 = vmatprep.subr.bf16.mxu0 %v7255_v10  ;;  %v7336_v5 = vld [vmem:[#allocation8 + $0x14c] ss:$16 sps:$4 sm:$0xff]   ;;  %v7337_v10 = vld [vmem:[#allocation8 + $0x520] ss:$16 sps:$4 sm:$0xff]  }
  0xf7   : > { %2298 = vmatprep.subr.bf16.mxu1 %v7258_v11  ;;  %v7340_v11 = vld [vmem:[#allocation8 + $0x128] ss:$16 sps:$4 sm:$0xff]  }
  0xf8   : > { %2202 = vmatmul.mubr.bf16.vlgmr.msra.gmra.mxu0 %v8820_v12 }
  0xf9   : > { %2245 = vmatmul.mubr.bf16.vlgmr.msra.gmra.mxu1 %v8822_v13  ;;  %2256 = vmatpush1.bf16.msra.mxu0 %v7253_v14  ;;  %v7345_v14 = vld [vmem:[#allocation8 + $0x504] ss:$16 sps:$4 sm:$0xff]  }
  0xfa   : > { %2299 = vmatpush1.bf16.msra.mxu1 %v7256_v15  ;;  %2257 = vmatprep.subr.bf16.mxu0 %v7261_v16  ;;  %v7348_v15 = vld [vmem:[#allocation8 + $0x10c] ss:$16 sps:$4 sm:$0xff]   ;;  %v7343_v16 = vld [vmem:[#allocation8 + $0x500] ss:$16 sps:$4 sm:$0xff]  }
  0xfb   : > { %2300 = vmatprep.subr.bf16.mxu1 %v7264_v17  ;;  %2330 = vmatprep.mubr.bf16.mxu1 %v500_v53  ;;  %v7307_v53 = vld [vmem:[#allocation8 + $0x5c0] ss:$16 sps:$4 sm:$0xff]   ;;  %v7346_v17 = vld [vmem:[#allocation8 + $0x108] ss:$16 sps:$4 sm:$0xff]  }
  0xfc   : > { %2287 = vmatprep.mubr.bf16.mxu0 %v8828_v44 }
  0xfd   : > { %2258 = vmatpush1.bf16.msra.mxu0 %v7259_v18  ;;  %v491_v18 = vld [vmem:[%s8791_s22 + $0x20] sm:$0xff] }
  0xfe   : > { %2301 = vmatpush1.bf16.msra.mxu1 %v7262_v19  ;;  %2259 = vmatprep.subr.bf16.mxu0 %v7267_v20  ;;  %v497_v19 = vld [vmem:[%s8791_s22 + $0x50] sm:$0xff]  ;;  %v7351_v20 = vld [vmem:[#allocation8 + $0x2ec] ss:$16 sps:$4 sm:$0xff]  }
  0xff   : > { %2302 = vmatprep.subr.bf16.mxu1 %v7270_v21  ;;  %v7354_v21 = vld [vmem:[#allocation8 + $0x4ec] ss:$16 sps:$4 sm:$0xff]  }
 0x101   : > { %2260 = vmatpush1.bf16.msra.mxu0 %v7265_v22  ;;  %v8833_v22 = vpack.c.bf16 %v497_v19, %v491_v18  ;;  %v7441_v18 = vld [vmem:[#allocation8 + $0x30c] ss:$16 sps:$4 sm:$0xff]  }
 0x102   : > { %2303 = vmatpush1.bf16.msra.mxu1 %v7268_v23  ;;  %2261 = vmatprep.subr.bf16.mxu0 %v7273_v24  ;;  %v7349_v23 = vld [vmem:[#allocation8 + $0x2e8] ss:$16 sps:$4 sm:$0xff]   ;;  %v7444_v19 = vld [vmem:[#allocation8 + $0x50c] ss:$16 sps:$4 sm:$0xff]  }
 0x103   : > { %2304 = vmatprep.subr.bf16.mxu1 %v7276_v25  ;;  %v7352_v24 = vld [vmem:[#allocation8 + $0x4e8] ss:$16 sps:$4 sm:$0xff]   ;;  %v7357_v25 = vld [vmem:[#allocation8 + $0x2cc] ss:$16 sps:$4 sm:$0xff]  }
 0x105   : > { %2262 = vmatpush1.bf16.msra.mxu0 %v7271_v26  ;;  %v7360_v26 = vld [vmem:[#allocation8 + $0x4cc] ss:$16 sps:$4 sm:$0xff]  }
 0x106   : > { %2305 = vmatpush1.bf16.msra.mxu1 %v7274_v27  ;;  %2263 = vmatprep.subr.bf16.mxu0 %v7279_v28  ;;  %v7355_v27 = vld [vmem:[#allocation8 + $0x2c8] ss:$16 sps:$4 sm:$0xff]  }
 0x107   : > { %2306 = vmatprep.subr.bf16.mxu1 %v7282_v29  ;;  %v7358_v28 = vld [vmem:[#allocation8 + $0x4c8] ss:$16 sps:$4 sm:$0xff]   ;;  %v7363_v29 = vld [vmem:[#allocation8 + $0x2ac] ss:$16 sps:$4 sm:$0xff]  }
 0x109   : > { %2264 = vmatpush1.bf16.msra.mxu0 %v7277_v30  ;;  %v7366_v30 = vld [vmem:[#allocation8 + $0x4ac] ss:$16 sps:$4 sm:$0xff]  }
 0x10a   : > { %2307 = vmatpush1.bf16.msra.mxu1 %v7280_v31  ;;  %2265 = vmatprep.subr.bf16.mxu0 %v7285_v32  ;;  %v7361_v31 = vld [vmem:[#allocation8 + $0x2a8] ss:$16 sps:$4 sm:$0xff]  }
 0x10b   : > { %2308 = vmatprep.subr.bf16.mxu1 %v7288_v33  ;;  %v7364_v32 = vld [vmem:[#allocation8 + $0x4a8] ss:$16 sps:$4 sm:$0xff]   ;;  %v7369_v33 = vld [vmem:[#allocation8 + $0x28c] ss:$16 sps:$4 sm:$0xff]  }
 0x10d   : > { %2266 = vmatpush1.bf16.msra.mxu0 %v7283_v34  ;;  %v7367_v34 = vld [vmem:[#allocation8 + $0x288] ss:$16 sps:$4 sm:$0xff]  }
 0x10e   : > { %2309 = vmatpush1.bf16.msra.mxu1 %v7286_v35  ;;  %2267 = vmatprep.subr.bf16.mxu0 %v7291_v36  ;;  %v7370_v35 = vld [vmem:[#allocation8 + $0x488] ss:$16 sps:$4 sm:$0xff]   ;;  %v7375_v36 = vld [vmem:[#allocation8 + $0x26c] ss:$16 sps:$4 sm:$0xff]  }
 0x10f   : > { %2310 = vmatprep.subr.bf16.mxu1 %v7294_v37  ;;  %v7378_v37 = vld [vmem:[#allocation8 + $0x46c] ss:$16 sps:$4 sm:$0xff]  }
 0x111   : > { %2268 = vmatpush1.bf16.msra.mxu0 %v7289_v38  ;;  %v7373_v38 = vld [vmem:[#allocation8 + $0x268] ss:$16 sps:$4 sm:$0xff]  }
 0x112   : > { %2311 = vmatpush1.bf16.msra.mxu1 %v7292_v39  ;;  %2269 = vmatprep.subr.bf16.mxu0 %v7297_v40  ;;  %v7381_v39 = vld [vmem:[#allocation8 + $0x24c] ss:$16 sps:$4 sm:$0xff]  }
 0x113   : > { %2312 = vmatprep.subr.bf16.mxu1 %v7300_v43  ;;  %v7384_v40 = vld [vmem:[#allocation8 + $0x44c] ss:$16 sps:$4 sm:$0xff]  }
 0x114   : > { %v7387_v43 = vld [vmem:[#allocation8 + $0x22c] ss:$16 sps:$4 sm:$0xff]  }
 0x115   : > { %2270 = vmatpush1.bf16.msra.mxu0 %v7295_v45  ;;  %v7385_v45 = vld [vmem:[#allocation8 + $0x228] ss:$16 sps:$4 sm:$0xff]  }
 0x116   : > { %2313 = vmatpush1.bf16.msra.mxu1 %v7298_v46  ;;  %2271 = vmatprep.subr.bf16.mxu0 %v7303_v47  ;;  %v7388_v46 = vld [vmem:[#allocation8 + $0x428] ss:$16 sps:$4 sm:$0xff]   ;;  %v7393_v47 = vld [vmem:[#allocation8 + $0x20c] ss:$16 sps:$4 sm:$0xff]  }
 0x117   : > { %2314 = vmatprep.subr.bf16.mxu1 %v7306_v48  ;;  %v7396_v48 = vld [vmem:[#allocation8 + $0x40c] ss:$16 sps:$4 sm:$0xff]  }
 0x119   : > { %2272 = vmatpush2.bf16.msra.mxu0 %v7301_v49  ;;  %v7391_v49 = vld [vmem:[#allocation8 + $0x208] ss:$16 sps:$4 sm:$0xff]  }
 0x11a   : > { %2315 = vmatpush2.bf16.msra.mxu1 %v7304_v50  ;;  %2273 = vmatprep.subr.bf16.mxu0 %v7309_v51  ;;  %v7394_v50 = vld [vmem:[#allocation8 + $0x408] ss:$16 sps:$4 sm:$0xff]   ;;  %v7399_v51 = vld [vmem:[#allocation8 + $0x3ec] ss:$16 sps:$4 sm:$0xff]  }
 0x11b   : > { %2316 = vmatprep.subr.bf16.mxu1 %v7312_v52  ;;  %v7402_v52 = vld [vmem:[#allocation8 + $0x5ec] ss:$16 sps:$4 sm:$0xff]  }
 0x11d   : > { %2274 = vmatpush2.bf16.msra.mxu0 %v7307_v53  ;;  %v7397_v53 = vld [vmem:[#allocation8 + $0x3e8] ss:$16 sps:$4 sm:$0xff]  }
 0x11e   : > { %2317 = vmatpush2.bf16.msra.mxu1 %v7310_v55  ;;  %2275 = vmatprep.subr.bf16.mxu0 %v7315_v56  ;;  %v7400_v55 = vld [vmem:[#allocation8 + $0x5e8] ss:$16 sps:$4 sm:$0xff]   ;;  %v7405_v56 = vld [vmem:[#allocation8 + $0x3cc] ss:$16 sps:$4 sm:$0xff]  }
 0x11f   : > { %2318 = vmatprep.subr.bf16.mxu1 %v7318_v57  ;;  %v7408_v57 = vld [vmem:[#allocation8 + $0x5cc] ss:$16 sps:$4 sm:$0xff]  }
 0x121   : > { %2276 = vmatpush2.bf16.msra.mxu0 %v7313_v58  ;;  %v7403_v58 = vld [vmem:[#allocation8 + $0x3c8] ss:$16 sps:$4 sm:$0xff]  }
 0x122   : > { %2319 = vmatpush2.bf16.msra.mxu1 %v7316_v59  ;;  %2277 = vmatprep.subr.bf16.mxu0 %v7321_v60  ;;  %v7406_v59 = vld [vmem:[#allocation8 + $0x5c8] ss:$16 sps:$4 sm:$0xff]   ;;  %v7411_v60 = vld [vmem:[#allocation8 + $0x3ac] ss:$16 sps:$4 sm:$0xff]  }
 0x123   : > { %2320 = vmatprep.subr.bf16.mxu1 %v7324_v61  ;;  %v7414_v61 = vld [vmem:[#allocation8 + $0x5ac] ss:$16 sps:$4 sm:$0xff]  }
 0x125   : > { %2278 = vmatpush2.bf16.msra.mxu0 %v7319_v62  ;;  %v7409_v62 = vld [vmem:[#allocation8 + $0x3a8] ss:$16 sps:$4 sm:$0xff]  }
 0x126   : > { %2321 = vmatpush2.bf16.msra.mxu1 %v7322_v63  ;;  %2279 = vmatprep.subr.bf16.mxu0 %v7327_v0  ;;  %v7412_v63 = vld [vmem:[#allocation8 + $0x5a8] ss:$16 sps:$4 sm:$0xff]   ;;  %v7417_v0 = vld [vmem:[#allocation8 + $0x38c] ss:$16 sps:$4 sm:$0xff]  }
 0x127   : > { %2322 = vmatprep.subr.bf16.mxu1 %v7330_v1  ;;  %v7420_v1 = vld [vmem:[#allocation8 + $0x58c] ss:$16 sps:$4 sm:$0xff]  }
 0x129   : > { %2280 = vmatpush2.bf16.msra.mxu0 %v7325_v2  ;;  %v7415_v2 = vld [vmem:[#allocation8 + $0x388] ss:$16 sps:$4 sm:$0xff]  }
 0x12a   : > { %2323 = vmatpush2.bf16.msra.mxu1 %v7328_v3  ;;  %2281 = vmatprep.subr.bf16.mxu0 %v7333_v4  ;;  %v7418_v3 = vld [vmem:[#allocation8 + $0x588] ss:$16 sps:$4 sm:$0xff]   ;;  %v7423_v4 = vld [vmem:[#allocation8 + $0x36c] ss:$16 sps:$4 sm:$0xff]  }
 0x12b   : > { %2324 = vmatprep.subr.bf16.mxu1 %v7336_v5  ;;  %v7426_v5 = vld [vmem:[#allocation8 + $0x56c] ss:$16 sps:$4 sm:$0xff]  }
 0x12d   : > { %2282 = vmatpush2.bf16.msra.mxu0 %v7331_v6  ;;  %v7421_v6 = vld [vmem:[#allocation8 + $0x368] ss:$16 sps:$4 sm:$0xff]  }
 0x12e   : > { %2325 = vmatpush2.bf16.msra.mxu1 %v7334_v7  ;;  %2283 = vmatprep.subr.bf16.mxu0 %v7339_v8  ;;  %v7424_v7 = vld [vmem:[#allocation8 + $0x568] ss:$16 sps:$4 sm:$0xff]   ;;  %v7429_v8 = vld [vmem:[#allocation8 + $0x34c] ss:$16 sps:$4 sm:$0xff]  }
 0x12f   : > { %2326 = vmatprep.subr.bf16.mxu1 %v7342_v9  ;;  %v7432_v9 = vld [vmem:[#allocation8 + $0x54c] ss:$16 sps:$4 sm:$0xff]  }
 0x131   : > { %2284 = vmatpush2.bf16.msra.mxu0 %v7337_v10  ;;  %v7427_v10 = vld [vmem:[#allocation8 + $0x348] ss:$16 sps:$4 sm:$0xff]  }
 0x132   : > { %2327 = vmatpush2.bf16.msra.mxu1 %v7340_v11  ;;  %2285 = vmatprep.subr.bf16.mxu0 %v7345_v14  ;;  %v7430_v11 = vld [vmem:[#allocation8 + $0x548] ss:$16 sps:$4 sm:$0xff]   ;;  %v7435_v14 = vld [vmem:[#allocation8 + $0x32c] ss:$16 sps:$4 sm:$0xff]  }
 0x133   : > { %2328 = vmatprep.subr.bf16.mxu1 %v7348_v15  ;;  %v7438_v15 = vld [vmem:[#allocation8 + $0x52c] ss:$16 sps:$4 sm:$0xff]  }
 0x135   : > { %2286 = vmatpush2.bf16.msra.mxu0 %v7343_v16  ;;  %v7433_v16 = vld [vmem:[#allocation8 + $0x328] ss:$16 sps:$4 sm:$0xff]  }
 0x136   : > { %2329 = vmatpush2.bf16.msra.mxu1 %v7346_v17  ;;  %2341 = vmatprep.subr.bf16.mxu0 %v7351_v20  ;;  %v7436_v17 = vld [vmem:[#allocation8 + $0x528] ss:$16 sps:$4 sm:$0xff]  }
 0x137   : > { %2384 = vmatprep.subr.bf16.mxu1 %v7354_v21  ;;  %v7439_v20 = vld [vmem:[#allocation8 + $0x308] ss:$16 sps:$4 sm:$0xff]  }
 0x138   : > { %2288 = vmatmul.mubr.bf16.vlgmr.msra.gmra.mxu0 %v8833_v22  ;;  %v7442_v21 = vld [vmem:[#allocation8 + $0x508] ss:$16 sps:$4 sm:$0xff]  }
 0x139   : > { %2331 = vmatmul.mubr.bf16.vlgmr.msra.gmra.mxu1 %v8820_v12  ;;  %2342 = vmatpush1.bf16.msra.mxu0 %v7349_v23  ;;  %v7372_v12 = vld [vmem:[#allocation8 + $0x48c] ss:$16 sps:$4 sm:$0xff]   ;;  %v7447_v23 = vld [vmem:[#allocation7 + $0xe4] ss:$16 sps:$4 sm:$0xff]  }
 0x13a   : > { %2385 = vmatpush1.bf16.msra.mxu1 %v7352_v24  ;;  %2343 = vmatprep.subr.bf16.mxu0 %v7357_v25  ;;  %v7450_v24 = vld [vmem:[#allocation7 + $0x2e4] ss:$16 sps:$4 sm:$0xff]   ;;  %v7445_v25 = vld [vmem:[#allocation7 + $0xe0] ss:$16 sps:$4 sm:$0xff]  }
 0x13b   : > { %2386 = vmatprep.subr.bf16.mxu1 %v7360_v26  ;;  %2373 = vmatprep.mubr.bf16.mxu0 %v8813_v54  ;;  %v7376_v54 = vld [vmem:[#allocation8 + $0x468] ss:$16 sps:$4 sm:$0xff]   ;;  %v7448_v26 = vld [vmem:[#allocation7 + $0x2e0] ss:$16 sps:$4 sm:$0xff]  }
 0x13c   : > { %2416 = vmatprep.mubr.bf16.mxu1 %v8828_v44  ;;  %v7390_v44 = vld [vmem:[#allocation8 + $0x42c] ss:$16 sps:$4 sm:$0xff]  }
 0x13d   : > { %2344 = vmatpush1.bf16.msra.mxu0 %v7355_v27  ;;  %v440_v27 = vld [vmem:[%s8783_s29 + $0x8] sm:$0xff] }
 0x13e   : > { %2387 = vmatpush1.bf16.msra.mxu1 %v7358_v28  ;;  %2345 = vmatprep.subr.bf16.mxu0 %v7363_v29  ;;  %v456_v28 = vld [vmem:[%s8783_s29 + $0x88] sm:$0xff]  ;;  %v442_v29 = vld [vmem:[%s8783_s29 + $0x18] sm:$0xff] }
 0x13f   : > { %2388 = vmatprep.subr.bf16.mxu1 %v7366_v30  ;;  %v458_v30 = vld [vmem:[%s8783_s29 + $0x98] sm:$0xff] }
 0x141   : > { %2346 = vmatpush1.bf16.msra.mxu0 %v7361_v31  ;;  %v7453_v31 = vld [vmem:[#allocation7 + $0xc4] ss:$16 sps:$4 sm:$0xff]  }
 0x142   : > { %2389 = vmatpush1.bf16.msra.mxu1 %v7364_v32  ;;  %2347 = vmatprep.subr.bf16.mxu0 %v7369_v33  ;;  %v7456_v32 = vld [vmem:[#allocation7 + $0x2c4] ss:$16 sps:$4 sm:$0xff]   ;;  %v8843_v33 = vpack.c.bf16 %v456_v28, %v440_v27  ;;  %v7535_v27 = vld [vmem:[#allocation7 + $0x100] ss:$16 sps:$4 sm:$0xff]  }
 0x143   : > { %2390 = vmatprep.subr.bf16.mxu1 %v7372_v12  ;;  %v8845_v12 = vpack.c.bf16 %v458_v30, %v442_v29  ;;  %v7538_v28 = vld [vmem:[#allocation7 + $0x300] ss:$16 sps:$4 sm:$0xff]  }
 0x144   : > { %v439_v29 = vld [vmem:[%s8783_s29] sm:$0xff] }
 0x145   : > { %2348 = vmatpush1.bf16.msra.mxu0 %v7367_v34  ;;  %v7451_v34 = vld [vmem:[#allocation7 + $0xc0] ss:$16 sps:$4 sm:$0xff]  }
 0x146   : > { %2391 = vmatpush1.bf16.msra.mxu1 %v7370_v35  ;;  %2349 = vmatprep.subr.bf16.mxu0 %v7375_v36  ;;  %v7454_v35 = vld [vmem:[#allocation7 + $0x2c0] ss:$16 sps:$4 sm:$0xff]   ;;  %v7459_v36 = vld [vmem:[#allocation7 + $0xa4] ss:$16 sps:$4 sm:$0xff]  }
 0x147   : > { %2392 = vmatprep.subr.bf16.mxu1 %v7378_v37  ;;  %v7462_v37 = vld [vmem:[#allocation7 + $0x2a4] ss:$16 sps:$4 sm:$0xff]  }
 0x148   : > { %v455_v30 = vld [vmem:[%s8783_s29 + $0x80] sm:$0xff] }
 0x149   : > { %2350 = vmatpush1.bf16.msra.mxu0 %v7373_v38  ;;  %v7457_v38 = vld [vmem:[#allocation7 + $0xa0] ss:$16 sps:$4 sm:$0xff]  }
 0x14a   : > { %2393 = vmatpush1.bf16.msra.mxu1 %v7376_v54  ;;  %2351 = vmatprep.subr.bf16.mxu0 %v7381_v39  ;;  %v7460_v54 = vld [vmem:[#allocation7 + $0x2a0] ss:$16 sps:$4 sm:$0xff]   ;;  %v7465_v39 = vld [vmem:[#allocation7 + $0x84] ss:$16 sps:$4 sm:$0xff]  }
 0x14b   : > { %2394 = vmatprep.subr.bf16.mxu1 %v7384_v40  ;;  %v7466_v40 = vld [vmem:[#allocation7 + $0x280] ss:$16 sps:$4 sm:$0xff]  }
 0x14d   : > { %2352 = vmatpush1.bf16.msra.mxu0 %v7379_v41  ;;  %v7471_v41 = vld [vmem:[#allocation7 + $0x64] ss:$16 sps:$4 sm:$0xff]  }
 0x14e   : > { %2395 = vmatpush1.bf16.msra.mxu1 %v7382_v42  ;;  %2353 = vmatprep.subr.bf16.mxu0 %v7387_v43  ;;  %v7474_v42 = vld [vmem:[#allocation7 + $0x264] ss:$16 sps:$4 sm:$0xff]   ;;  %v7469_v43 = vld [vmem:[#allocation7 + $0x60] ss:$16 sps:$4 sm:$0xff]  }
 0x14f   : > { %2396 = vmatprep.subr.bf16.mxu1 %v7390_v44  ;;  %v7472_v44 = vld [vmem:[#allocation7 + $0x260] ss:$16 sps:$4 sm:$0xff]  }
 0x151   : > { %2354 = vmatpush1.bf16.msra.mxu0 %v7385_v45  ;;  %v7477_v45 = vld [vmem:[#allocation7 + $0x44] ss:$16 sps:$4 sm:$0xff]  }
 0x152   : > { %2397 = vmatpush1.bf16.msra.mxu1 %v7388_v46  ;;  %2355 = vmatprep.subr.bf16.mxu0 %v7393_v47  ;;  %v7480_v46 = vld [vmem:[#allocation7 + $0x244] ss:$16 sps:$4 sm:$0xff]   ;;  %v7475_v47 = vld [vmem:[#allocation7 + $0x40] ss:$16 sps:$4 sm:$0xff]  }
 0x153   : > { %2398 = vmatprep.subr.bf16.mxu1 %v7396_v48  ;;  %v7478_v48 = vld [vmem:[#allocation7 + $0x240] ss:$16 sps:$4 sm:$0xff]  }
 0x155   : > { %2356 = vmatpush1.bf16.msra.mxu0 %v7391_v49  ;;  %v7483_v49 = vld [vmem:[#allocation7 + $0x24] ss:$16 sps:$4 sm:$0xff]  }
 0x156   : > { %2399 = vmatpush1.bf16.msra.mxu1 %v7394_v50  ;;  %2357 = vmatprep.subr.bf16.mxu0 %v7399_v51  ;;  %v7486_v50 = vld [vmem:[#allocation7 + $0x224] ss:$16 sps:$4 sm:$0xff]   ;;  %v7481_v51 = vld [vmem:[#allocation7 + $0x20] ss:$16 sps:$4 sm:$0xff]  }
 0x157   : > { %2400 = vmatprep.subr.bf16.mxu1 %v7402_v52  ;;  %v7484_v52 = vld [vmem:[#allocation7 + $0x220] ss:$16 sps:$4 sm:$0xff]  }
 0x159   : > { %2358 = vmatpush2.bf16.msra.mxu0 %v7397_v53  ;;  %v7489_v53 = vld [vmem:[#allocation7 + $0x4] ss:$16 sps:$4 sm:$0xff]  }
 0x15a   : > { %2401 = vmatpush2.bf16.msra.mxu1 %v7400_v55  ;;  %2359 = vmatprep.subr.bf16.mxu0 %v7405_v56  ;;  %v7492_v55 = vld [vmem:[#allocation7 + $0x204] ss:$16 sps:$4 sm:$0xff]   ;;  %v7487_v56 = vld [vmem:[#allocation7] ss:$16 sps:$4 sm:$0xff]  }
 0x15b   : > { %2402 = vmatprep.subr.bf16.mxu1 %v7408_v57  ;;  %v7490_v57 = vld [vmem:[#allocation7 + $0x200] ss:$16 sps:$4 sm:$0xff]  }
 0x15d   : > { %2360 = vmatpush2.bf16.msra.mxu0 %v7403_v58  ;;  %v7495_v58 = vld [vmem:[#allocation7 + $0x1e4] ss:$16 sps:$4 sm:$0xff]  }
 0x15e   : > { %2403 = vmatpush2.bf16.msra.mxu1 %v7406_v59  ;;  %2361 = vmatprep.subr.bf16.mxu0 %v7411_v60  ;;  %v7498_v59 = vld [vmem:[#allocation7 + $0x3e4] ss:$16 sps:$4 sm:$0xff]   ;;  %v7493_v60 = vld [vmem:[#allocation7 + $0x1e0] ss:$16 sps:$4 sm:$0xff]  }
 0x15f   : > { %2404 = vmatprep.subr.bf16.mxu1 %v7414_v61  ;;  %v7496_v61 = vld [vmem:[#allocation7 + $0x3e0] ss:$16 sps:$4 sm:$0xff]  }
 0x161   : > { %2362 = vmatpush2.bf16.msra.mxu0 %v7409_v62  ;;  %v7501_v62 = vld [vmem:[#allocation7 + $0x1c4] ss:$16 sps:$4 sm:$0xff]  }
 0x162   : > { %2405 = vmatpush2.bf16.msra.mxu1 %v7412_v63  ;;  %2363 = vmatprep.subr.bf16.mxu0 %v7417_v0  ;;  %v7504_v63 = vld [vmem:[#allocation7 + $0x3c4] ss:$16 sps:$4 sm:$0xff]   ;;  %v7499_v0 = vld [vmem:[#allocation7 + $0x1c0] ss:$16 sps:$4 sm:$0xff]  }
 0x163   : > { %2406 = vmatprep.subr.bf16.mxu1 %v7420_v1  ;;  %v7502_v1 = vld [vmem:[#allocation7 + $0x3c0] ss:$16 sps:$4 sm:$0xff]  }
 0x165   : > { %2364 = vmatpush2.bf16.msra.mxu0 %v7415_v2  ;;  %v7507_v2 = vld [vmem:[#allocation7 + $0x1a4] ss:$16 sps:$4 sm:$0xff]  }
 0x166   : > { %2407 = vmatpush2.bf16.msra.mxu1 %v7418_v3  ;;  %2365 = vmatprep.subr.bf16.mxu0 %v7423_v4  ;;  %v7510_v3 = vld [vmem:[#allocation7 + $0x3a4] ss:$16 sps:$4 sm:$0xff]   ;;  %v7505_v4 = vld [vmem:[#allocation7 + $0x1a0] ss:$16 sps:$4 sm:$0xff]  }
 0x167   : > { %2408 = vmatprep.subr.bf16.mxu1 %v7426_v5  ;;  %v7508_v5 = vld [vmem:[#allocation7 + $0x3a0] ss:$16 sps:$4 sm:$0xff]  }
 0x169   : > { %2366 = vmatpush2.bf16.msra.mxu0 %v7421_v6  ;;  %v7513_v6 = vld [vmem:[#allocation7 + $0x184] ss:$16 sps:$4 sm:$0xff]  }
 0x16a   : > { %2409 = vmatpush2.bf16.msra.mxu1 %v7424_v7  ;;  %2367 = vmatprep.subr.bf16.mxu0 %v7429_v8  ;;  %v7516_v7 = vld [vmem:[#allocation7 + $0x384] ss:$16 sps:$4 sm:$0xff]   ;;  %v7511_v8 = vld [vmem:[#allocation7 + $0x180] ss:$16 sps:$4 sm:$0xff]  }
 0x16b   : > { %2410 = vmatprep.subr.bf16.mxu1 %v7432_v9  ;;  %v7514_v9 = vld [vmem:[#allocation7 + $0x380] ss:$16 sps:$4 sm:$0xff]  }
 0x16d   : > { %2368 = vmatpush2.bf16.msra.mxu0 %v7427_v10  ;;  %v7519_v10 = vld [vmem:[#allocation7 + $0x164] ss:$16 sps:$4 sm:$0xff]  }
 0x16e   : > { %2411 = vmatpush2.bf16.msra.mxu1 %v7430_v11  ;;  %2369 = vmatprep.subr.bf16.mxu0 %v7435_v14  ;;  %v7522_v11 = vld [vmem:[#allocation7 + $0x364] ss:$16 sps:$4 sm:$0xff]   ;;  %v7517_v14 = vld [vmem:[#allocation7 + $0x160] ss:$16 sps:$4 sm:$0xff]  }
 0x16f   : > { %2412 = vmatprep.subr.bf16.mxu1 %v7438_v15  ;;  %v7520_v15 = vld [vmem:[#allocation7 + $0x360] ss:$16 sps:$4 sm:$0xff]  }
 0x171   : > { %2370 = vmatpush2.bf16.msra.mxu0 %v7433_v16  ;;  %v7525_v16 = vld [vmem:[#allocation7 + $0x144] ss:$16 sps:$4 sm:$0xff]  }
 0x172   : > { %2413 = vmatpush2.bf16.msra.mxu1 %v7436_v17  ;;  %2371 = vmatprep.subr.bf16.mxu0 %v7441_v18  ;;  %v7528_v17 = vld [vmem:[#allocation7 + $0x344] ss:$16 sps:$4 sm:$0xff]   ;;  %v7523_v18 = vld [vmem:[#allocation7 + $0x140] ss:$16 sps:$4 sm:$0xff]  }
 0x173   : > { %2414 = vmatprep.subr.bf16.mxu1 %v7444_v19  ;;  %v7526_v19 = vld [vmem:[#allocation7 + $0x340] ss:$16 sps:$4 sm:$0xff]  }
 0x175   : > { %2372 = vmatpush2.bf16.msra.mxu0 %v7439_v20  ;;  %v7531_v20 = vld [vmem:[#allocation7 + $0x124] ss:$16 sps:$4 sm:$0xff]  }
 0x176   : > { %2415 = vmatpush2.bf16.msra.mxu1 %v7442_v21  ;;  %4987 = vmatprep.subr.bf16.mxu0 %v7447_v23  ;;  %v7534_v21 = vld [vmem:[#allocation7 + $0x324] ss:$16 sps:$4 sm:$0xff]   ;;  %v7529_v23 = vld [vmem:[#allocation7 + $0x120] ss:$16 sps:$4 sm:$0xff]  }
 0x177   : > { %5030 = vmatprep.subr.bf16.mxu1 %v7450_v24  ;;  %v7532_v24 = vld [vmem:[#allocation7 + $0x320] ss:$16 sps:$4 sm:$0xff]  }
 0x178   : > { %2374 = vmatmul.mubr.bf16.vlgmr.msra.gmra.mxu0 %v8822_v13  ;;  %v7468_v13 = vld [vmem:[#allocation7 + $0x284] ss:$16 sps:$4 sm:$0xff]  }
 0x179   : > { %2417 = vmatmul.mubr.bf16.vlgmr.msra.gmra.mxu1 %v8833_v22  ;;  %4988 = vmatpush1.bf16.msra.mxu0 %v7445_v25  ;;  %v7463_v22 = vld [vmem:[#allocation7 + $0x80] ss:$16 sps:$4 sm:$0xff]   ;;  %v7537_v25 = vld [vmem:[#allocation7 + $0x104] ss:$16 sps:$4 sm:$0xff]  }
 0x17a   : > { %5031 = vmatpush1.bf16.msra.mxu1 %v7448_v26  ;;  %4989 = vmatprep.subr.bf16.mxu0 %v7453_v31  ;;  %v7540_v26 = vld [vmem:[#allocation7 + $0x304] ss:$16 sps:$4 sm:$0xff]  }
 0x17b   : > { %5032 = vmatprep.subr.bf16.mxu1 %v7456_v32  ;;  %5019 = vmatprep.mubr.bf16.mxu0 %v8843_v33  ;;  %v441_v31 = vld [vmem:[%s8783_s29 + $0x10] sm:$0xff] }
 0x17c   : > { %5062 = vmatprep.mubr.bf16.mxu1 %v8845_v12  ;;  %v457_v32 = vld [vmem:[%s8783_s29 + $0x90] sm:$0xff] }
 0x17d   : > { %4990 = vmatpush1.bf16.msra.mxu0 %v7451_v34  ;;  %v7543_v34 = vld [vmem:[#allocation7 + $0x4e4] ss:$16 sps:$4 sm:$0xff]  }
 0x17e   : > { %5033 = vmatpush1.bf16.msra.mxu1 %v7454_v35  ;;  %4991 = vmatprep.subr.bf16.mxu0 %v7459_v36  ;;  %v7546_v35 = vld [vmem:[#allocation7 + $0x6e4] ss:$16 sps:$4 sm:$0xff]   ;;  %v7541_v36 = vld [vmem:[#allocation7 + $0x4e0] ss:$16 sps:$4 sm:$0xff]  }
 0x17f   : > { %5034 = vmatprep.subr.bf16.mxu1 %v7462_v37  ;;  %v7544_v37 = vld [vmem:[#allocation7 + $0x6e0] ss:$16 sps:$4 sm:$0xff]  }
 0x181   : > { %4992 = vmatpush1.bf16.msra.mxu0 %v7457_v38  ;;  %v444_v38 = vld [vmem:[%s8783_s29 + $0x28] sm:$0xff] }
 0x182   : > { %5035 = vmatpush1.bf16.msra.mxu1 %v7460_v54  ;;  %4993 = vmatprep.subr.bf16.mxu0 %v7465_v39  ;;  %v460_v54 = vld [vmem:[%s8783_s29 + $0xa8] sm:$0xff]  ;;  %v8857_v39 = vpack.c.bf16 %v455_v30, %v439_v29  ;;  %v7610_v29 = vld [vmem:[#allocation7 + $0x780] ss:$16 sps:$4 sm:$0xff]   ;;  %v7615_v30 = vld [vmem:[#allocation7 + $0x564] ss:$16 sps:$4 sm:$0xff]  }
 0x183   : > { %5036 = vmatprep.subr.bf16.mxu1 %v7468_v13  ;;  %v8859_v13 = vpack.c.bf16 %v457_v32, %v441_v31  ;;  %v7618_v31 = vld [vmem:[#allocation7 + $0x764] ss:$16 sps:$4 sm:$0xff]   ;;  %v7613_v32 = vld [vmem:[#allocation7 + $0x560] ss:$16 sps:$4 sm:$0xff]  }
 0x185   : > { %4994 = vmatpush1.bf16.msra.mxu0 %v7463_v22  ;;  %v446_v22 = vld [vmem:[%s8783_s29 + $0x38] sm:$0xff] }
 0x186   : > { %5037 = vmatpush1.bf16.msra.mxu1 %v7466_v40  ;;  %4995 = vmatprep.subr.bf16.mxu0 %v7471_v41  ;;  %v462_v40 = vld [vmem:[%s8783_s29 + $0xb8] sm:$0xff]  ;;  %v7549_v41 = vld [vmem:[#allocation7 + $0x4c4] ss:$16 sps:$4 sm:$0xff]  }
 0x187   : > { %5038 = vmatprep.subr.bf16.mxu1 %v7474_v42  ;;  %v7552_v42 = vld [vmem:[#allocation7 + $0x6c4] ss:$16 sps:$4 sm:$0xff]  }
 0x189   : > { %4996 = vmatpush1.bf16.msra.mxu0 %v7469_v43  ;;  %v8863_v43 = vpack.c.bf16 %v460_v54, %v444_v38  ;;  %v7622_v38 = vld [vmem:[#allocation7 + $0x740] ss:$16 sps:$4 sm:$0xff]   ;;  %v7627_v54 = vld [vmem:[#allocation7 + $0x524] ss:$16 sps:$4 sm:$0xff]  }
 0x18a   : > { %5039 = vmatpush1.bf16.msra.mxu1 %v7472_v44  ;;  %4997 = vmatprep.subr.bf16.mxu0 %v7477_v45  ;;  %v8865_v44 = vpack.c.bf16 %v462_v40, %v446_v22  ;;  %v7630_v22 = vld [vmem:[#allocation7 + $0x724] ss:$16 sps:$4 sm:$0xff]   ;;  %v7625_v40 = vld [vmem:[#allocation7 + $0x520] ss:$16 sps:$4 sm:$0xff]  }
 0x18b   : > { %5040 = vmatprep.subr.bf16.mxu1 %v7480_v46 }
 0x18d   : > { %4998 = vmatpush1.bf16.msra.mxu0 %v7475_v47  ;;  %v7547_v47 = vld [vmem:[#allocation7 + $0x4c0] ss:$16 sps:$4 sm:$0xff]  }
 0x18e   : > { %5041 = vmatpush1.bf16.msra.mxu1 %v7478_v48  ;;  %4999 = vmatprep.subr.bf16.mxu0 %v7483_v49  ;;  %v7550_v48 = vld [vmem:[#allocation7 + $0x6c0] ss:$16 sps:$4 sm:$0xff]  }
 0x18f   : > { %5042 = vmatprep.subr.bf16.mxu1 %v7486_v50  ;;  %v7555_v50 = vld [vmem:[#allocation7 + $0x4a4] ss:$16 sps:$4 sm:$0xff]  }
 0x191   : > { %5000 = vmatpush1.bf16.msra.mxu0 %v7481_v51  ;;  %v7558_v51 = vld [vmem:[#allocation7 + $0x6a4] ss:$16 sps:$4 sm:$0xff]  }
 0x192   : > { %5043 = vmatpush1.bf16.msra.mxu1 %v7484_v52  ;;  %5001 = vmatprep.subr.bf16.mxu0 %v7489_v53  ;;  %v7553_v52 = vld [vmem:[#allocation7 + $0x4a0] ss:$16 sps:$4 sm:$0xff]  }
 0x193   : > { %5044 = vmatprep.subr.bf16.mxu1 %v7492_v55  ;;  %v7556_v53 = vld [vmem:[#allocation7 + $0x6a0] ss:$16 sps:$4 sm:$0xff]   ;;  %v7561_v55 = vld [vmem:[#allocation7 + $0x484] ss:$16 sps:$4 sm:$0xff]  }
 0x195   : > { %5002 = vmatpush1.bf16.msra.mxu0 %v7487_v56  ;;  %v7564_v56 = vld [vmem:[#allocation7 + $0x684] ss:$16 sps:$4 sm:$0xff]  }
 0x196   : > { %5045 = vmatpush1.bf16.msra.mxu1 %v7490_v57  ;;  %5003 = vmatprep.subr.bf16.mxu0 %v7495_v58  ;;  %v7559_v57 = vld [vmem:[#allocation7 + $0x480] ss:$16 sps:$4 sm:$0xff]  }
 0x197   : > { %5046 = vmatprep.subr.bf16.mxu1 %v7498_v59  ;;  %v7562_v58 = vld [vmem:[#allocation7 + $0x680] ss:$16 sps:$4 sm:$0xff]   ;;  %v7567_v59 = vld [vmem:[#allocation7 + $0x464] ss:$16 sps:$4 sm:$0xff]  }
 0x199   : > { %5004 = vmatpush2.bf16.msra.mxu0 %v7493_v60  ;;  %v7570_v60 = vld [vmem:[#allocation7 + $0x664] ss:$16 sps:$4 sm:$0xff]  }
 0x19a   : > { %5047 = vmatpush2.bf16.msra.mxu1 %v7496_v61  ;;  %5005 = vmatprep.subr.bf16.mxu0 %v7501_v62  ;;  %v7565_v61 = vld [vmem:[#allocation7 + $0x460] ss:$16 sps:$4 sm:$0xff]  }
 0x19b   : > { %5048 = vmatprep.subr.bf16.mxu1 %v7504_v63  ;;  %v7568_v62 = vld [vmem:[#allocation7 + $0x660] ss:$16 sps:$4 sm:$0xff]   ;;  %v7573_v63 = vld [vmem:[#allocation7 + $0x444] ss:$16 sps:$4 sm:$0xff]  }
 0x19d   : > { %5006 = vmatpush2.bf16.msra.mxu0 %v7499_v0  ;;  %v7576_v0 = vld [vmem:[#allocation7 + $0x644] ss:$16 sps:$4 sm:$0xff]  }
 0x19e   : > { %5049 = vmatpush2.bf16.msra.mxu1 %v7502_v1  ;;  %5007 = vmatprep.subr.bf16.mxu0 %v7507_v2  ;;  %v7571_v1 = vld [vmem:[#allocation7 + $0x440] ss:$16 sps:$4 sm:$0xff]  }
 0x19f   : > { %5050 = vmatprep.subr.bf16.mxu1 %v7510_v3  ;;  %v7574_v2 = vld [vmem:[#allocation7 + $0x640] ss:$16 sps:$4 sm:$0xff]   ;;  %v7579_v3 = vld [vmem:[#allocation7 + $0x424] ss:$16 sps:$4 sm:$0xff]  }
 0x1a1   : > { %5008 = vmatpush2.bf16.msra.mxu0 %v7505_v4  ;;  %v7582_v4 = vld [vmem:[#allocation7 + $0x624] ss:$16 sps:$4 sm:$0xff]  }
 0x1a2   : > { %5051 = vmatpush2.bf16.msra.mxu1 %v7508_v5  ;;  %5009 = vmatprep.subr.bf16.mxu0 %v7513_v6  ;;  %v7577_v5 = vld [vmem:[#allocation7 + $0x420] ss:$16 sps:$4 sm:$0xff]  }
 0x1a3   : > { %5052 = vmatprep.subr.bf16.mxu1 %v7516_v7  ;;  %v7580_v6 = vld [vmem:[#allocation7 + $0x620] ss:$16 sps:$4 sm:$0xff]   ;;  %v7585_v7 = vld [vmem:[#allocation7 + $0x404] ss:$16 sps:$4 sm:$0xff]  }
 0x1a5   : > { %5010 = vmatpush2.bf16.msra.mxu0 %v7511_v8  ;;  %v7588_v8 = vld [vmem:[#allocation7 + $0x604] ss:$16 sps:$4 sm:$0xff]  }
 0x1a6   : > { %5053 = vmatpush2.bf16.msra.mxu1 %v7514_v9  ;;  %5011 = vmatprep.subr.bf16.mxu0 %v7519_v10  ;;  %v7583_v9 = vld [vmem:[#allocation7 + $0x400] ss:$16 sps:$4 sm:$0xff]  }
 0x1a7   : > { %5054 = vmatprep.subr.bf16.mxu1 %v7522_v11  ;;  %v7586_v10 = vld [vmem:[#allocation7 + $0x600] ss:$16 sps:$4 sm:$0xff]   ;;  %v7591_v11 = vld [vmem:[#allocation7 + $0x5e4] ss:$16 sps:$4 sm:$0xff]  }
 0x1a9   : > { %5012 = vmatpush2.bf16.msra.mxu0 %v7517_v14  ;;  %v7594_v14 = vld [vmem:[#allocation7 + $0x7e4] ss:$16 sps:$4 sm:$0xff]  }
 0x1aa   : > { %5055 = vmatpush2.bf16.msra.mxu1 %v7520_v15  ;;  %5013 = vmatprep.subr.bf16.mxu0 %v7525_v16  ;;  %v7589_v15 = vld [vmem:[#allocation7 + $0x5e0] ss:$16 sps:$4 sm:$0xff]  }
 0x1ab   : > { %5056 = vmatprep.subr.bf16.mxu1 %v7528_v17  ;;  %v7592_v16 = vld [vmem:[#allocation7 + $0x7e0] ss:$16 sps:$4 sm:$0xff]   ;;  %v7597_v17 = vld [vmem:[#allocation7 + $0x5c4] ss:$16 sps:$4 sm:$0xff]  }
 0x1ad   : > { %5014 = vmatpush2.bf16.msra.mxu0 %v7523_v18  ;;  %v7600_v18 = vld [vmem:[#allocation7 + $0x7c4] ss:$16 sps:$4 sm:$0xff]  }
 0x1ae   : > { %5057 = vmatpush2.bf16.msra.mxu1 %v7526_v19  ;;  %5015 = vmatprep.subr.bf16.mxu0 %v7531_v20  ;;  %v7595_v19 = vld [vmem:[#allocation7 + $0x5c0] ss:$16 sps:$4 sm:$0xff]  }
 0x1af   : > { %5058 = vmatprep.subr.bf16.mxu1 %v7534_v21  ;;  %v7598_v20 = vld [vmem:[#allocation7 + $0x7c0] ss:$16 sps:$4 sm:$0xff]   ;;  %v7603_v21 = vld [vmem:[#allocation7 + $0x5a4] ss:$16 sps:$4 sm:$0xff]  }
 0x1b1   : > { %5016 = vmatpush2.bf16.msra.mxu0 %v7529_v23  ;;  %v7606_v23 = vld [vmem:[#allocation7 + $0x7a4] ss:$16 sps:$4 sm:$0xff]  }
 0x1b2   : > { %5059 = vmatpush2.bf16.msra.mxu1 %v7532_v24  ;;  %5017 = vmatprep.subr.bf16.mxu0 %v7537_v25  ;;  %v7601_v24 = vld [vmem:[#allocation7 + $0x5a0] ss:$16 sps:$4 sm:$0xff]  }
 0x1b3   : > { %5060 = vmatprep.subr.bf16.mxu1 %v7540_v26  ;;  %v7604_v25 = vld [vmem:[#allocation7 + $0x7a0] ss:$16 sps:$4 sm:$0xff]   ;;  %v7609_v26 = vld [vmem:[#allocation7 + $0x584] ss:$16 sps:$4 sm:$0xff]  }
 0x1b5   : > { %5018 = vmatpush2.bf16.msra.mxu0 %v7535_v27  ;;  %v7612_v27 = vld [vmem:[#allocation7 + $0x784] ss:$16 sps:$4 sm:$0xff]  }
 0x1b6   : > { %5061 = vmatpush2.bf16.msra.mxu1 %v7538_v28  ;;  %5073 = vmatprep.subr.bf16.mxu0 %v7543_v34  ;;  %v7607_v28 = vld [vmem:[#allocation7 + $0x580] ss:$16 sps:$4 sm:$0xff]  }
 0x1b7   : > { %5116 = vmatprep.subr.bf16.mxu1 %v7546_v35  ;;  %v7616_v34 = vld [vmem:[#allocation7 + $0x760] ss:$16 sps:$4 sm:$0xff]   ;;  %v7621_v35 = vld [vmem:[#allocation7 + $0x544] ss:$16 sps:$4 sm:$0xff]  }
 0x1b8   : > { %v2203_v45 = vpop.f32.mrf.mxu0  ;;  %5020 = vmatmul.mubr.bf16.vlgmr.msra.gmra.mxu0 %v8857_v39 }
 0x1b9   : > { %v2246_v46 = vpop.f32.mrf.mxu1  ;;  %5063 = vmatmul.mubr.bf16.vlgmr.msra.gmra.mxu1 %v8859_v13  ;;  %5074 = vmatpush1.bf16.msra.mxu0 %v7541_v36  ;;  %v7624_v36 = vld [vmem:[#allocation7 + $0x744] ss:$16 sps:$4 sm:$0xff]  }
 0x1ba   : > { %v8869_v49 = vadd.f32 %v2246_v46, %v2203_v45  ;;  %5117 = vmatpush1.bf16.msra.mxu1 %v7544_v37  ;;  %5075 = vmatprep.subr.bf16.mxu0 %v7549_v41  ;;  %v7619_v37 = vld [vmem:[#allocation7 + $0x540] ss:$16 sps:$4 sm:$0xff]   ;;  %v7636_v45 = vld [vmem:[#allocation7 + $0x704] ss:$16 sps:$4 sm:$0xff]  }
 0x1bb   : > { %5118 = vmatprep.subr.bf16.mxu1 %v7552_v42  ;;  %5105 = vmatprep.mubr.bf16.mxu0 %v8863_v43  ;;  %v7628_v41 = vld [vmem:[#allocation7 + $0x720] ss:$16 sps:$4 sm:$0xff]   ;;  %v7633_v42 = vld [vmem:[#allocation7 + $0x504] ss:$16 sps:$4 sm:$0xff]  }
 0x1bc   : > { %5148 = vmatprep.mubr.bf16.mxu1 %v8865_v44  ;;  %v7631_v46 = vld [vmem:[#allocation7 + $0x500] ss:$16 sps:$4 sm:$0xff]  }
 0x1bd   : > { %5076 = vmatpush1.bf16.msra.mxu0 %v7547_v47  ;;  %v7634_v47 = vld [vmem:[#allocation7 + $0x700] ss:$16 sps:$4 sm:$0xff]  }
 0x1be   : > { %5119 = vmatpush1.bf16.msra.mxu1 %v7550_v48  ;;  %5077 = vmatprep.subr.bf16.mxu0 %v7555_v50  ;;  %v443_v48 = vld [vmem:[%s8783_s29 + $0x20] sm:$0xff] }
 0x1bf   : > { %5120 = vmatprep.subr.bf16.mxu1 %v7558_v51  ;;  %v459_v50 = vld [vmem:[%s8783_s29 + $0xa0] sm:$0xff]  ;;  %v445_v51 = vld [vmem:[%s8783_s29 + $0x30] sm:$0xff] }
 0x1c1   : > { %5078 = vmatpush1.bf16.msra.mxu0 %v7553_v52  ;;  %v461_v52 = vld [vmem:[%s8783_s29 + $0xb0] sm:$0xff] }
 0x1c2   : > { %5121 = vmatpush1.bf16.msra.mxu1 %v7556_v53  ;;  %5079 = vmatprep.subr.bf16.mxu0 %v7561_v55  ;;  %v7639_v53 = vld [vmem:[#allocation7 + $0x8e4] ss:$16 sps:$4 sm:$0xff]  }
 0x1c3   : > { %5122 = vmatprep.subr.bf16.mxu1 %v7564_v56  ;;  %v7642_v55 = vld [vmem:[#allocation7 + $0xae4] ss:$16 sps:$4 sm:$0xff]   ;;  %v448_v56 = vld [vmem:[%s8783_s29 + $0x48] sm:$0xff] }
 0x1c5   : > { %5080 = vmatpush1.bf16.msra.mxu0 %v7559_v57  ;;  %v8878_v57 = vpack.c.bf16 %v459_v50, %v443_v48  ;;  %v7708_v48 = vld [vmem:[#allocation7 + $0xb84] ss:$16 sps:$4 sm:$0xff]   ;;  %v8893_v50 = vpop.f32.mrf.mxu0 }
 0x1c6   : > { %5123 = vmatpush1.bf16.msra.mxu1 %v7562_v58  ;;  %5081 = vmatprep.subr.bf16.mxu0 %v7567_v59  ;;  %v8880_v58 = vpack.c.bf16 %v461_v52, %v445_v51  ;;  %v464_v59 = vld [vmem:[%s8783_s29 + $0xc8] sm:$0xff]  ;;  %v8895_v51 = vpop.f32.mrf.mxu1  ;;  %v7703_v52 = vld [vmem:[#allocation7 + $0x980] ss:$16 sps:$4 sm:$0xff]  }
 0x1c7   : > { %5124 = vmatprep.subr.bf16.mxu1 %v7570_v60  ;;  %v450_v60 = vld [vmem:[%s8783_s29 + $0x58] sm:$0xff] }
 0x1c9   : > { %5082 = vmatpush1.bf16.msra.mxu0 %v7565_v61  ;;  %v466_v61 = vld [vmem:[%s8783_s29 + $0xd8] sm:$0xff] }
 0x1ca   : > { %5125 = vmatpush1.bf16.msra.mxu1 %v7568_v62  ;;  %5083 = vmatprep.subr.bf16.mxu0 %v7573_v63  ;;  %v7637_v62 = vld [vmem:[#allocation7 + $0x8e0] ss:$16 sps:$4 sm:$0xff]  }
 0x1cb   : > { %5126 = vmatprep.subr.bf16.mxu1 %v7576_v0  ;;  %v7640_v63 = vld [vmem:[#allocation7 + $0xae0] ss:$16 sps:$4 sm:$0xff]   ;;  %v7645_v0 = vld [vmem:[#allocation7 + $0x8c4] ss:$16 sps:$4 sm:$0xff]  }
 0x1cd   : > { %5084 = vmatpush1.bf16.msra.mxu0 %v7571_v1  ;;  %v7648_v1 = vld [vmem:[#allocation7 + $0xac4] ss:$16 sps:$4 sm:$0xff]  }
 0x1ce   : > { %5127 = vmatpush1.bf16.msra.mxu1 %v7574_v2  ;;  %5085 = vmatprep.subr.bf16.mxu0 %v7579_v3  ;;  %v7643_v2 = vld [vmem:[#allocation7 + $0x8c0] ss:$16 sps:$4 sm:$0xff]  }
 0x1cf   : > { %5128 = vmatprep.subr.bf16.mxu1 %v7582_v4  ;;  %v7646_v3 = vld [vmem:[#allocation7 + $0xac0] ss:$16 sps:$4 sm:$0xff]   ;;  %v8885_v4 = vpack.c.bf16 %v464_v59, %v448_v56  ;;  %v7714_v56 = vld [vmem:[#allocation7 + $0xb64] ss:$16 sps:$4 sm:$0xff]   ;;  %v8897_v59 = vpop.f32.mrf.mxu0 }
 0x1d1   : > { %5086 = vmatpush1.bf16.msra.mxu0 %v7577_v5  ;;  %v8887_v5 = vpack.c.bf16 %v466_v61, %v450_v60  ;;  %v8899_v60 = vpop.f32.mrf.mxu1  ;;  %v7709_v61 = vld [vmem:[#allocation7 + $0x960] ss:$16 sps:$4 sm:$0xff]  }
 0x1d2   : > { %5129 = vmatpush1.bf16.msra.mxu1 %v7580_v6  ;;  %5087 = vmatprep.subr.bf16.mxu0 %v7585_v7  ;;  %v7651_v6 = vld [vmem:[#allocation7 + $0x8a4] ss:$16 sps:$4 sm:$0xff]  }
 0x1d3   : > { %5130 = vmatprep.subr.bf16.mxu1 %v7588_v8  ;;  %v7654_v7 = vld [vmem:[#allocation7 + $0xaa4] ss:$16 sps:$4 sm:$0xff]   ;;  %v7649_v8 = vld [vmem:[#allocation7 + $0x8a0] ss:$16 sps:$4 sm:$0xff]  }
 0x1d5   : > { %5088 = vmatpush1.bf16.msra.mxu0 %v7583_v9  ;;  %v7652_v9 = vld [vmem:[#allocation7 + $0xaa0] ss:$16 sps:$4 sm:$0xff]  }
 0x1d6   : > { %5131 = vmatpush1.bf16.msra.mxu1 %v7586_v10  ;;  %5089 = vmatprep.subr.bf16.mxu0 %v7591_v11  ;;  %v7657_v10 = vld [vmem:[#allocation7 + $0x884] ss:$16 sps:$4 sm:$0xff]  }
 0x1d7   : > { %5132 = vmatprep.subr.bf16.mxu1 %v7594_v14  ;;  %v7660_v11 = vld [vmem:[#allocation7 + $0xa84] ss:$16 sps:$4 sm:$0xff]   ;;  %v7655_v14 = vld [vmem:[#allocation7 + $0x880] ss:$16 sps:$4 sm:$0xff]  }
 0x1d9   : > { %5090 = vmatpush2.bf16.msra.mxu0 %v7589_v15  ;;  %v7658_v15 = vld [vmem:[#allocation7 + $0xa80] ss:$16 sps:$4 sm:$0xff]  }
 0x1da   : > { %5133 = vmatpush2.bf16.msra.mxu1 %v7592_v16  ;;  %5091 = vmatprep.subr.bf16.mxu0 %v7597_v17  ;;  %v7663_v16 = vld [vmem:[#allocation7 + $0x864] ss:$16 sps:$4 sm:$0xff]  }
 0x1db   : > { %5134 = vmatprep.subr.bf16.mxu1 %v7600_v18  ;;  %v7666_v17 = vld [vmem:[#allocation7 + $0xa64] ss:$16 sps:$4 sm:$0xff]   ;;  %v7661_v18 = vld [vmem:[#allocation7 + $0x860] ss:$16 sps:$4 sm:$0xff]  }
 0x1dd   : > { %5092 = vmatpush2.bf16.msra.mxu0 %v7595_v19  ;;  %v7664_v19 = vld [vmem:[#allocation7 + $0xa60] ss:$16 sps:$4 sm:$0xff]  }
 0x1de   : > { %5135 = vmatpush2.bf16.msra.mxu1 %v7598_v20  ;;  %5093 = vmatprep.subr.bf16.mxu0 %v7603_v21  ;;  %v7669_v20 = vld [vmem:[#allocation7 + $0x844] ss:$16 sps:$4 sm:$0xff]  }
 0x1df   : > { %5136 = vmatprep.subr.bf16.mxu1 %v7606_v23  ;;  %v7672_v21 = vld [vmem:[#allocation7 + $0xa44] ss:$16 sps:$4 sm:$0xff]   ;;  %v7667_v23 = vld [vmem:[#allocation7 + $0x840] ss:$16 sps:$4 sm:$0xff]  }
 0x1e1   : > { %5094 = vmatpush2.bf16.msra.mxu0 %v7601_v24  ;;  %v7670_v24 = vld [vmem:[#allocation7 + $0xa40] ss:$16 sps:$4 sm:$0xff]  }
 0x1e2   : > { %5137 = vmatpush2.bf16.msra.mxu1 %v7604_v25  ;;  %5095 = vmatprep.subr.bf16.mxu0 %v7609_v26  ;;  %v7675_v25 = vld [vmem:[#allocation7 + $0x824] ss:$16 sps:$4 sm:$0xff]  }
 0x1e3   : > { %5138 = vmatprep.subr.bf16.mxu1 %v7612_v27  ;;  %v7678_v26 = vld [vmem:[#allocation7 + $0xa24] ss:$16 sps:$4 sm:$0xff]   ;;  %v7673_v27 = vld [vmem:[#allocation7 + $0x820] ss:$16 sps:$4 sm:$0xff]  }
 0x1e5   : > { %5096 = vmatpush2.bf16.msra.mxu0 %v7607_v28  ;;  %v7676_v28 = vld [vmem:[#allocation7 + $0xa20] ss:$16 sps:$4 sm:$0xff]  }
 0x1e6   : > { %5139 = vmatpush2.bf16.msra.mxu1 %v7610_v29  ;;  %5097 = vmatprep.subr.bf16.mxu0 %v7615_v30  ;;  %v7681_v29 = vld [vmem:[#allocation7 + $0x804] ss:$16 sps:$4 sm:$0xff]  }
 0x1e7   : > { %5140 = vmatprep.subr.bf16.mxu1 %v7618_v31  ;;  %v7684_v30 = vld [vmem:[#allocation7 + $0xa04] ss:$16 sps:$4 sm:$0xff]   ;;  %v7679_v31 = vld [vmem:[#allocation7 + $0x800] ss:$16 sps:$4 sm:$0xff]  }
 0x1e9   : > { %5098 = vmatpush2.bf16.msra.mxu0 %v7613_v32  ;;  %v7682_v32 = vld [vmem:[#allocation7 + $0xa00] ss:$16 sps:$4 sm:$0xff]  }
 0x1ea   : > { %5141 = vmatpush2.bf16.msra.mxu1 %v7616_v34  ;;  %5099 = vmatprep.subr.bf16.mxu0 %v7621_v35  ;;  %v7687_v34 = vld [vmem:[#allocation7 + $0x9e4] ss:$16 sps:$4 sm:$0xff]  }
 0x1eb   : > { %5142 = vmatprep.subr.bf16.mxu1 %v7624_v36  ;;  %v7690_v35 = vld [vmem:[#allocation7 + $0xbe4] ss:$16 sps:$4 sm:$0xff]   ;;  %v7685_v36 = vld [vmem:[#allocation7 + $0x9e0] ss:$16 sps:$4 sm:$0xff]  }
 0x1ed   : > { %5100 = vmatpush2.bf16.msra.mxu0 %v7619_v37  ;;  %v7688_v37 = vld [vmem:[#allocation7 + $0xbe0] ss:$16 sps:$4 sm:$0xff]  }
 0x1ee   : > { %5143 = vmatpush2.bf16.msra.mxu1 %v7622_v38  ;;  %5101 = vmatprep.subr.bf16.mxu0 %v7627_v54  ;;  %v7693_v38 = vld [vmem:[#allocation7 + $0x9c4] ss:$16 sps:$4 sm:$0xff]  }
 0x1ef   : > { %5144 = vmatprep.subr.bf16.mxu1 %v7630_v22  ;;  %v7696_v54 = vld [vmem:[#allocation7 + $0xbc4] ss:$16 sps:$4 sm:$0xff]   ;;  %v7691_v22 = vld [vmem:[#allocation7 + $0x9c0] ss:$16 sps:$4 sm:$0xff]  }
 0x1f1   : > { %5102 = vmatpush2.bf16.msra.mxu0 %v7625_v40  ;;  %v7694_v40 = vld [vmem:[#allocation7 + $0xbc0] ss:$16 sps:$4 sm:$0xff]  }
 0x1f2   : > { %5145 = vmatpush2.bf16.msra.mxu1 %v7628_v41  ;;  %5103 = vmatprep.subr.bf16.mxu0 %v7633_v42  ;;  %v7699_v41 = vld [vmem:[#allocation7 + $0x9a4] ss:$16 sps:$4 sm:$0xff]  }
 0x1f3   : > { %5146 = vmatprep.subr.bf16.mxu1 %v7636_v45  ;;  %v7702_v42 = vld [vmem:[#allocation7 + $0xba4] ss:$16 sps:$4 sm:$0xff]   ;;  %v7697_v45 = vld [vmem:[#allocation7 + $0x9a0] ss:$16 sps:$4 sm:$0xff]  }
 0x1f5   : > { %5104 = vmatpush2.bf16.msra.mxu0 %v7631_v46  ;;  %v7700_v46 = vld [vmem:[#allocation7 + $0xba0] ss:$16 sps:$4 sm:$0xff]  }
 0x1f6   : > { %5147 = vmatpush2.bf16.msra.mxu1 %v7634_v47  ;;  %5159 = vmatprep.subr.bf16.mxu0 %v7639_v53  ;;  %v7705_v47 = vld [vmem:[#allocation7 + $0x984] ss:$16 sps:$4 sm:$0xff]   ;;  %v7706_v53 = vld [vmem:[#allocation7 + $0xb80] ss:$16 sps:$4 sm:$0xff]  }
 0x1f7   : > { %5202 = vmatprep.subr.bf16.mxu1 %v7642_v55  ;;  %v7711_v55 = vld [vmem:[#allocation7 + $0x964] ss:$16 sps:$4 sm:$0xff]  }
 0x1f8   : > { %5106 = vmatmul.mubr.bf16.vlgmr.msra.gmra.mxu0 %v8878_v57 }
 0x1f9   : > { %5149 = vmatmul.mubr.bf16.vlgmr.msra.gmra.mxu1 %v8880_v58  ;;  %5160 = vmatpush1.bf16.msra.mxu0 %v7637_v62  ;;  %v7712_v62 = vld [vmem:[#allocation7 + $0xb60] ss:$16 sps:$4 sm:$0xff]  }
 0x1fa   : > { %5203 = vmatpush1.bf16.msra.mxu1 %v7640_v63  ;;  %5161 = vmatprep.subr.bf16.mxu0 %v7645_v0  ;;  %v7717_v63 = vld [vmem:[#allocation7 + $0x944] ss:$16 sps:$4 sm:$0xff]  }
 0x1fb   : > { %5204 = vmatprep.subr.bf16.mxu1 %v7648_v1  ;;  %5191 = vmatprep.mubr.bf16.mxu0 %v8885_v4  ;;  %v7720_v0 = vld [vmem:[#allocation7 + $0xb44] ss:$16 sps:$4 sm:$0xff]   ;;  %v8901_v1 = vpop.f32.mrf.mxu0 }
 0x1fc   : > { %5234 = vmatprep.mubr.bf16.mxu1 %v8887_v5 }
 0x1fd   : > { %5162 = vmatpush1.bf16.msra.mxu0 %v7643_v2  ;;  %v8903_v2 = vpop.f32.mrf.mxu1 }
 0x1fe   : > { %5205 = vmatpush1.bf16.msra.mxu1 %v7646_v3  ;;  %5163 = vmatprep.subr.bf16.mxu0 %v7651_v6  ;;  %v7715_v3 = vld [vmem:[#allocation7 + $0x940] ss:$16 sps:$4 sm:$0xff]  }
 0x1ff   : > { %5206 = vmatprep.subr.bf16.mxu1 %v7654_v7  ;;  %v7718_v6 = vld [vmem:[#allocation7 + $0xb40] ss:$16 sps:$4 sm:$0xff]   ;;  %v8905_v7 = vpop.f32.mrf.mxu0 }
 0x201   : > { %5164 = vmatpush1.bf16.msra.mxu0 %v7649_v8  ;;  %v2332_v8 = vpop.f32.mrf.mxu1 }
 0x202   : > { %5207 = vmatpush1.bf16.msra.mxu1 %v7652_v9  ;;  %5165 = vmatprep.subr.bf16.mxu0 %v7657_v10  ;;  %v7723_v9 = vld [vmem:[#allocation7 + $0x924] ss:$16 sps:$4 sm:$0xff]  }
 0x203   : > { %5208 = vmatprep.subr.bf16.mxu1 %v7660_v11  ;;  %v7726_v10 = vld [vmem:[#allocation7 + $0xb24] ss:$16 sps:$4 sm:$0xff]   ;;  %v7721_v11 = vld [vmem:[#allocation7 + $0x920] ss:$16 sps:$4 sm:$0xff]  }
 0x205   : > { %5166 = vmatpush1.bf16.msra.mxu0 %v7655_v14  ;;  %v7724_v14 = vld [vmem:[#allocation7 + $0xb20] ss:$16 sps:$4 sm:$0xff]  }
 0x206   : > { %5209 = vmatpush1.bf16.msra.mxu1 %v7658_v15  ;;  %5167 = vmatprep.subr.bf16.mxu0 %v7663_v16  ;;  %v8907_v15 = vpop.f32.mrf.mxu0  ;;  %v2334_v16 = vpop.f32.mrf.mxu1 }
 0x207   : > { %5210 = vmatprep.subr.bf16.mxu1 %v7666_v17  ;;  %v7729_v17 = vld [vmem:[#allocation7 + $0x904] ss:$16 sps:$4 sm:$0xff]  }
 0x209   : > { %5168 = vmatpush1.bf16.msra.mxu0 %v7661_v18  ;;  %v7732_v18 = vld [vmem:[#allocation7 + $0xb04] ss:$16 sps:$4 sm:$0xff]  }
 0x20a   : > { %5211 = vmatpush1.bf16.msra.mxu1 %v7664_v19  ;;  %5169 = vmatprep.subr.bf16.mxu0 %v7669_v20  ;;  %v7727_v19 = vld [vmem:[#allocation7 + $0x900] ss:$16 sps:$4 sm:$0xff]  }
 0x20b   : > { %5212 = vmatprep.subr.bf16.mxu1 %v7672_v21  ;;  %v7730_v20 = vld [vmem:[#allocation7 + $0xb00] ss:$16 sps:$4 sm:$0xff]  }
 0x20c   : > { %v447_v21 = vld [vmem:[%s8783_s29 + $0x40] sm:$0xff] }
 0x20d   : > { %5170 = vmatpush1.bf16.msra.mxu0 %v7667_v23  ;;  %v463_v23 = vld [vmem:[%s8783_s29 + $0xc0] sm:$0xff] }
 0x20e   : > { %5213 = vmatpush1.bf16.msra.mxu1 %v7670_v24  ;;  %5171 = vmatprep.subr.bf16.mxu0 %v7675_v25  ;;  %v449_v24 = vld [vmem:[%s8783_s29 + $0x50] sm:$0xff] }
 0x20f   : > { %5214 = vmatprep.subr.bf16.mxu1 %v7678_v26  ;;  %v465_v25 = vld [vmem:[%s8783_s29 + $0xd0] sm:$0xff] }
 0x210   : > { %v7735_v26 = vld [vmem:[#allocation7 + $0xce4] ss:$16 sps:$4 sm:$0xff]  }
 0x211   : > { %5172 = vmatpush1.bf16.msra.mxu0 %v7673_v27  ;;  %v7738_v27 = vld [vmem:[#allocation7 + $0xee4] ss:$16 sps:$4 sm:$0xff]  }
 0x212   : > { %5215 = vmatpush1.bf16.msra.mxu1 %v7676_v28  ;;  %5173 = vmatprep.subr.bf16.mxu0 %v7681_v29  ;;  %v8913_v28 = vpop.f32.mrf.mxu0  ;;  %v2336_v29 = vpop.f32.mrf.mxu1 }
 0x213   : > { %5216 = vmatprep.subr.bf16.mxu1 %v7684_v30  ;;  %v452_v30 = vld [vmem:[%s8783_s29 + $0x68] sm:$0xff] }
 0x215   : > { %5174 = vmatpush1.bf16.msra.mxu0 %v7679_v31  ;;  %v468_v31 = vld [vmem:[%s8783_s29 + $0xe8] sm:$0xff] }
 0x216   : > { %5217 = vmatpush1.bf16.msra.mxu1 %v7682_v32  ;;  %5175 = vmatprep.subr.bf16.mxu0 %v7687_v34  ;;  %v454_v32 = vld [vmem:[%s8783_s29 + $0x78] sm:$0xff] }
 0x217   : > { %5218 = vmatprep.subr.bf16.mxu1 %v7690_v35  ;;  %v470_v34 = vld [vmem:[%s8783_s29 + $0xf8] sm:$0xff]  ;;  %v7733_v35 = vld [vmem:[#allocation7 + $0xce0] ss:$16 sps:$4 sm:$0xff]  }
 0x219   : > { %5176 = vmatpush2.bf16.msra.mxu0 %v7685_v36  ;;  %v7736_v36 = vld [vmem:[#allocation7 + $0xee0] ss:$16 sps:$4 sm:$0xff]  }
 0x21a   : > { %5219 = vmatpush2.bf16.msra.mxu1 %v7688_v37  ;;  %5177 = vmatprep.subr.bf16.mxu0 %v7693_v38  ;;  %v8919_v37 = vpack.c.bf16 %v463_v23, %v447_v21  ;;  %v8921_v38 = vpack.c.bf16 %v465_v25, %v449_v24  ;;  %v7751_v23 = vld [vmem:[#allocation7 + $0xc80] ss:$16 sps:$4 sm:$0xff]   ;;  %v7759_v25 = vld [vmem:[#allocation7 + $0xc64] ss:$16 sps:$4 sm:$0xff]  }
 0x21b   : > { %5220 = vmatprep.subr.bf16.mxu1 %v7696_v54  ;;  %v8923_v54 = vpop.f32.mrf.mxu0  ;;  %v7754_v24 = vld [vmem:[#allocation7 + $0xe80] ss:$16 sps:$4 sm:$0xff]  }
 0x21d   : > { %5178 = vmatpush2.bf16.msra.mxu0 %v7691_v22  ;;  %v2338_v22 = vpop.f32.mrf.mxu1 }
 0x21e   : > { %5221 = vmatpush2.bf16.msra.mxu1 %v7694_v40  ;;  %5179 = vmatprep.subr.bf16.mxu0 %v7699_v41  ;;  %v7741_v40 = vld [vmem:[#allocation7 + $0xcc4] ss:$16 sps:$4 sm:$0xff]  }
 0x21f   : > { %5222 = vmatprep.subr.bf16.mxu1 %v7702_v42  ;;  %v7744_v41 = vld [vmem:[#allocation7 + $0xec4] ss:$16 sps:$4 sm:$0xff]   ;;  %v7739_v42 = vld [vmem:[#allocation7 + $0xcc0] ss:$16 sps:$4 sm:$0xff]  }
 0x221   : > { %5180 = vmatpush2.bf16.msra.mxu0 %v7697_v45  ;;  %v7742_v45 = vld [vmem:[#allocation7 + $0xec0] ss:$16 sps:$4 sm:$0xff]  }
 0x222   : > { %5223 = vmatpush2.bf16.msra.mxu1 %v7700_v46  ;;  %5181 = vmatprep.subr.bf16.mxu0 %v7705_v47  ;;  %v8925_v46 = vpack.c.bf16 %v468_v31, %v452_v30  ;;  %v8927_v47 = vpack.c.bf16 %v470_v34, %v454_v32  ;;  %v7765_v30 = vld [vmem:[#allocation7 + $0xc44] ss:$16 sps:$4 sm:$0xff]   ;;  %v7763_v32 = vld [vmem:[#allocation7 + $0xc40] ss:$16 sps:$4 sm:$0xff]  }
 0x223   : > { %5224 = vmatprep.subr.bf16.mxu1 %v7708_v48  ;;  %v7768_v31 = vld [vmem:[#allocation7 + $0xe44] ss:$16 sps:$4 sm:$0xff]   ;;  %v7766_v34 = vld [vmem:[#allocation7 + $0xe40] ss:$16 sps:$4 sm:$0xff]  }
 0x225   : > { %5182 = vmatpush2.bf16.msra.mxu0 %v7703_v52 }
 0x226   : > { %5225 = vmatpush2.bf16.msra.mxu1 %v7706_v53  ;;  %5183 = vmatprep.subr.bf16.mxu0 %v7711_v55 }
 0x227   : > { %5226 = vmatprep.subr.bf16.mxu1 %v7714_v56 }
 0x229   : > { %5184 = vmatpush2.bf16.msra.mxu0 %v7709_v61  ;;  %v7747_v61 = vld [vmem:[#allocation7 + $0xca4] ss:$16 sps:$4 sm:$0xff]  }
 0x22a   : > { %5227 = vmatpush2.bf16.msra.mxu1 %v7712_v62  ;;  %5185 = vmatprep.subr.bf16.mxu0 %v7717_v63  ;;  %v7750_v62 = vld [vmem:[#allocation7 + $0xea4] ss:$16 sps:$4 sm:$0xff]  }
 0x22b   : > { %5228 = vmatprep.subr.bf16.mxu1 %v7720_v0 }
 0x22d   : > { %5186 = vmatpush2.bf16.msra.mxu0 %v7715_v3  ;;  %v7745_v3 = vld [vmem:[#allocation7 + $0xca0] ss:$16 sps:$4 sm:$0xff]  }
 0x22e   : > { %5229 = vmatpush2.bf16.msra.mxu1 %v7718_v6  ;;  %5187 = vmatprep.subr.bf16.mxu0 %v7723_v9  ;;  %v7748_v6 = vld [vmem:[#allocation7 + $0xea0] ss:$16 sps:$4 sm:$0xff]  }
 0x22f   : > { %5230 = vmatprep.subr.bf16.mxu1 %v7726_v10 }
 0x231   : > { %5188 = vmatpush2.bf16.msra.mxu0 %v7721_v11 }
 0x232   : > { %5231 = vmatpush2.bf16.msra.mxu1 %v7724_v14  ;;  %5189 = vmatprep.subr.bf16.mxu0 %v7729_v17  ;;  %v7753_v17 = vld [vmem:[#allocation7 + $0xc84] ss:$16 sps:$4 sm:$0xff]  }
 0x233   : > { %5232 = vmatprep.subr.bf16.mxu1 %v7732_v18  ;;  %v7756_v18 = vld [vmem:[#allocation7 + $0xe84] ss:$16 sps:$4 sm:$0xff]  }
 0x235   : > { %5190 = vmatpush2.bf16.msra.mxu0 %v7727_v19 }
 0x236   : > { %5233 = vmatpush2.bf16.msra.mxu1 %v7730_v20  ;;  %5245 = vmatprep.subr.bf16.mxu0 %v7735_v26  ;;  %v7762_v26 = vld [vmem:[#allocation7 + $0xe64] ss:$16 sps:$4 sm:$0xff]  }
 0x237   : > { %5288 = vmatprep.subr.bf16.mxu1 %v7738_v27  ;;  %v7757_v27 = vld [vmem:[#allocation7 + $0xc60] ss:$16 sps:$4 sm:$0xff]  }
 0x238   : > { %v2375_v48 = vpop.f32.mrf.mxu0  ;;  %5192 = vmatmul.mubr.bf16.vlgmr.msra.gmra.mxu0 %v8919_v37 }
 0x239   : > { %v2418_v52 = vpop.f32.mrf.mxu1  ;;  %5235 = vmatmul.mubr.bf16.vlgmr.msra.gmra.mxu1 %v8921_v38  ;;  %v2376_v53 = vadd.f32 %v2375_v48, %v2332_v8  ;;  %5246 = vmatpush1.bf16.msra.mxu0 %v7733_v35  ;;  %v7771_v35 = vld [vmem:[#allocation7 + $0xc24] ss:$16 sps:$4 sm:$0xff]   ;;  %v7778_v48 = vld [vmem:[#allocation7 + $0xe00] ss:$16 sps:$4 sm:$0xff]  }
 0x23a   : > { %5289 = vmatpush1.bf16.msra.mxu1 %v7736_v36  ;;  %v2377_v55 = vpop.f32.mrf.mxu0  ;;  %5247 = vmatprep.subr.bf16.mxu0 %v7741_v40  ;;  %v7774_v36 = vld [vmem:[#allocation7 + $0xe24] ss:$16 sps:$4 sm:$0xff]   ;;  %v7772_v40 = vld [vmem:[#allocation7 + $0xe20] ss:$16 sps:$4 sm:$0xff]  }
 0x23b   : > { %v2420_v56 = vpop.f32.mrf.mxu1  ;;  %5290 = vmatprep.subr.bf16.mxu1 %v7744_v41  ;;  %v8931_v63 = vadd.f32 %v2418_v52, %v2376_v53  ;;  %v2378_v0 = vadd.f32 %v2377_v55, %v2334_v16  ;;  %5277 = vmatprep.mubr.bf16.mxu0 %v8925_v46  ;;  %v7777_v41 = vld [vmem:[#allocation7 + $0xc04] ss:$16 sps:$4 sm:$0xff]   ;;  %v7781_v55 = vld [vmem:[#allocation7 + $0xde0] ss:$16 sps:$4 sm:$0xff]  }
 0x23c   : > { %5320 = vmatprep.mubr.bf16.mxu1 %v8927_v47  ;;  %v2379_v9 = vpop.f32.mrf.mxu0  ;;  %v7783_v52 = vld [vmem:[#allocation7 + $0xde4] ss:$16 sps:$4 sm:$0xff]  }
 0x23d   : > { %v2422_v10 = vpop.f32.mrf.mxu1  ;;  %v8935_v8 = vadd.f32 %v2420_v56, %v2378_v0  ;;  %v2380_v11 = vadd.f32 %v2379_v9, %v2336_v29  ;;  %5248 = vmatpush1.bf16.msra.mxu0 %v7739_v42  ;;  %v7760_v29 = vld [vmem:[#allocation7 + $0xe60] ss:$16 sps:$4 sm:$0xff]   ;;  %v7780_v42 = vld [vmem:[#allocation7 + $0xe04] ss:$16 sps:$4 sm:$0xff]  }
 0x23e   : > { %5291 = vmatpush1.bf16.msra.mxu1 %v7742_v45  ;;  %v2381_v14 = vpop.f32.mrf.mxu0  ;;  %5249 = vmatprep.subr.bf16.mxu0 %v7747_v61  ;;  %v7775_v45 = vld [vmem:[#allocation7 + $0xc00] ss:$16 sps:$4 sm:$0xff]   ;;  %v7786_v53 = vld [vmem:[#allocation7 + $0xfe4] ss:$16 sps:$4 sm:$0xff]  }
 0x23f   : > { %5292 = vmatprep.subr.bf16.mxu1 %v7750_v62  ;;  %v8937_v19 = vadd.f32 %v2422_v10, %v2380_v11  ;;  %v2382_v16 = vadd.f32 %v2381_v14, %v2338_v22  ;;  %v2424_v20 = vpop.f32.mrf.mxu1  ;;  %v7769_v22 = vld [vmem:[#allocation7 + $0xc20] ss:$16 sps:$4 sm:$0xff]   ;;  %v7789_v61 = vld [vmem:[#allocation7 + $0xdc4] ss:$16 sps:$4 sm:$0xff]  }
 0x240   : > { %v7784_v56 = vld [vmem:[#allocation7 + $0xfe0] ss:$16 sps:$4 sm:$0xff]   ;;  %v7792_v62 = vld [vmem:[#allocation7 + $0xfc4] ss:$16 sps:$4 sm:$0xff]  }
 0x241   : > { %v8939_v21 = vadd.f32 %v2424_v20, %v2382_v16  ;;  %5250 = vmatpush1.bf16.msra.mxu0 %v7745_v3  ;;  %v7787_v0 = vld [vmem:[#allocation7 + $0xdc0] ss:$16 sps:$4 sm:$0xff]   ;;  %v7798_v9 = vld [vmem:[#allocation7 + $0xfa4] ss:$16 sps:$4 sm:$0xff]  }
 0x242   : > { %5293 = vmatpush1.bf16.msra.mxu1 %v7748_v6  ;;  %5251 = vmatprep.subr.bf16.mxu0 %v7753_v17  ;;  %v7790_v3 = vld [vmem:[#allocation7 + $0xfc0] ss:$16 sps:$4 sm:$0xff]   ;;  %v7795_v6 = vld [vmem:[#allocation7 + $0xda4] ss:$16 sps:$4 sm:$0xff]  }
 0x243   : > { %5294 = vmatprep.subr.bf16.mxu1 %v7756_v18  ;;  %v7793_v10 = vld [vmem:[#allocation7 + $0xda0] ss:$16 sps:$4 sm:$0xff]   ;;  %v7801_v14 = vld [vmem:[#allocation7 + $0xd84] ss:$16 sps:$4 sm:$0xff]  }
 0x244   : > { %v7796_v11 = vld [vmem:[#allocation7 + $0xfa0] ss:$16 sps:$4 sm:$0xff]   ;;  %v7804_v17 = vld [vmem:[#allocation7 + $0xf84] ss:$16 sps:$4 sm:$0xff]  }
 0x245   : > { %5252 = vmatpush1.bf16.msra.mxu0 %v7751_v23  ;;  %v7799_v18 = vld [vmem:[#allocation7 + $0xd80] ss:$16 sps:$4 sm:$0xff]   ;;  %v7807_v20 = vld [vmem:[#allocation7 + $0xd64] ss:$16 sps:$4 sm:$0xff]  }
 0x246   : > { %5295 = vmatpush1.bf16.msra.mxu1 %v7754_v24  ;;  %5253 = vmatprep.subr.bf16.mxu0 %v7759_v25  ;;  %v7802_v16 = vld [vmem:[#allocation7 + $0xf80] ss:$16 sps:$4 sm:$0xff]   ;;  %v7810_v23 = vld [vmem:[#allocation7 + $0xf64] ss:$16 sps:$4 sm:$0xff]  }
 0x247   : > { %5296 = vmatprep.subr.bf16.mxu1 %v7762_v26  ;;  %v7805_v24 = vld [vmem:[#allocation7 + $0xd60] ss:$16 sps:$4 sm:$0xff]   ;;  %v7813_v26 = vld [vmem:[#allocation7 + $0xd44] ss:$16 sps:$4 sm:$0xff]  }
 0x248   : > { %v7808_v25 = vld [vmem:[#allocation7 + $0xf60] ss:$16 sps:$4 sm:$0xff]  }
 0x249   : > { %5254 = vmatpush1.bf16.msra.mxu0 %v7757_v27  ;;  %v7816_v27 = vld [vmem:[#allocation7 + $0xf44] ss:$16 sps:$4 sm:$0xff]  }
 0x24a   : > { %5297 = vmatpush1.bf16.msra.mxu1 %v7760_v29  ;;  %5255 = vmatprep.subr.bf16.mxu0 %v7765_v30  ;;  %v7811_v29 = vld [vmem:[#allocation7 + $0xd40] ss:$16 sps:$4 sm:$0xff]  }
 0x24b   : > { %5298 = vmatprep.subr.bf16.mxu1 %v7768_v31  ;;  %v7814_v30 = vld [vmem:[#allocation7 + $0xf40] ss:$16 sps:$4 sm:$0xff]   ;;  %v7819_v31 = vld [vmem:[#allocation7 + $0xd24] ss:$16 sps:$4 sm:$0xff]  }
 0x24d   : > { %5256 = vmatpush1.bf16.msra.mxu0 %v7763_v32  ;;  %v7822_v32 = vld [vmem:[#allocation7 + $0xf24] ss:$16 sps:$4 sm:$0xff]  }
 0x24e   : > { %5299 = vmatpush1.bf16.msra.mxu1 %v7766_v34  ;;  %5257 = vmatprep.subr.bf16.mxu0 %v7771_v35  ;;  %v7817_v34 = vld [vmem:[#allocation7 + $0xd20] ss:$16 sps:$4 sm:$0xff]  }
 0x24f   : > { %5300 = vmatprep.subr.bf16.mxu1 %v7774_v36  ;;  %v7820_v35 = vld [vmem:[#allocation7 + $0xf20] ss:$16 sps:$4 sm:$0xff]   ;;  %v7825_v36 = vld [vmem:[#allocation7 + $0xd04] ss:$16 sps:$4 sm:$0xff]  }
 0x251   : > { %5258 = vmatpush1.bf16.msra.mxu0 %v7769_v22  ;;  %v7828_v22 = vld [vmem:[#allocation7 + $0xf04] ss:$16 sps:$4 sm:$0xff]  }
 0x252   : > { %5301 = vmatpush1.bf16.msra.mxu1 %v7772_v40  ;;  %5259 = vmatprep.subr.bf16.mxu0 %v7777_v41  ;;  %v7823_v40 = vld [vmem:[#allocation7 + $0xd00] ss:$16 sps:$4 sm:$0xff]  }
 0x253   : > { %5302 = vmatprep.subr.bf16.mxu1 %v7780_v42  ;;  %v7826_v41 = vld [vmem:[#allocation7 + $0xf00] ss:$16 sps:$4 sm:$0xff]  }
 0x254   : > { %v451_v42 = vld [vmem:[%s8783_s29 + $0x60] sm:$0xff] }
 0x255   : > { %5260 = vmatpush1.bf16.msra.mxu0 %v7775_v45  ;;  %v467_v45 = vld [vmem:[%s8783_s29 + $0xe0] sm:$0xff] }
 0x256   : > { %5303 = vmatpush1.bf16.msra.mxu1 %v7778_v48  ;;  %5261 = vmatprep.subr.bf16.mxu0 %v7783_v52  ;;  %v453_v48 = vld [vmem:[%s8783_s29 + $0x70] sm:$0xff] }
 0x257   : > { %5304 = vmatprep.subr.bf16.mxu1 %v7786_v53  ;;  %v469_v52 = vld [vmem:[%s8783_s29 + $0xf0] sm:$0xff]  ;;  %v7831_v53 = vld [vmem:[#allocation7 + $0xec] ss:$16 sps:$4 sm:$0xff]  }
 0x259   : > { %5262 = vmatpush2.bf16.msra.mxu0 %v7781_v55  ;;  %v7834_v55 = vld [vmem:[#allocation7 + $0x2ec] ss:$16 sps:$4 sm:$0xff]  }
 0x25a   : > { %5305 = vmatpush2.bf16.msra.mxu1 %v7784_v56  ;;  %5263 = vmatprep.subr.bf16.mxu0 %v7789_v61  ;;  %v7829_v56 = vld [vmem:[#allocation7 + $0xe8] ss:$16 sps:$4 sm:$0xff]  }
 0x25b   : > { %5306 = vmatprep.subr.bf16.mxu1 %v7792_v62  ;;  %v7832_v61 = vld [vmem:[#allocation7 + $0x2e8] ss:$16 sps:$4 sm:$0xff]   ;;  %v8945_v62 = vpack.c.bf16 %v467_v45, %v451_v42  ;;  %v7879_v45 = vld [vmem:[#allocation7 + $0x1ec] ss:$16 sps:$4 sm:$0xff]  }
 0x25c   : > { %v7874_v42 = vld [vmem:[#allocation7 + $0x208] ss:$16 sps:$4 sm:$0xff]  }
 0x25d   : > { %5264 = vmatpush2.bf16.msra.mxu0 %v7787_v0  ;;  %v8947_v0 = vpack.c.bf16 %v469_v52, %v453_v48  ;;  %v7882_v48 = vld [vmem:[#allocation7 + $0x3ec] ss:$16 sps:$4 sm:$0xff]   ;;  %v7877_v52 = vld [vmem:[#allocation7 + $0x1e8] ss:$16 sps:$4 sm:$0xff]  }
 0x25e   : > { %5307 = vmatpush2.bf16.msra.mxu1 %v7790_v3  ;;  %5265 = vmatprep.subr.bf16.mxu0 %v7795_v6  ;;  %v7837_v3 = vld [vmem:[#allocation7 + $0xcc] ss:$16 sps:$4 sm:$0xff]  }
 0x25f   : > { %5308 = vmatprep.subr.bf16.mxu1 %v7798_v9  ;;  %v7840_v6 = vld [vmem:[#allocation7 + $0x2cc] ss:$16 sps:$4 sm:$0xff]   ;;  %v7835_v9 = vld [vmem:[#allocation7 + $0xc8] ss:$16 sps:$4 sm:$0xff]  }
 0x261   : > { %5266 = vmatpush2.bf16.msra.mxu0 %v7793_v10  ;;  %v7838_v10 = vld [vmem:[#allocation7 + $0x2c8] ss:$16 sps:$4 sm:$0xff]  }
 0x262   : > { %5309 = vmatpush2.bf16.msra.mxu1 %v7796_v11  ;;  %5267 = vmatprep.subr.bf16.mxu0 %v7801_v14  ;;  %v7843_v11 = vld [vmem:[#allocation7 + $0xac] ss:$16 sps:$4 sm:$0xff]  }
 0x263   : > { %5310 = vmatprep.subr.bf16.mxu1 %v7804_v17  ;;  %v7846_v14 = vld [vmem:[#allocation7 + $0x2ac] ss:$16 sps:$4 sm:$0xff]   ;;  %v7841_v17 = vld [vmem:[#allocation7 + $0xa8] ss:$16 sps:$4 sm:$0xff]  }
 0x265   : > { %5268 = vmatpush2.bf16.msra.mxu0 %v7799_v18  ;;  %v7844_v18 = vld [vmem:[#allocation7 + $0x2a8] ss:$16 sps:$4 sm:$0xff]  }
 0x266   : > { %5311 = vmatpush2.bf16.msra.mxu1 %v7802_v16  ;;  %5269 = vmatprep.subr.bf16.mxu0 %v7807_v20  ;;  %v7849_v16 = vld [vmem:[#allocation7 + $0x8c] ss:$16 sps:$4 sm:$0xff]  }
 0x267   : > { %5312 = vmatprep.subr.bf16.mxu1 %v7810_v23  ;;  %v7852_v20 = vld [vmem:[#allocation7 + $0x28c] ss:$16 sps:$4 sm:$0xff]   ;;  %v7847_v23 = vld [vmem:[#allocation7 + $0x88] ss:$16 sps:$4 sm:$0xff]  }
 0x269   : > { %5270 = vmatpush2.bf16.msra.mxu0 %v7805_v24  ;;  %v7850_v24 = vld [vmem:[#allocation7 + $0x288] ss:$16 sps:$4 sm:$0xff]  }
 0x26a   : > { %5313 = vmatpush2.bf16.msra.mxu1 %v7808_v25  ;;  %5271 = vmatprep.subr.bf16.mxu0 %v7813_v26  ;;  %v7855_v25 = vld [vmem:[#allocation7 + $0x6c] ss:$16 sps:$4 sm:$0xff]  }
 0x26b   : > { %5314 = vmatprep.subr.bf16.mxu1 %v7816_v27  ;;  %v7858_v26 = vld [vmem:[#allocation7 + $0x26c] ss:$16 sps:$4 sm:$0xff]   ;;  %v7853_v27 = vld [vmem:[#allocation7 + $0x68] ss:$16 sps:$4 sm:$0xff]  }
 0x26d   : > { %5272 = vmatpush2.bf16.msra.mxu0 %v7811_v29  ;;  %v7864_v29 = vld [vmem:[#allocation7 + $0x24c] ss:$16 sps:$4 sm:$0xff]  }
 0x26e   : > { %5315 = vmatpush2.bf16.msra.mxu1 %v7814_v30  ;;  %5273 = vmatprep.subr.bf16.mxu0 %v7819_v31  ;;  %v7859_v30 = vld [vmem:[#allocation7 + $0x48] ss:$16 sps:$4 sm:$0xff]  }
 0x26f   : > { %5316 = vmatprep.subr.bf16.mxu1 %v7822_v32  ;;  %v7862_v31 = vld [vmem:[#allocation7 + $0x248] ss:$16 sps:$4 sm:$0xff]   ;;  %v7867_v32 = vld [vmem:[#allocation7 + $0x2c] ss:$16 sps:$4 sm:$0xff]  }
 0x271   : > { %5274 = vmatpush2.bf16.msra.mxu0 %v7817_v34  ;;  %v7870_v34 = vld [vmem:[#allocation7 + $0x22c] ss:$16 sps:$4 sm:$0xff]  }
 0x272   : > { %5317 = vmatpush2.bf16.msra.mxu1 %v7820_v35  ;;  %5275 = vmatprep.subr.bf16.mxu0 %v7825_v36  ;;  %v7865_v35 = vld [vmem:[#allocation7 + $0x28] ss:$16 sps:$4 sm:$0xff]  }
 0x273   : > { %5318 = vmatprep.subr.bf16.mxu1 %v7828_v22  ;;  %v7868_v36 = vld [vmem:[#allocation7 + $0x228] ss:$16 sps:$4 sm:$0xff]   ;;  %v7873_v22 = vld [vmem:[#allocation7 + $0xc] ss:$16 sps:$4 sm:$0xff]  }
 0x275   : > { %5276 = vmatpush2.bf16.msra.mxu0 %v7823_v40  ;;  %v7876_v40 = vld [vmem:[#allocation7 + $0x20c] ss:$16 sps:$4 sm:$0xff]  }
 0x276   : > { %5319 = vmatpush2.bf16.msra.mxu1 %v7826_v41  ;;  %5331 = vmatprep.subr.bf16.mxu0 %v7831_v53  ;;  %v7871_v41 = vld [vmem:[#allocation7 + $0x8] ss:$16 sps:$4 sm:$0xff]  }
 0x277   : > { %5374 = vmatprep.subr.bf16.mxu1 %v7834_v55  ;;  %v7880_v53 = vld [vmem:[#allocation7 + $0x3e8] ss:$16 sps:$4 sm:$0xff]   ;;  %v7885_v55 = vld [vmem:[#allocation7 + $0x1cc] ss:$16 sps:$4 sm:$0xff]  }
 0x278   : > { %5278 = vmatmul.mubr.bf16.vlgmr.msra.gmra.mxu0 %v8945_v62 }
 0x279   : > { %5321 = vmatmul.mubr.bf16.vlgmr.msra.gmra.mxu1 %v8947_v0  ;;  %5332 = vmatpush1.bf16.msra.mxu0 %v7829_v56  ;;  %v7888_v56 = vld [vmem:[#allocation7 + $0x3cc] ss:$16 sps:$4 sm:$0xff]  }
 0x27a   : > { %5375 = vmatpush1.bf16.msra.mxu1 %v7832_v61  ;;  %5333 = vmatprep.subr.bf16.mxu0 %v7837_v3  ;;  %v7883_v61 = vld [vmem:[#allocation7 + $0x1c8] ss:$16 sps:$4 sm:$0xff]  }
 0x27b   : > { %5376 = vmatprep.subr.bf16.mxu1 %v7840_v6  ;;  %5363 = vmatprep.mubr.bf16.mxu0 %v8843_v33  ;;  %v7856_v33 = vld [vmem:[#allocation7 + $0x268] ss:$16 sps:$4 sm:$0xff]   ;;  %v7891_v6 = vld [vmem:[#allocation7 + $0x1ac] ss:$16 sps:$4 sm:$0xff]  }
 0x27c   : > { %5406 = vmatprep.mubr.bf16.mxu1 %v8845_v12  ;;  %v7861_v12 = vld [vmem:[#allocation7 + $0x4c] ss:$16 sps:$4 sm:$0xff]   ;;  %v7886_v3 = vld [vmem:[#allocation7 + $0x3c8] ss:$16 sps:$4 sm:$0xff]  }
 0x27d   : > { %5334 = vmatpush1.bf16.msra.mxu0 %v7835_v9  ;;  %v7894_v9 = vld [vmem:[#allocation7 + $0x3ac] ss:$16 sps:$4 sm:$0xff]  }
 0x27e   : > { %5377 = vmatpush1.bf16.msra.mxu1 %v7838_v10  ;;  %5335 = vmatprep.subr.bf16.mxu0 %v7843_v11  ;;  %v7889_v10 = vld [vmem:[#allocation7 + $0x1a8] ss:$16 sps:$4 sm:$0xff]  }
 0x27f   : > { %5378 = vmatprep.subr.bf16.mxu1 %v7846_v14  ;;  %v7892_v11 = vld [vmem:[#allocation7 + $0x3a8] ss:$16 sps:$4 sm:$0xff]   ;;  %v7897_v14 = vld [vmem:[#allocation7 + $0x18c] ss:$16 sps:$4 sm:$0xff]  }
 0x281   : > { %5336 = vmatpush1.bf16.msra.mxu0 %v7841_v17  ;;  %v7900_v17 = vld [vmem:[#allocation7 + $0x38c] ss:$16 sps:$4 sm:$0xff]  }
 0x282   : > { %5379 = vmatpush1.bf16.msra.mxu1 %v7844_v18  ;;  %5337 = vmatprep.subr.bf16.mxu0 %v7849_v16  ;;  %v7895_v18 = vld [vmem:[#allocation7 + $0x188] ss:$16 sps:$4 sm:$0xff]  }
 0x283   : > { %5380 = vmatprep.subr.bf16.mxu1 %v7852_v20  ;;  %v7898_v16 = vld [vmem:[#allocation7 + $0x388] ss:$16 sps:$4 sm:$0xff]   ;;  %v7903_v20 = vld [vmem:[#allocation7 + $0x16c] ss:$16 sps:$4 sm:$0xff]  }
 0x285   : > { %5338 = vmatpush1.bf16.msra.mxu0 %v7847_v23  ;;  %v7906_v23 = vld [vmem:[#allocation7 + $0x36c] ss:$16 sps:$4 sm:$0xff]  }
 0x286   : > { %5381 = vmatpush1.bf16.msra.mxu1 %v7850_v24  ;;  %5339 = vmatprep.subr.bf16.mxu0 %v7855_v25  ;;  %v7901_v24 = vld [vmem:[#allocation7 + $0x168] ss:$16 sps:$4 sm:$0xff]  }
 0x287   : > { %5382 = vmatprep.subr.bf16.mxu1 %v7858_v26  ;;  %v7904_v25 = vld [vmem:[#allocation7 + $0x368] ss:$16 sps:$4 sm:$0xff]   ;;  %v7909_v26 = vld [vmem:[#allocation7 + $0x14c] ss:$16 sps:$4 sm:$0xff]  }
 0x289   : > { %5340 = vmatpush1.bf16.msra.mxu0 %v7853_v27  ;;  %v7912_v27 = vld [vmem:[#allocation7 + $0x34c] ss:$16 sps:$4 sm:$0xff]  }
 0x28a   : > { %5383 = vmatpush1.bf16.msra.mxu1 %v7856_v33  ;;  %5341 = vmatprep.subr.bf16.mxu0 %v7861_v12  ;;  %v7907_v33 = vld [vmem:[#allocation7 + $0x148] ss:$16 sps:$4 sm:$0xff]  }
 0x28b   : > { %5384 = vmatprep.subr.bf16.mxu1 %v7864_v29  ;;  %v7910_v12 = vld [vmem:[#allocation7 + $0x348] ss:$16 sps:$4 sm:$0xff]   ;;  %v7915_v29 = vld [vmem:[#allocation7 + $0x12c] ss:$16 sps:$4 sm:$0xff]  }
 0x28d   : > { %5342 = vmatpush1.bf16.msra.mxu0 %v7859_v30  ;;  %v7918_v30 = vld [vmem:[#allocation7 + $0x32c] ss:$16 sps:$4 sm:$0xff]  }
 0x28e   : > { %5385 = vmatpush1.bf16.msra.mxu1 %v7862_v31  ;;  %5343 = vmatprep.subr.bf16.mxu0 %v7867_v32  ;;  %v7913_v31 = vld [vmem:[#allocation7 + $0x128] ss:$16 sps:$4 sm:$0xff]  }
 0x28f   : > { %5386 = vmatprep.subr.bf16.mxu1 %v7870_v34  ;;  %v7916_v32 = vld [vmem:[#allocation7 + $0x328] ss:$16 sps:$4 sm:$0xff]   ;;  %v7921_v34 = vld [vmem:[#allocation7 + $0x10c] ss:$16 sps:$4 sm:$0xff]  }
 0x291   : > { %5344 = vmatpush1.bf16.msra.mxu0 %v7865_v35  ;;  %v7924_v35 = vld [vmem:[#allocation7 + $0x30c] ss:$16 sps:$4 sm:$0xff]  }
 0x292   : > { %5387 = vmatpush1.bf16.msra.mxu1 %v7868_v36  ;;  %5345 = vmatprep.subr.bf16.mxu0 %v7873_v22  ;;  %v7919_v36 = vld [vmem:[#allocation7 + $0x108] ss:$16 sps:$4 sm:$0xff]  }
 0x293   : > { %5388 = vmatprep.subr.bf16.mxu1 %v7876_v40  ;;  %v7922_v22 = vld [vmem:[#allocation7 + $0x308] ss:$16 sps:$4 sm:$0xff]   ;;  %v7927_v40 = vld [vmem:[#allocation7 + $0x4ec] ss:$16 sps:$4 sm:$0xff]  }
 0x295   : > { %5346 = vmatpush1.bf16.msra.mxu0 %v7871_v41  ;;  %v7930_v41 = vld [vmem:[#allocation7 + $0x6ec] ss:$16 sps:$4 sm:$0xff]  }
 0x296   : > { %5389 = vmatpush1.bf16.msra.mxu1 %v7874_v42  ;;  %5347 = vmatprep.subr.bf16.mxu0 %v7879_v45  ;;  %v7925_v42 = vld [vmem:[#allocation7 + $0x4e8] ss:$16 sps:$4 sm:$0xff]  }
 0x297   : > { %5390 = vmatprep.subr.bf16.mxu1 %v7882_v48  ;;  %v7928_v45 = vld [vmem:[#allocation7 + $0x6e8] ss:$16 sps:$4 sm:$0xff]   ;;  %v7933_v48 = vld [vmem:[#allocation7 + $0x4cc] ss:$16 sps:$4 sm:$0xff]  }
 0x299   : > { %5348 = vmatpush2.bf16.msra.mxu0 %v7877_v52  ;;  %v7936_v52 = vld [vmem:[#allocation7 + $0x6cc] ss:$16 sps:$4 sm:$0xff]  }
 0x29a   : > { %5391 = vmatpush2.bf16.msra.mxu1 %v7880_v53  ;;  %5349 = vmatprep.subr.bf16.mxu0 %v7885_v55  ;;  %v7931_v53 = vld [vmem:[#allocation7 + $0x4c8] ss:$16 sps:$4 sm:$0xff]  }
 0x29b   : > { %5392 = vmatprep.subr.bf16.mxu1 %v7888_v56  ;;  %v7934_v55 = vld [vmem:[#allocation7 + $0x6c8] ss:$16 sps:$4 sm:$0xff]   ;;  %v7939_v56 = vld [vmem:[#allocation7 + $0x4ac] ss:$16 sps:$4 sm:$0xff]  }
 0x29d   : > { %5350 = vmatpush2.bf16.msra.mxu0 %v7883_v61  ;;  %v7942_v61 = vld [vmem:[#allocation7 + $0x6ac] ss:$16 sps:$4 sm:$0xff]  }
 0x29e   : > { %5393 = vmatpush2.bf16.msra.mxu1 %v7886_v3  ;;  %5351 = vmatprep.subr.bf16.mxu0 %v7891_v6  ;;  %v7937_v3 = vld [vmem:[#allocation7 + $0x4a8] ss:$16 sps:$4 sm:$0xff]  }
 0x29f   : > { %5394 = vmatprep.subr.bf16.mxu1 %v7894_v9  ;;  %v7940_v6 = vld [vmem:[#allocation7 + $0x6a8] ss:$16 sps:$4 sm:$0xff]  }
 0x2a0   : > { %v7943_v9 = vld [vmem:[#allocation7 + $0x488] ss:$16 sps:$4 sm:$0xff]  }
 0x2a1   : > { %5352 = vmatpush2.bf16.msra.mxu0 %v7889_v10  ;;  %v7946_v10 = vld [vmem:[#allocation7 + $0x688] ss:$16 sps:$4 sm:$0xff]  }
 0x2a2   : > { %5395 = vmatpush2.bf16.msra.mxu1 %v7892_v11  ;;  %5353 = vmatprep.subr.bf16.mxu0 %v7897_v14  ;;  %v7951_v11 = vld [vmem:[#allocation7 + $0x46c] ss:$16 sps:$4 sm:$0xff]  }
 0x2a3   : > { %5396 = vmatprep.subr.bf16.mxu1 %v7900_v17  ;;  %v7954_v14 = vld [vmem:[#allocation7 + $0x66c] ss:$16 sps:$4 sm:$0xff]  }
 0x2a4   : > { %v7957_v17 = vld [vmem:[#allocation7 + $0x44c] ss:$16 sps:$4 sm:$0xff]  }
 0x2a5   : > { %5354 = vmatpush2.bf16.msra.mxu0 %v7895_v18  ;;  %v7960_v18 = vld [vmem:[#allocation7 + $0x64c] ss:$16 sps:$4 sm:$0xff]  }
 0x2a6   : > { %5397 = vmatpush2.bf16.msra.mxu1 %v7898_v16  ;;  %5355 = vmatprep.subr.bf16.mxu0 %v7903_v20  ;;  %v7955_v16 = vld [vmem:[#allocation7 + $0x448] ss:$16 sps:$4 sm:$0xff]  }
 0x2a7   : > { %5398 = vmatprep.subr.bf16.mxu1 %v7906_v23  ;;  %v7958_v20 = vld [vmem:[#allocation7 + $0x648] ss:$16 sps:$4 sm:$0xff]   ;;  %v7963_v23 = vld [vmem:[#allocation7 + $0x42c] ss:$16 sps:$4 sm:$0xff]  }
 0x2a9   : > { %5356 = vmatpush2.bf16.msra.mxu0 %v7901_v24  ;;  %v7966_v24 = vld [vmem:[#allocation7 + $0x62c] ss:$16 sps:$4 sm:$0xff]  }
 0x2aa   : > { %5399 = vmatpush2.bf16.msra.mxu1 %v7904_v25  ;;  %5357 = vmatprep.subr.bf16.mxu0 %v7909_v26  ;;  %v7961_v25 = vld [vmem:[#allocation7 + $0x428] ss:$16 sps:$4 sm:$0xff]  }
 0x2ab   : > { %5400 = vmatprep.subr.bf16.mxu1 %v7912_v27  ;;  %v7964_v26 = vld [vmem:[#allocation7 + $0x628] ss:$16 sps:$4 sm:$0xff]   ;;  %v7969_v27 = vld [vmem:[#allocation7 + $0x40c] ss:$16 sps:$4 sm:$0xff]  }
 0x2ad   : > { %5358 = vmatpush2.bf16.msra.mxu0 %v7907_v33  ;;  %v7972_v33 = vld [vmem:[#allocation7 + $0x60c] ss:$16 sps:$4 sm:$0xff]  }
 0x2ae   : > { %5401 = vmatpush2.bf16.msra.mxu1 %v7910_v12  ;;  %5359 = vmatprep.subr.bf16.mxu0 %v7915_v29  ;;  %v7967_v12 = vld [vmem:[#allocation7 + $0x408] ss:$16 sps:$4 sm:$0xff]  }
 0x2af   : > { %5402 = vmatprep.subr.bf16.mxu1 %v7918_v30  ;;  %v7970_v29 = vld [vmem:[#allocation7 + $0x608] ss:$16 sps:$4 sm:$0xff]   ;;  %v7975_v30 = vld [vmem:[#allocation7 + $0x5ec] ss:$16 sps:$4 sm:$0xff]  }
 0x2b1   : > { %5360 = vmatpush2.bf16.msra.mxu0 %v7913_v31  ;;  %v7978_v31 = vld [vmem:[#allocation7 + $0x7ec] ss:$16 sps:$4 sm:$0xff]  }
 0x2b2   : > { %5403 = vmatpush2.bf16.msra.mxu1 %v7916_v32  ;;  %5361 = vmatprep.subr.bf16.mxu0 %v7921_v34  ;;  %v7973_v32 = vld [vmem:[#allocation7 + $0x5e8] ss:$16 sps:$4 sm:$0xff]  }
 0x2b3   : > { %5404 = vmatprep.subr.bf16.mxu1 %v7924_v35  ;;  %v7976_v34 = vld [vmem:[#allocation7 + $0x7e8] ss:$16 sps:$4 sm:$0xff]   ;;  %v7981_v35 = vld [vmem:[#allocation7 + $0x5cc] ss:$16 sps:$4 sm:$0xff]  }
 0x2b5   : > { %5362 = vmatpush2.bf16.msra.mxu0 %v7919_v36  ;;  %v7984_v36 = vld [vmem:[#allocation7 + $0x7cc] ss:$16 sps:$4 sm:$0xff]  }
 0x2b6   : > { %5405 = vmatpush2.bf16.msra.mxu1 %v7922_v22  ;;  %5417 = vmatprep.subr.bf16.mxu0 %v7927_v40  ;;  %v7979_v22 = vld [vmem:[#allocation7 + $0x5c8] ss:$16 sps:$4 sm:$0xff]  }
 0x2b7   : > { %5460 = vmatprep.subr.bf16.mxu1 %v7930_v41  ;;  %v7982_v40 = vld [vmem:[#allocation7 + $0x7c8] ss:$16 sps:$4 sm:$0xff]   ;;  %v7987_v41 = vld [vmem:[#allocation7 + $0x5ac] ss:$16 sps:$4 sm:$0xff]  }
 0x2b8   : > { %5364 = vmatmul.mubr.bf16.vlgmr.msra.gmra.mxu0 %v8857_v39  ;;  %v7945_v39 = vld [vmem:[#allocation7 + $0x48c] ss:$16 sps:$4 sm:$0xff]  }
 0x2b9   : > { %5407 = vmatmul.mubr.bf16.vlgmr.msra.gmra.mxu1 %v8859_v13  ;;  %5418 = vmatpush1.bf16.msra.mxu0 %v7925_v42  ;;  %v7948_v13 = vld [vmem:[#allocation7 + $0x68c] ss:$16 sps:$4 sm:$0xff]  }
 0x2ba   : > { %5461 = vmatpush1.bf16.msra.mxu1 %v7928_v45  ;;  %5419 = vmatprep.subr.bf16.mxu0 %v7933_v48  ;;  %v7990_v42 = vld [vmem:[#allocation7 + $0x7ac] ss:$16 sps:$4 sm:$0xff]   ;;  %v7985_v45 = vld [vmem:[#allocation7 + $0x5a8] ss:$16 sps:$4 sm:$0xff]  }
 0x2bb   : > { %5462 = vmatprep.subr.bf16.mxu1 %v7936_v52  ;;  %5449 = vmatprep.mubr.bf16.mxu0 %v8863_v43  ;;  %v7949_v43 = vld [vmem:[#allocation7 + $0x468] ss:$16 sps:$4 sm:$0xff]   ;;  %v7993_v52 = vld [vmem:[#allocation7 + $0x58c] ss:$16 sps:$4 sm:$0xff]  }
 0x2bc   : > { %5492 = vmatprep.mubr.bf16.mxu1 %v8865_v44  ;;  %v7952_v44 = vld [vmem:[#allocation7 + $0x668] ss:$16 sps:$4 sm:$0xff]  }
 0x2bd   : > { %5420 = vmatpush1.bf16.msra.mxu0 %v7931_v53  ;;  %v7988_v48 = vld [vmem:[#allocation7 + $0x7a8] ss:$16 sps:$4 sm:$0xff]   ;;  %v7996_v53 = vld [vmem:[#allocation7 + $0x78c] ss:$16 sps:$4 sm:$0xff]  }
 0x2be   : > { %5463 = vmatpush1.bf16.msra.mxu1 %v7934_v55  ;;  %5421 = vmatprep.subr.bf16.mxu0 %v7939_v56  ;;  %v7991_v55 = vld [vmem:[#allocation7 + $0x588] ss:$16 sps:$4 sm:$0xff]  }
 0x2bf   : > { %5464 = vmatprep.subr.bf16.mxu1 %v7942_v61  ;;  %v7994_v56 = vld [vmem:[#allocation7 + $0x788] ss:$16 sps:$4 sm:$0xff]   ;;  %v7999_v61 = vld [vmem:[#allocation7 + $0x56c] ss:$16 sps:$4 sm:$0xff]  }
 0x2c1   : > { %5422 = vmatpush1.bf16.msra.mxu0 %v7937_v3  ;;  %v8002_v3 = vld [vmem:[#allocation7 + $0x76c] ss:$16 sps:$4 sm:$0xff]  }
 0x2c2   : > { %5465 = vmatpush1.bf16.msra.mxu1 %v7940_v6  ;;  %5423 = vmatprep.subr.bf16.mxu0 %v7945_v39  ;;  %v7997_v6 = vld [vmem:[#allocation7 + $0x568] ss:$16 sps:$4 sm:$0xff]  }
 0x2c3   : > { %5466 = vmatprep.subr.bf16.mxu1 %v7948_v13  ;;  %v8000_v39 = vld [vmem:[#allocation7 + $0x768] ss:$16 sps:$4 sm:$0xff]   ;;  %v8005_v13 = vld [vmem:[#allocation7 + $0x54c] ss:$16 sps:$4 sm:$0xff]  }
 0x2c5   : > { %5424 = vmatpush1.bf16.msra.mxu0 %v7943_v9  ;;  %v8008_v9 = vld [vmem:[#allocation7 + $0x74c] ss:$16 sps:$4 sm:$0xff]  }
 0x2c6   : > { %5467 = vmatpush1.bf16.msra.mxu1 %v7946_v10  ;;  %5425 = vmatprep.subr.bf16.mxu0 %v7951_v11  ;;  %v8003_v10 = vld [vmem:[#allocation7 + $0x548] ss:$16 sps:$4 sm:$0xff]  }
 0x2c7   : > { %5468 = vmatprep.subr.bf16.mxu1 %v7954_v14  ;;  %v8006_v11 = vld [vmem:[#allocation7 + $0x748] ss:$16 sps:$4 sm:$0xff]   ;;  %v8011_v14 = vld [vmem:[#allocation7 + $0x52c] ss:$16 sps:$4 sm:$0xff]  }
 0x2c9   : > { %5426 = vmatpush1.bf16.msra.mxu0 %v7949_v43  ;;  %v8014_v43 = vld [vmem:[#allocation7 + $0x72c] ss:$16 sps:$4 sm:$0xff]  }
 0x2ca   : > { %5469 = vmatpush1.bf16.msra.mxu1 %v7952_v44  ;;  %5427 = vmatprep.subr.bf16.mxu0 %v7957_v17  ;;  %v8009_v44 = vld [vmem:[#allocation7 + $0x528] ss:$16 sps:$4 sm:$0xff]  }
 0x2cb   : > { %5470 = vmatprep.subr.bf16.mxu1 %v7960_v18  ;;  %v8012_v17 = vld [vmem:[#allocation7 + $0x728] ss:$16 sps:$4 sm:$0xff]   ;;  %v8017_v18 = vld [vmem:[#allocation7 + $0x50c] ss:$16 sps:$4 sm:$0xff]  }
 0x2cd   : > { %5428 = vmatpush1.bf16.msra.mxu0 %v7955_v16  ;;  %v8020_v16 = vld [vmem:[#allocation7 + $0x70c] ss:$16 sps:$4 sm:$0xff]  }
 0x2ce   : > { %5471 = vmatpush1.bf16.msra.mxu1 %v7958_v20  ;;  %5429 = vmatprep.subr.bf16.mxu0 %v7963_v23  ;;  %v8015_v20 = vld [vmem:[#allocation7 + $0x508] ss:$16 sps:$4 sm:$0xff]  }
 0x2cf   : > { %5472 = vmatprep.subr.bf16.mxu1 %v7966_v24  ;;  %v8018_v23 = vld [vmem:[#allocation7 + $0x708] ss:$16 sps:$4 sm:$0xff]   ;;  %v8023_v24 = vld [vmem:[#allocation7 + $0x8ec] ss:$16 sps:$4 sm:$0xff]  }
 0x2d1   : > { %5430 = vmatpush1.bf16.msra.mxu0 %v7961_v25  ;;  %v8026_v25 = vld [vmem:[#allocation7 + $0xaec] ss:$16 sps:$4 sm:$0xff]  }
 0x2d2   : > { %5473 = vmatpush1.bf16.msra.mxu1 %v7964_v26  ;;  %5431 = vmatprep.subr.bf16.mxu0 %v7969_v27  ;;  %v8021_v26 = vld [vmem:[#allocation7 + $0x8e8] ss:$16 sps:$4 sm:$0xff]  }
 0x2d3   : > { %5474 = vmatprep.subr.bf16.mxu1 %v7972_v33  ;;  %v8024_v27 = vld [vmem:[#allocation7 + $0xae8] ss:$16 sps:$4 sm:$0xff]   ;;  %v8029_v33 = vld [vmem:[#allocation7 + $0x8cc] ss:$16 sps:$4 sm:$0xff]  }
 0x2d5   : > { %5432 = vmatpush1.bf16.msra.mxu0 %v7967_v12  ;;  %v8032_v12 = vld [vmem:[#allocation7 + $0xacc] ss:$16 sps:$4 sm:$0xff]  }
 0x2d6   : > { %5475 = vmatpush1.bf16.msra.mxu1 %v7970_v29  ;;  %5433 = vmatprep.subr.bf16.mxu0 %v7975_v30  ;;  %v8027_v29 = vld [vmem:[#allocation7 + $0x8c8] ss:$16 sps:$4 sm:$0xff]  }
 0x2d7   : > { %5476 = vmatprep.subr.bf16.mxu1 %v7978_v31  ;;  %v8030_v30 = vld [vmem:[#allocation7 + $0xac8] ss:$16 sps:$4 sm:$0xff]   ;;  %v8035_v31 = vld [vmem:[#allocation7 + $0x8ac] ss:$16 sps:$4 sm:$0xff]  }
 0x2d9   : > { %5434 = vmatpush2.bf16.msra.mxu0 %v7973_v32  ;;  %v8038_v32 = vld [vmem:[#allocation7 + $0xaac] ss:$16 sps:$4 sm:$0xff]  }
 0x2da   : > { %5477 = vmatpush2.bf16.msra.mxu1 %v7976_v34  ;;  %5435 = vmatprep.subr.bf16.mxu0 %v7981_v35  ;;  %v8033_v34 = vld [vmem:[#allocation7 + $0x8a8] ss:$16 sps:$4 sm:$0xff]  }
 0x2db   : > { %5478 = vmatprep.subr.bf16.mxu1 %v7984_v36  ;;  %v8036_v35 = vld [vmem:[#allocation7 + $0xaa8] ss:$16 sps:$4 sm:$0xff]  }
 0x2dc   : > { %v8039_v36 = vld [vmem:[#allocation7 + $0x888] ss:$16 sps:$4 sm:$0xff]  }
 0x2dd   : > { %5436 = vmatpush2.bf16.msra.mxu0 %v7979_v22  ;;  %v8042_v22 = vld [vmem:[#allocation7 + $0xa88] ss:$16 sps:$4 sm:$0xff]  }
 0x2de   : > { %5479 = vmatpush2.bf16.msra.mxu1 %v7982_v40  ;;  %5437 = vmatprep.subr.bf16.mxu0 %v7987_v41  ;;  %v8047_v40 = vld [vmem:[#allocation7 + $0x86c] ss:$16 sps:$4 sm:$0xff]  }
 0x2df   : > { %5480 = vmatprep.subr.bf16.mxu1 %v7990_v42  ;;  %v8050_v41 = vld [vmem:[#allocation7 + $0xa6c] ss:$16 sps:$4 sm:$0xff]  }
 0x2e0   : > { %v8053_v42 = vld [vmem:[#allocation7 + $0x84c] ss:$16 sps:$4 sm:$0xff]  }
 0x2e1   : > { %5438 = vmatpush2.bf16.msra.mxu0 %v7985_v45  ;;  %v8056_v45 = vld [vmem:[#allocation7 + $0xa4c] ss:$16 sps:$4 sm:$0xff]  }
 0x2e2   : > { %5481 = vmatpush2.bf16.msra.mxu1 %v7988_v48  ;;  %5439 = vmatprep.subr.bf16.mxu0 %v7993_v52  ;;  %v8051_v48 = vld [vmem:[#allocation7 + $0x848] ss:$16 sps:$4 sm:$0xff]  }
 0x2e3   : > { %5482 = vmatprep.subr.bf16.mxu1 %v7996_v53  ;;  %v8054_v52 = vld [vmem:[#allocation7 + $0xa48] ss:$16 sps:$4 sm:$0xff]   ;;  %v8059_v53 = vld [vmem:[#allocation7 + $0x82c] ss:$16 sps:$4 sm:$0xff]  }
 0x2e5   : > { %5440 = vmatpush2.bf16.msra.mxu0 %v7991_v55  ;;  %v8062_v55 = vld [vmem:[#allocation7 + $0xa2c] ss:$16 sps:$4 sm:$0xff]  }
 0x2e6   : > { %5483 = vmatpush2.bf16.msra.mxu1 %v7994_v56  ;;  %5441 = vmatprep.subr.bf16.mxu0 %v7999_v61  ;;  %v8057_v56 = vld [vmem:[#allocation7 + $0x828] ss:$16 sps:$4 sm:$0xff]  }
 0x2e7   : > { %5484 = vmatprep.subr.bf16.mxu1 %v8002_v3  ;;  %v8060_v61 = vld [vmem:[#allocation7 + $0xa28] ss:$16 sps:$4 sm:$0xff]   ;;  %v8961_v3 = vpop.f32.mrf.mxu0 }
 0x2e9   : > { %5442 = vmatpush2.bf16.msra.mxu0 %v7997_v6  ;;  %v8963_v6 = vpop.f32.mrf.mxu1 }
 0x2ea   : > { %5485 = vmatpush2.bf16.msra.mxu1 %v8000_v39  ;;  %5443 = vmatprep.subr.bf16.mxu0 %v8005_v13  ;;  %v8065_v39 = vld [vmem:[#allocation7 + $0x80c] ss:$16 sps:$4 sm:$0xff]  }
 0x2eb   : > { %5486 = vmatprep.subr.bf16.mxu1 %v8008_v9  ;;  %v8068_v13 = vld [vmem:[#allocation7 + $0xa0c] ss:$16 sps:$4 sm:$0xff]   ;;  %v8063_v9 = vld [vmem:[#allocation7 + $0x808] ss:$16 sps:$4 sm:$0xff]  }
 0x2ed   : > { %5444 = vmatpush2.bf16.msra.mxu0 %v8003_v10  ;;  %v8066_v10 = vld [vmem:[#allocation7 + $0xa08] ss:$16 sps:$4 sm:$0xff]  }
 0x2ee   : > { %5487 = vmatpush2.bf16.msra.mxu1 %v8006_v11  ;;  %5445 = vmatprep.subr.bf16.mxu0 %v8011_v14  ;;  %v8965_v11 = vpop.f32.mrf.mxu0  ;;  %v8967_v14 = vpop.f32.mrf.mxu1 }
 0x2ef   : > { %5488 = vmatprep.subr.bf16.mxu1 %v8014_v43  ;;  %v8071_v43 = vld [vmem:[#allocation7 + $0x9ec] ss:$16 sps:$4 sm:$0xff]  }
 0x2f1   : > { %5446 = vmatpush2.bf16.msra.mxu0 %v8009_v44  ;;  %v8074_v44 = vld [vmem:[#allocation7 + $0xbec] ss:$16 sps:$4 sm:$0xff]  }
 0x2f2   : > { %5489 = vmatpush2.bf16.msra.mxu1 %v8012_v17  ;;  %5447 = vmatprep.subr.bf16.mxu0 %v8017_v18  ;;  %v8069_v17 = vld [vmem:[#allocation7 + $0x9e8] ss:$16 sps:$4 sm:$0xff]  }
 0x2f3   : > { %5490 = vmatprep.subr.bf16.mxu1 %v8020_v16  ;;  %v8072_v18 = vld [vmem:[#allocation7 + $0xbe8] ss:$16 sps:$4 sm:$0xff]   ;;  %v8969_v16 = vpop.f32.mrf.mxu0 }
 0x2f5   : > { %5448 = vmatpush2.bf16.msra.mxu0 %v8015_v20  ;;  %v8971_v20 = vpop.f32.mrf.mxu1 }
 0x2f6   : > { %5491 = vmatpush2.bf16.msra.mxu1 %v8018_v23  ;;  %5503 = vmatprep.subr.bf16.mxu0 %v8023_v24  ;;  %v8077_v23 = vld [vmem:[#allocation7 + $0x9cc] ss:$16 sps:$4 sm:$0xff]  }
 0x2f7   : > { %5546 = vmatprep.subr.bf16.mxu1 %v8026_v25  ;;  %v8080_v24 = vld [vmem:[#allocation7 + $0xbcc] ss:$16 sps:$4 sm:$0xff]   ;;  %v8075_v25 = vld [vmem:[#allocation7 + $0x9c8] ss:$16 sps:$4 sm:$0xff]  }
 0x2f8   : > { %5450 = vmatmul.mubr.bf16.vlgmr.msra.gmra.mxu0 %v8878_v57  ;;  %v8041_v57 = vld [vmem:[#allocation7 + $0x88c] ss:$16 sps:$4 sm:$0xff]  }
 0x2f9   : > { %5493 = vmatmul.mubr.bf16.vlgmr.msra.gmra.mxu1 %v8880_v58  ;;  %5504 = vmatpush1.bf16.msra.mxu0 %v8021_v26  ;;  %v8044_v58 = vld [vmem:[#allocation7 + $0xa8c] ss:$16 sps:$4 sm:$0xff]   ;;  %v8078_v26 = vld [vmem:[#allocation7 + $0xbc8] ss:$16 sps:$4 sm:$0xff]  }
 0x2fa   : > { %5547 = vmatpush1.bf16.msra.mxu1 %v8024_v27  ;;  %5505 = vmatprep.subr.bf16.mxu0 %v8029_v33  ;;  %v8973_v27 = vpop.f32.mrf.mxu0  ;;  %v8975_v33 = vpop.f32.mrf.mxu1 }
 0x2fb   : > { %5548 = vmatprep.subr.bf16.mxu1 %v8032_v12  ;;  %5535 = vmatprep.mubr.bf16.mxu0 %v8885_v4  ;;  %v8045_v4 = vld [vmem:[#allocation7 + $0x868] ss:$16 sps:$4 sm:$0xff]   ;;  %v8083_v12 = vld [vmem:[#allocation7 + $0x9ac] ss:$16 sps:$4 sm:$0xff]  }
 0x2fc   : > { %5578 = vmatprep.mubr.bf16.mxu1 %v8887_v5  ;;  %v8048_v5 = vld [vmem:[#allocation7 + $0xa68] ss:$16 sps:$4 sm:$0xff]  }
 0x2fd   : > { %5506 = vmatpush1.bf16.msra.mxu0 %v8027_v29  ;;  %v8086_v29 = vld [vmem:[#allocation7 + $0xbac] ss:$16 sps:$4 sm:$0xff]  }
 0x2fe   : > { %5549 = vmatpush1.bf16.msra.mxu1 %v8030_v30  ;;  %5507 = vmatprep.subr.bf16.mxu0 %v8035_v31  ;;  %v5107_v30 = vpop.f32.mrf.mxu0  ;;  %v5150_v31 = vpop.f32.mrf.mxu1 }
 0x2ff   : > { %5550 = vmatprep.subr.bf16.mxu1 %v8038_v32  ;;  %v8081_v32 = vld [vmem:[#allocation7 + $0x9a8] ss:$16 sps:$4 sm:$0xff]  }
 0x301   : > { %5508 = vmatpush1.bf16.msra.mxu0 %v8033_v34  ;;  %v8084_v34 = vld [vmem:[#allocation7 + $0xba8] ss:$16 sps:$4 sm:$0xff]  }
 0x302   : > { %5551 = vmatpush1.bf16.msra.mxu1 %v8036_v35  ;;  %5509 = vmatprep.subr.bf16.mxu0 %v8041_v57  ;;  %v8089_v35 = vld [vmem:[#allocation7 + $0x98c] ss:$16 sps:$4 sm:$0xff]  }
 0x303   : > { %5552 = vmatprep.subr.bf16.mxu1 %v8044_v58  ;;  %v8092_v57 = vld [vmem:[#allocation7 + $0xb8c] ss:$16 sps:$4 sm:$0xff]   ;;  %v8977_v58 = vpop.f32.mrf.mxu0 }
 0x305   : > { %5510 = vmatpush1.bf16.msra.mxu0 %v8039_v36  ;;  %v8979_v36 = vpop.f32.mrf.mxu1 }
 0x306   : > { %5553 = vmatpush1.bf16.msra.mxu1 %v8042_v22  ;;  %5511 = vmatprep.subr.bf16.mxu0 %v8047_v40  ;;  %v8087_v22 = vld [vmem:[#allocation7 + $0x988] ss:$16 sps:$4 sm:$0xff]  }
 0x307   : > { %5554 = vmatprep.subr.bf16.mxu1 %v8050_v41  ;;  %v8090_v40 = vld [vmem:[#allocation7 + $0xb88] ss:$16 sps:$4 sm:$0xff]   ;;  %v8095_v41 = vld [vmem:[#allocation7 + $0x96c] ss:$16 sps:$4 sm:$0xff]  }
 0x309   : > { %5512 = vmatpush1.bf16.msra.mxu0 %v8045_v4  ;;  %v8098_v4 = vld [vmem:[#allocation7 + $0xb6c] ss:$16 sps:$4 sm:$0xff]  }
 0x30a   : > { %5555 = vmatpush1.bf16.msra.mxu1 %v8048_v5  ;;  %5513 = vmatprep.subr.bf16.mxu0 %v8053_v42  ;;  %v5111_v5 = vpop.f32.mrf.mxu0  ;;  %v5154_v42 = vpop.f32.mrf.mxu1 }
 0x30b   : > { %5556 = vmatprep.subr.bf16.mxu1 %v8056_v45  ;;  %v2290_v45 = vadd.f32 %v8905_v7, %v8869_v49  ;;  %v8099_v49 = vld [vmem:[#allocation7 + $0x948] ss:$16 sps:$4 sm:$0xff]  }
 0x30c   : > { %v8102_v7 = vld [vmem:[#allocation7 + $0xb48] ss:$16 sps:$4 sm:$0xff]  }
 0x30d   : > { %5514 = vmatpush1.bf16.msra.mxu0 %v8051_v48  ;;  %v8093_v48 = vld [vmem:[#allocation7 + $0x968] ss:$16 sps:$4 sm:$0xff]  }
 0x30e   : > { %5557 = vmatpush1.bf16.msra.mxu1 %v8054_v52  ;;  %5515 = vmatprep.subr.bf16.mxu0 %v8059_v53  ;;  %v8096_v52 = vld [vmem:[#allocation7 + $0xb68] ss:$16 sps:$4 sm:$0xff]   ;;  %v8101_v53 = vld [vmem:[#allocation7 + $0x94c] ss:$16 sps:$4 sm:$0xff]  }
 0x30f   : > { %5558 = vmatprep.subr.bf16.mxu1 %v8062_v55  ;;  %v8104_v55 = vld [vmem:[#allocation7 + $0xb4c] ss:$16 sps:$4 sm:$0xff]  }
 0x311   : > { %5516 = vmatpush1.bf16.msra.mxu0 %v8057_v56  ;;  %v2251_v56 = vadd.f32 %v8899_v60, %v8897_v59 }
 0x312   : > { %5559 = vmatpush1.bf16.msra.mxu1 %v8060_v61  ;;  %5517 = vmatprep.subr.bf16.mxu0 %v8065_v39  ;;  %v5022_v61 = vadd.f32 %v8961_v3, %v2290_v45  ;;  %v8986_v39 = vpop.f32.mrf.mxu0  ;;  %v8120_v45 = vld [vmem:[#allocation7 + $0xee8] ss:$16 sps:$4 sm:$0xff]  }
 0x313   : > { %5560 = vmatprep.subr.bf16.mxu1 %v8068_v13  ;;  %v8988_v13 = vpop.f32.mrf.mxu1 }
 0x314   : > { %v5065_v59 = vadd.f32 %v8963_v6, %v5022_v61 }
 0x315   : > { %5518 = vmatpush1.bf16.msra.mxu0 %v8063_v9  ;;  %v2294_v9 = vadd.f32 %v8913_v28, %v2251_v56 }
 0x316   : > { %5561 = vmatpush1.bf16.msra.mxu1 %v8066_v10  ;;  %5519 = vmatprep.subr.bf16.mxu0 %v8071_v43  ;;  %v5193_v10 = vpop.f32.mrf.mxu0  ;;  %v5236_v43 = vpop.f32.mrf.mxu1  ;;  %v5108_v3 = vadd.f32 %v5107_v30, %v5065_v59  ;;  %v8114_v30 = vld [vmem:[#allocation7 + $0xb08] ss:$16 sps:$4 sm:$0xff]   ;;  %v8134_v59 = vld [vmem:[#allocation7 + $0xeac] ss:$16 sps:$4 sm:$0xff]  }
 0x317   : > { %5562 = vmatprep.subr.bf16.mxu1 %v8074_v44  ;;  %v8107_v44 = vld [vmem:[#allocation7 + $0x92c] ss:$16 sps:$4 sm:$0xff]   ;;  %v5026_v60 = vadd.f32 %v8969_v16, %v2294_v9  ;;  %v8111_v16 = vld [vmem:[#allocation7 + $0x908] ss:$16 sps:$4 sm:$0xff]  }
 0x318   : > { %v8993_v28 = vpop.f32.mrf.mxu0 }
 0x319   : > { %5520 = vmatpush2.bf16.msra.mxu0 %v8069_v17  ;;  %v8110_v17 = vld [vmem:[#allocation7 + $0xb2c] ss:$16 sps:$4 sm:$0xff]  }
 0x31a   : > { %5563 = vmatpush2.bf16.msra.mxu1 %v8072_v18  ;;  %5521 = vmatprep.subr.bf16.mxu0 %v8077_v23  ;;  %v8105_v18 = vld [vmem:[#allocation7 + $0x928] ss:$16 sps:$4 sm:$0xff]  }
 0x31b   : > { %5564 = vmatprep.subr.bf16.mxu1 %v8080_v24  ;;  %v8108_v23 = vld [vmem:[#allocation7 + $0xb28] ss:$16 sps:$4 sm:$0xff]   ;;  %v8995_v24 = vpop.f32.mrf.mxu1 }
 0x31d   : > { %5522 = vmatpush2.bf16.msra.mxu0 %v8075_v25  ;;  %v8113_v25 = vld [vmem:[#allocation7 + $0x90c] ss:$16 sps:$4 sm:$0xff]  }
 0x31e   : > { %5565 = vmatpush2.bf16.msra.mxu1 %v8078_v26  ;;  %5523 = vmatprep.subr.bf16.mxu0 %v8083_v12  ;;  %v8116_v26 = vld [vmem:[#allocation7 + $0xb0c] ss:$16 sps:$4 sm:$0xff]   ;;  %v5069_v12 = vadd.f32 %v8971_v20, %v5026_v60  ;;  %v8117_v20 = vld [vmem:[#allocation7 + $0xce8] ss:$16 sps:$4 sm:$0xff]  }
 0x31f   : > { %5566 = vmatprep.subr.bf16.mxu1 %v8086_v29  ;;  %v5677_v29 = vlaneseq }
 0x320   : > { %v5112_v6 = vadd.f32 %v5111_v5, %v5069_v12  ;;  %v8137_v12 = vld [vmem:[#allocation7 + $0xc8c] ss:$16 sps:$4 sm:$0xff]  }
 0x321   : > { %5524 = vmatpush2.bf16.msra.mxu0 %v8081_v32  ;;  %v5151_v32 = vadd.f32 %v5150_v31, %v5108_v3 }
 0x322   : > { %5567 = vmatpush2.bf16.msra.mxu1 %v8084_v34  ;;  %5525 = vmatprep.subr.bf16.mxu0 %v8089_v35  ;;  %v5197_v34 = vpop.f32.mrf.mxu0  ;;  %v5240_v35 = vpop.f32.mrf.mxu1 }
 0x323   : > { %5568 = vmatprep.subr.bf16.mxu1 %v8092_v57  ;;  %v8119_v57 = vld [vmem:[#allocation7 + $0xcec] ss:$16 sps:$4 sm:$0xff]  }
 0x324   : > { %v9000_v31 = vpop.f32.mrf.mxu0  ;;  %v9002_v5 = vpop.f32.mrf.mxu1 }
 0x325   : > { %5526 = vmatpush2.bf16.msra.mxu0 %v8087_v22  ;;  %v8122_v22 = vld [vmem:[#allocation7 + $0xeec] ss:$16 sps:$4 sm:$0xff]  }
 0x326   : > { %5569 = vmatpush2.bf16.msra.mxu1 %v8090_v40  ;;  %5527 = vmatprep.subr.bf16.mxu0 %v8095_v41  ;;  %v5194_v40 = vadd.f32 %v5193_v10, %v5151_v32  ;;  %v8998_v41 = vshrl.u32 %v5677_v29, 7  ;;  %v8126_v10 = vld [vmem:[#allocation7 + $0xec8] ss:$16 sps:$4 sm:$0xff]   ;;  %v8140_v29 = vld [vmem:[#allocation7 + $0xe8c] ss:$16 sps:$4 sm:$0xff]  }
 0x327   : > { %5570 = vmatprep.subr.bf16.mxu1 %v8098_v4  ;;  %v5155_v4 = vadd.f32 %v5154_v42, %v5112_v6 }
 0x328   : > { %v5679_v56 = vsub.s32 0, %v8998_v41 }
 0x329   : > { %5528 = vmatpush2.bf16.msra.mxu0 %v8093_v48  ;;  %v8125_v48 = vld [vmem:[#allocation7 + $0xccc] ss:$16 sps:$4 sm:$0xff]  }
 0x32a   : > { %5571 = vmatpush2.bf16.msra.mxu1 %v8096_v52  ;;  %5529 = vmatprep.subr.bf16.mxu0 %v8101_v53  ;;  %v8128_v52 = vld [vmem:[#allocation7 + $0xecc] ss:$16 sps:$4 sm:$0xff]   ;;  %v5237_v53 = vadd.f32 %v5236_v43, %v5194_v40  ;;  %v8141_v40 = vld [vmem:[#allocation7 + $0xc68] ss:$16 sps:$4 sm:$0xff]  }
 0x32b   : > { %5572 = vmatprep.subr.bf16.mxu1 %v8104_v55  ;;  %v5198_v55 = vadd.f32 %v5197_v34, %v5155_v4  ;;  %v8131_v43 = vld [vmem:[#allocation7 + $0xcac] ss:$16 sps:$4 sm:$0xff]   ;;  %v8144_v4 = vld [vmem:[#allocation7 + $0xe68] ss:$16 sps:$4 sm:$0xff]  }
 0x32c   : > { %v8146_v34 = vld [vmem:[#allocation7 + $0xe6c] ss:$16 sps:$4 sm:$0xff]  }
 0x32d   : > { %5530 = vmatpush2.bf16.msra.mxu0 %v8099_v49  ;;  %v9005_v49 = vld [vmem:[#allocation10] sm:$0xf]  ;;  %v5241_v60 = vadd.f32 %v5240_v35, %v5198_v55  ;;  %v8158_v55 = vld [vmem:[#allocation7 + $0xe2c] ss:$16 sps:$4 sm:$0xff]  }
 0x32e   : > { %5573 = vmatpush2.bf16.msra.mxu1 %v8102_v7  ;;  %5531 = vmatprep.subr.bf16.mxu0 %v8107_v44  ;;  %v8123_v7 = vld [vmem:[#allocation7 + $0xcc8] ss:$16 sps:$4 sm:$0xff]  }
 0x32f   : > { %5574 = vmatprep.subr.bf16.mxu1 %v8110_v17 }
 0x331   : > { %5532 = vmatpush2.bf16.msra.mxu0 %v8105_v18  ;;  %v5680_v18 = vrot.slane %v9005_v49, %v5679_v56  ;;  %v8153_v56 = vld [vmem:[#allocation7 + $0xc28] ss:$16 sps:$4 sm:$0xff]  }
 0x332   : > { %5575 = vmatpush2.bf16.msra.mxu1 %v8108_v23  ;;  %5533 = vmatprep.subr.bf16.mxu0 %v8113_v25  ;;  %v8129_v23 = vld [vmem:[#allocation7 + $0xca8] ss:$16 sps:$4 sm:$0xff]  }
 0x333   : > { %5576 = vmatprep.subr.bf16.mxu1 %v8116_v26  ;;  %v8132_v25 = vld [vmem:[#allocation7 + $0xea8] ss:$16 sps:$4 sm:$0xff]  }
 0x335   : > { %5534 = vmatpush2.bf16.msra.mxu0 %v8111_v16 }
 0x336   : > { %5577 = vmatpush2.bf16.msra.mxu1 %v8114_v30  ;;  %5589 = vmatprep.subr.bf16.mxu0 %v8119_v57  ;;  %v8135_v30 = vld [vmem:[#allocation7 + $0xc88] ss:$16 sps:$4 sm:$0xff]  }
 0x337   : > { %5632 = vmatprep.subr.bf16.mxu1 %v8122_v22 }
 0x338   : > { %v5279_v61 = vpop.f32.mrf.mxu0  ;;  %5536 = vmatmul.mubr.bf16.vlgmr.msra.gmra.mxu0 %v8919_v37 }
 0x339   : > { %v5322_v9 = vpop.f32.mrf.mxu1  ;;  %5579 = vmatmul.mubr.bf16.vlgmr.msra.gmra.mxu1 %v8921_v38  ;;  %v5280_v42 = vadd.f32 %v5279_v61, %v5237_v53  ;;  %5590 = vmatpush1.bf16.msra.mxu0 %v8117_v20  ;;  %v8149_v20 = vld [vmem:[#allocation7 + $0xc4c] ss:$16 sps:$4 sm:$0xff]   ;;  %v8156_v61 = vld [vmem:[#allocation7 + $0xe28] ss:$16 sps:$4 sm:$0xff]  }
 0x33a   : > { %5633 = vmatpush1.bf16.msra.mxu1 %v8120_v45  ;;  %v9009_v44 = vpop.f32.mrf.mxu0  ;;  %5591 = vmatprep.subr.bf16.mxu0 %v8125_v48  ;;  %v8152_v45 = vld [vmem:[#allocation7 + $0xe4c] ss:$16 sps:$4 sm:$0xff]   ;;  %v8147_v48 = vld [vmem:[#allocation7 + $0xc48] ss:$16 sps:$4 sm:$0xff]  }
 0x33b   : > { %v9011_v17 = vpop.f32.mrf.mxu1  ;;  %5634 = vmatprep.subr.bf16.mxu1 %v8128_v52  ;;  %v5323_v3 = vadd.f32 %v5322_v9, %v5280_v42  ;;  %5621 = vmatprep.mubr.bf16.mxu0 %v8925_v46  ;;  %v8138_v46 = vld [vmem:[#allocation7 + $0xe88] ss:$16 sps:$4 sm:$0xff]   ;;  %v8155_v53 = vld [vmem:[#allocation7 + $0xc2c] ss:$16 sps:$4 sm:$0xff]  }
 0x33c   : > { %5664 = vmatprep.mubr.bf16.mxu1 %v8927_v47  ;;  %v5283_v37 = vpop.f32.mrf.mxu0  ;;  %v8143_v47 = vld [vmem:[#allocation7 + $0xc6c] ss:$16 sps:$4 sm:$0xff]   ;;  %v8150_v52 = vld [vmem:[#allocation7 + $0xe48] ss:$16 sps:$4 sm:$0xff]  }
 0x33d   : > { %v5284_v38 = vadd.f32 %v5283_v37, %v5241_v60  ;;  %5592 = vmatpush1.bf16.msra.mxu0 %v8123_v7  ;;  %v5326_v26 = vpop.f32.mrf.mxu1  ;;  %v5697_v32 = vadd.f32 %v5680_v18, %v5323_v3  ;;  %v8161_v9 = vld [vmem:[#allocation7 + $0xc0c] ss:$16 sps:$4 sm:$0xff]   ;;  %v2253_v7 = vadd.f32 %v8903_v2, %v8901_v1  ;;  %v2249_v3 = vadd.f32 %v8895_v51, %v8893_v50  ;;  %v8165_v1 = vld [vmem:[#allocation7 + $0xde8] ss:$16 sps:$4 sm:$0xff]  }
 0x33e   : > { %5635 = vmatpush1.bf16.msra.mxu1 %v8126_v10  ;;  %5593 = vmatprep.subr.bf16.mxu0 %v8131_v43  ;;  %v8164_v42 = vld [vmem:[#allocation7 + $0xe0c] ss:$16 sps:$4 sm:$0xff]   ;;  %v8159_v10 = vld [vmem:[#allocation7 + $0xc08] ss:$16 sps:$4 sm:$0xff]  }
 0x33f   : > { %5636 = vmatprep.subr.bf16.mxu1 %v8134_v59  ;;  %v5327_v6 = vadd.f32 %v5326_v26, %v5284_v38  ;;  %v5705_v35 = vmax.f32 %v5697_v32, 0.0  ;;  %v8162_v43 = vld [vmem:[#allocation7 + $0xe08] ss:$16 sps:$4 sm:$0xff]   ;;  %v8167_v59 = vld [vmem:[#allocation7 + $0xdec] ss:$16 sps:$4 sm:$0xff]   ;;  %v2292_v37 = vadd.f32 %v8907_v15, %v2249_v3 }
 0x340   : > { %v8170_v60 = vld [vmem:[#allocation7 + $0xfec] ss:$16 sps:$4 sm:$0xff]   ;;  %v8168_v2 = vld [vmem:[#allocation7 + $0xfe8] ss:$16 sps:$4 sm:$0xff]  }
 0x341   : > { %v5701_v16 = vadd.f32 %v5680_v18, %v5327_v6  ;;  %5594 = vmatpush1.bf16.msra.mxu0 %v8129_v23  ;;  %v2296_v18 = vadd.f32 %v8923_v54, %v2253_v7  ;;  %v8173_v23 = vld [vmem:[#allocation7 + $0xdcc] ss:$16 sps:$4 sm:$0xff]   ;;  %v5024_v26 = vadd.f32 %v8965_v11, %v2292_v37  ;;  %v8171_v50 = vld [vmem:[#allocation7 + $0xdc8] ss:$16 sps:$4 sm:$0xff]  }
 0x342   : > { %5637 = vmatpush1.bf16.msra.mxu1 %v8132_v25  ;;  %5595 = vmatprep.subr.bf16.mxu0 %v8137_v12  ;;  %v8176_v25 = vld [vmem:[#allocation7 + $0xfcc] ss:$16 sps:$4 sm:$0xff]   ;;  %v8174_v51 = vld [vmem:[#allocation7 + $0xfc8] ss:$16 sps:$4 sm:$0xff]  }
 0x343   : > { %5638 = vmatprep.subr.bf16.mxu1 %v8140_v29  ;;  %v5709_v57 = vmax.f32 %v5701_v16, 0.0  ;;  %v5028_v38 = vadd.f32 %v8973_v27, %v2296_v18  ;;  %v8179_v15 = vld [vmem:[#allocation7 + $0xdac] ss:$16 sps:$4 sm:$0xff]   ;;  %v5067_v27 = vadd.f32 %v8967_v14, %v5024_v26  ;;  %v8177_v6 = vld [vmem:[#allocation7 + $0xda8] ss:$16 sps:$4 sm:$0xff]  }
 0x344   : > { %v8182_v54 = vld [vmem:[#allocation7 + $0xfac] ss:$16 sps:$4 sm:$0xff]   ;;  %v8180_v11 = vld [vmem:[#allocation7 + $0xfa8] ss:$16 sps:$4 sm:$0xff]  }
 0x345   : > { %v9016_v22 = vpack.c.bf16 %v5709_v57, %v5705_v35  ;;  %5596 = vmatpush1.bf16.msra.mxu0 %v8135_v30  ;;  %v5071_v12 = vadd.f32 %v8975_v33, %v5028_v38  ;;  %v5110_v32 = vadd.f32 %v8977_v58, %v5067_v27  ;;  %v8185_v33 = vld [vmem:[#allocation7 + $0xd8c] ss:$16 sps:$4 sm:$0xff]   ;;  %v8183_v14 = vld [vmem:[#allocation7 + $0xd88] ss:$16 sps:$4 sm:$0xff]   ;;  %v5285_v57 = vpop.f32.mrf.mxu0 }
 0x346   : > { %5639 = vmatpush1.bf16.msra.mxu1 %v8138_v46  ;;  %5597 = vmatprep.subr.bf16.mxu0 %v8143_v47  ;;  %v8188_v16 = vld [vmem:[#allocation7 + $0xf8c] ss:$16 sps:$4 sm:$0xff]   ;;  %v8210_v3 = vld [vmem:[#allocation7 + $0xf08] ss:$16 sps:$4 sm:$0xff]  }
 0x347   : > { %5640 = vmatprep.subr.bf16.mxu1 %v8146_v34  ;;  %v5114_v29 = vadd.f32 %v8986_v39, %v5071_v12  ;;  %v5153_v46 = vadd.f32 %v8979_v36, %v5110_v32  ;;  %v8186_v39 = vld [vmem:[#allocation7 + $0xf88] ss:$16 sps:$4 sm:$0xff]   ;;  %v8191_v58 = vld [vmem:[#allocation7 + $0xd6c] ss:$16 sps:$4 sm:$0xff]  }
 0x348   : > { %v8194_v34 = vld [vmem:[#allocation7 + $0xf6c] ss:$16 sps:$4 sm:$0xff]   ;;  %v8219_v12 = vld [vmem:[#allocation11 + $0x60] sm:$0xff]   ;;  %v8223_v32 = vld [vmem:[#allocation11 + $0x50] sm:$0xff]  }
 0x349   : > { %5598 = vmatpush1.bf16.msra.mxu0 %v8141_v40  ;;  %v5157_v30 = vadd.f32 %v8988_v13, %v5114_v29  ;;  %v5196_v35 = vadd.f32 %v8993_v28, %v5153_v46  ;;  %v8189_v13 = vld [vmem:[#allocation7 + $0xd68] ss:$16 sps:$4 sm:$0xff]   ;;  %v8197_v36 = vld [vmem:[#allocation7 + $0xd4c] ss:$16 sps:$4 sm:$0xff]  }
 0x34a   : > { %5641 = vmatpush1.bf16.msra.mxu1 %v8144_v4  ;;  %5599 = vmatprep.subr.bf16.mxu0 %v8149_v20  ;;  %v8192_v4 = vld [vmem:[#allocation7 + $0xf68] ss:$16 sps:$4 sm:$0xff]   ;;  %v8209_v7 = vld [vmem:[#allocation7 + $0xd0c] ss:$16 sps:$4 sm:$0xff]  }
 0x34b   : > { %5642 = vmatprep.subr.bf16.mxu1 %v8152_v45  ;;  %v5200_v47 = vadd.f32 %v9000_v31, %v5157_v30  ;;  %v8200_v31 = vld [vmem:[#allocation7 + $0xf4c] ss:$16 sps:$4 sm:$0xff]   ;;  %v5239_v20 = vadd.f32 %v8995_v24, %v5196_v35  ;;  %v8195_v28 = vld [vmem:[#allocation7 + $0xd48] ss:$16 sps:$4 sm:$0xff]  }
 0x34c   : > { %v8201_v24 = vld [vmem:[#allocation7 + $0xd28] ss:$16 sps:$4 sm:$0xff]   ;;  %v8213_v18 = vld [vmem:[#allocation11 + $0x78] sm:$0xff]   ;;  %v8218_v26 = vld [vmem:[#allocation11 + $0x28] sm:$0xff]  }
 0x34d   : > { %5600 = vmatpush1.bf16.msra.mxu0 %v8147_v48  ;;  %v5243_v40 = vadd.f32 %v9002_v5, %v5200_v47  ;;  %v5282_v48 = vadd.f32 %v9009_v44, %v5239_v20  ;;  %v5328_v5 = vpop.f32.mrf.mxu1  ;;  %v8204_v44 = vld [vmem:[#allocation7 + $0xf28] ss:$16 sps:$4 sm:$0xff]   ;;  %v8214_v38 = vld [vmem:[#allocation11 + $0x38] sm:$0xff]   ;;  %v8233_v29 = vld [vmem:[#allocation11 + $0xe8] sm:$0xff]  }
 0x34e   : > { %5643 = vmatpush1.bf16.msra.mxu1 %v8150_v52  ;;  %5601 = vmatprep.subr.bf16.mxu0 %v8155_v53  ;;  %v5683_v52 = vsub.s32 1, %v8998_v41  ;;  %v8198_v53 = vld [vmem:[#allocation7 + $0xf48] ss:$16 sps:$4 sm:$0xff]   ;;  %v8221_v27 = vld [vmem:[#allocation11 + $0x58] sm:$0xff]   ;;  %v8226_v46 = vld [vmem:[#allocation11 + $0x8] sm:$0xff]  }
 0x34f   : > { %5644 = vmatprep.subr.bf16.mxu1 %v8158_v55  ;;  %v5286_v45 = vadd.f32 %v5285_v57, %v5243_v40  ;;  %v8203_v55 = vld [vmem:[#allocation7 + $0xd2c] ss:$16 sps:$4 sm:$0xff]   ;;  %v8236_v30 = vld [vmem:[#allocation11 + $0xa0] sm:$0xff]   ;;  %v8240_v35 = vld [vmem:[#allocation11 + $0x90] sm:$0xff]  }
 0x350   : > { %v8227_v47 = vld [vmem:[#allocation11 + $0x40] sm:$0xff]   ;;  %v8241_v57 = vld [vmem:[#allocation11 + $0xc8] sm:$0xff]  }
 0x351   : > { %5602 = vmatpush1.bf16.msra.mxu0 %v8153_v56  ;;  %v8206_v56 = vld [vmem:[#allocation7 + $0xf2c] ss:$16 sps:$4 sm:$0xff]  }
 0x352   : > { %5645 = vmatpush1.bf16.msra.mxu1 %v8156_v61  ;;  %5603 = vmatprep.subr.bf16.mxu0 %v8161_v9  ;;  %v5329_v61 = vadd.f32 %v5328_v5, %v5286_v45  ;;  %v5325_v9 = vadd.f32 %v9011_v17, %v5282_v48  ;;  %v8242_v40 = vld [vmem:[#allocation11 + $0x88] sm:$0xff]  }
 0x353   : > { %5646 = vmatprep.subr.bf16.mxu1 %v8164_v42  ;;  %v5684_v42 = vrot.slane %v9005_v49, %v5683_v52 }
 0x355   : > { %5604 = vmatpush1.bf16.msra.mxu0 %v8159_v10  ;;  %v8212_v10 = vld [vmem:[#allocation7 + $0xf0c] ss:$16 sps:$4 sm:$0xff]  }
 0x356   : > { %5647 = vmatpush1.bf16.msra.mxu1 %v8162_v43  ;;  %5605 = vmatprep.subr.bf16.mxu0 %v8167_v59  ;;  %v5702_v43 = vadd.f32 %v5684_v42, %v5329_v61  ;;  %v5698_v59 = vadd.f32 %v5684_v42, %v5325_v9 }
 0x357   : > { %5648 = vmatprep.subr.bf16.mxu1 %v8170_v60  ;;  %v8207_v60 = vld [vmem:[#allocation7 + $0xd08] ss:$16 sps:$4 sm:$0xff]  }
 0x358   : > { %v5710_v17 = vmax.f32 %v5702_v43, 0.0  ;;  %v5706_v37 = vmax.f32 %v5698_v59, 0.0 }
 0x359   : > { %5606 = vmatpush2.bf16.msra.mxu0 %v8165_v1  ;;  %v8215_v1 = vld [vmem:[#allocation11 + $0x70] sm:$0xff]  }
 0x35a   : > { %5649 = vmatpush2.bf16.msra.mxu1 %v8168_v2  ;;  %5607 = vmatprep.subr.bf16.mxu0 %v8173_v23  ;;  %v5714_v2 = vpack.c.bf16 %v5710_v17, %v5706_v37  ;;  %v8216_v23 = vld [vmem:[#allocation11 + $0x30] sm:$0xff]  }
 0x35b   : > { %5650 = vmatprep.subr.bf16.mxu1 %v8176_v25  ;;  %v8217_v25 = vld [vmem:[#allocation11 + $0x68] sm:$0xff]  }
 0x35d   : > { %5608 = vmatpush2.bf16.msra.mxu0 %v8171_v50  ;;  %v8220_v50 = vld [vmem:[#allocation11 + $0x20] sm:$0xff]  }
 0x35e   : > { %5651 = vmatpush2.bf16.msra.mxu1 %v8174_v51  ;;  %5609 = vmatprep.subr.bf16.mxu0 %v8179_v15  ;;  %v8229_v51 = vld [vmem:[#allocation11 + $0xf8] sm:$0xff]  }
 0x35f   : > { %5652 = vmatprep.subr.bf16.mxu1 %v8182_v54  ;;  %v8230_v15 = vld [vmem:[#allocation11 + $0xb8] sm:$0xff]   ;;  %v8231_v54 = vld [vmem:[#allocation11 + $0xf0] sm:$0xff]  }
 0x361   : > { %5610 = vmatpush2.bf16.msra.mxu0 %v8177_v6  ;;  %v8234_v6 = vld [vmem:[#allocation11 + $0xa8] sm:$0xff]  }
 0x362   : > { %5653 = vmatpush2.bf16.msra.mxu1 %v8180_v11  ;;  %5611 = vmatprep.subr.bf16.mxu0 %v8185_v33  ;;  %v8224_v11 = vld [vmem:[#allocation11 + $0x10] sm:$0xff]   ;;  %v8235_v33 = vld [vmem:[#allocation11 + $0xe0] sm:$0xff]  }
 0x363   : > { %5654 = vmatprep.subr.bf16.mxu1 %v8188_v16  ;;  %v8225_v16 = vld [vmem:[#allocation11 + $0x48] sm:$0xff]  }
 0x365   : > { %5612 = vmatpush2.bf16.msra.mxu0 %v8183_v14  ;;  %v8228_v14 = vld [vmem:[#allocation11] sm:$0xff]  }
 0x366   : > { %5655 = vmatpush2.bf16.msra.mxu1 %v8186_v39  ;;  %5613 = vmatprep.subr.bf16.mxu0 %v8191_v58  ;;  %v8237_v39 = vld [vmem:[#allocation11 + $0xd8] sm:$0xff]  }
 0x367   : > { %5656 = vmatprep.subr.bf16.mxu1 %v8194_v34  ;;  %v8238_v58 = vld [vmem:[#allocation11 + $0x98] sm:$0xff]   ;;  %v8239_v34 = vld [vmem:[#allocation11 + $0xd0] sm:$0xff]  }
 0x369   : > { %5614 = vmatpush2.bf16.msra.mxu0 %v8189_v13  ;;  %v8243_v13 = vld [vmem:[#allocation11 + $0xc0] sm:$0xff]  }
 0x36a   : > { %5657 = vmatpush2.bf16.msra.mxu1 %v8192_v4  ;;  %5615 = vmatprep.subr.bf16.mxu0 %v8197_v36  ;;  %v8244_v4 = vld [vmem:[#allocation11 + $0x80] sm:$0xff]  }
 0x36b   : > { %5658 = vmatprep.subr.bf16.mxu1 %v8200_v31 }
 0x36d   : > { %5616 = vmatpush2.bf16.msra.mxu0 %v8195_v28 }
 0x36e   : > { %5659 = vmatpush2.bf16.msra.mxu1 %v8198_v53  ;;  %5617 = vmatprep.subr.bf16.mxu0 %v8203_v55 }
 0x36f   : > { %5660 = vmatprep.subr.bf16.mxu1 %v8206_v56 }
 0x371   : > { %5618 = vmatpush2.bf16.msra.mxu0 %v8201_v24 }
 0x372   : > { %5661 = vmatpush2.bf16.msra.mxu1 %v8204_v44  ;;  %5619 = vmatprep.subr.bf16.mxu0 %v8209_v7 }
 0x373   : > { %5662 = vmatprep.subr.bf16.mxu1 %v8212_v10 }
 0x375   : > { %5620 = vmatpush2.bf16.msra.mxu0 %v8207_v60 }
 0x376   : > { %5663 = vmatpush2.bf16.msra.mxu1 %v8210_v3  ;;  %7009 = vmatprep.subr.bf16.mxu0 %v8213_v18 }
 0x377   : > { %7031 = vmatprep.subr.bf16.mxu1 %v8229_v51 }
 0x378   : > { %5622 = vmatmul.mubr.bf16.vlgmr.msra.gmra.mxu0 %v8945_v62  ;;  %v8232_v62 = vld [vmem:[#allocation11 + $0xb0] sm:$0xff]   ;;  %v5365_v36 = vpop.f32.mrf.mxu0 }
 0x379   : > { %5665 = vmatmul.mubr.bf16.vlgmr.msra.gmra.mxu1 %v8947_v0  ;;  %7010 = vmatpush3.bf16.msra.mxu0 %v8214_v38  ;;  %v8222_v0 = vld [vmem:[#allocation11 + $0x18] sm:$0xff]   ;;  %v5408_v31 = vpop.f32.mrf.mxu1  ;;  %v5366_v42 = vadd.f32 %v5365_v36, %v8931_v63 }
 0x37a   : > { %6012 = vmatprep.mubr.bf16.mxu0 %v5714_v2  ;;  %7011 = vmatprep.subr.bf16.mxu0 %v8215_v1  ;;  %v5367_v20 = vpop.f32.mrf.mxu0 }
 0x37b   : > { %7032 = vmatpush3.bf16.msra.mxu1 %v8230_v15  ;;  %v5368_v7 = vadd.f32 %v5367_v20, %v8935_v8  ;;  %v5409_v59 = vadd.f32 %v5408_v31, %v5366_v42 }
 0x37c   : > { %7033 = vmatprep.subr.bf16.mxu1 %v8231_v54  ;;  %v5369_v45 = vpop.f32.mrf.mxu0 }
 0x37d   : > { %7012 = vmatpush3.bf16.msra.mxu0 %v8216_v23  ;;  %v5370_v60 = vadd.f32 %v5369_v45, %v8937_v19 }
 0x37e   : > { %7013 = vmatprep.subr.bf16.mxu0 %v8217_v25  ;;  %v5371_v52 = vpop.f32.mrf.mxu0 }
 0x37f   : > { %7034 = vmatpush3.bf16.msra.mxu1 %v8232_v62  ;;  %v5372_v18 = vadd.f32 %v5371_v52, %v8939_v21 }
 0x380   : > { %7035 = vmatprep.subr.bf16.mxu1 %v8233_v29  ;;  %v5687_v29 = vsub.s32 2, %v8998_v41 }
 0x381   : > { %7014 = vmatpush3.bf16.msra.mxu0 %v8218_v26 }
 0x382   : > { %7015 = vmatprep.subr.bf16.mxu0 %v8219_v12 }
 0x383   : > { %7036 = vmatpush3.bf16.msra.mxu1 %v8234_v6 }
 0x384   : > { %7037 = vmatprep.subr.bf16.mxu1 %v8235_v33 }
 0x385   : > { %7016 = vmatpush3.bf16.msra.mxu0 %v8220_v50 }
 0x386   : > { %7017 = vmatprep.subr.bf16.mxu0 %v8221_v27 }
 0x387   : > { %7038 = vmatpush3.bf16.msra.mxu1 %v8236_v30  ;;  %v5691_v30 = vsub.s32 3, %v8998_v41 }
 0x388   : > { %7039 = vmatprep.subr.bf16.mxu1 %v8237_v39 }
 0x389   : > { %7018 = vmatpush3.bf16.msra.mxu0 %v8222_v0 }
 0x38a   : > { %7019 = vmatprep.subr.bf16.mxu0 %v8223_v32 }
 0x38b   : > { %7040 = vmatpush3.bf16.msra.mxu1 %v8238_v58  ;;  %v5688_v58 = vrot.slane %v9005_v49, %v5687_v29 }
 0x38c   : > { %7041 = vmatprep.subr.bf16.mxu1 %v8239_v34 }
 0x38d   : > { %7020 = vmatpush3.bf16.msra.mxu0 %v8224_v11 }
 0x38e   : > { %7021 = vmatprep.subr.bf16.mxu0 %v8225_v16 }
 0x38f   : > { %7042 = vmatpush3.bf16.msra.mxu1 %v8240_v35 }
 0x390   : > { %7043 = vmatprep.subr.bf16.mxu1 %v8241_v57 }
 0x391   : > { %7022 = vmatpush3.bf16.msra.mxu0 %v8226_v46 }
 0x392   : > { %7023 = vmatprep.subr.bf16.mxu0 %v8227_v47 }
 0x393   : > { %7044 = vmatpush3.bf16.msra.mxu1 %v8242_v40 }
 0x394   : > { %7045 = vmatprep.subr.bf16.mxu1 %v8243_v13 }
 0x395   : > { %7024 = vmatpush3.bf16.msra.mxu0 %v8228_v14 }
 0x397   : > { %7046 = vmatpush3.bf16.msra.mxu1 %v8244_v4  ;;  %v5692_v4 = vrot.slane %v9005_v49, %v5691_v30 }
 0x398   : > { %6013 = vmatmul.mubr.bf16.vlgmr.msra.gmra.mxu0 %v9016_v22  ;;  %v5410_v22 = vpop.f32.mrf.mxu1 }
 0x399   : > { %v5411_v3 = vadd.f32 %v5410_v22, %v5368_v7 }
 0x39a   : > { %v5412_v48 = vpop.f32.mrf.mxu1 }
 0x39b   : > { %v5413_v1 = vadd.f32 %v5412_v48, %v5370_v60 }
 0x39c   : > { %v5414_v28 = vpop.f32.mrf.mxu1 }
 0x39d   : > { %v5415_v23 = vadd.f32 %v5414_v28, %v5372_v18 }
 0x3b8   : > { %v5451_v53 = vpop.f32.mrf.mxu0 }
 0x3b9   : > { %v5494_v5 = vpop.f32.mrf.mxu1  ;;  %v5452_v17 = vadd.f32 %v5451_v53, %v5409_v59 }
 0x3ba   : > { %v5453_v55 = vpop.f32.mrf.mxu0 }
 0x3bb   : > { %v5496_v56 = vpop.f32.mrf.mxu1  ;;  %v5454_v2 = vadd.f32 %v5453_v55, %v5411_v3  ;;  %v5495_v25 = vadd.f32 %v5494_v5, %v5452_v17 }
 0x3bc   : > { %v5455_v61 = vpop.f32.mrf.mxu0 }
 0x3bd   : > { %v5498_v9 = vpop.f32.mrf.mxu1  ;;  %v5456_v63 = vadd.f32 %v5455_v61, %v5413_v1  ;;  %v5497_v50 = vadd.f32 %v5496_v56, %v5454_v2 }
 0x3be   : > { %v5457_v24 = vpop.f32.mrf.mxu0 }
 0x3bf   : > { %v5500_v44 = vpop.f32.mrf.mxu1  ;;  %v5458_v8 = vadd.f32 %v5457_v24, %v5415_v23  ;;  %v5499_v15 = vadd.f32 %v5498_v9, %v5456_v63 }
 0x3c1   : > { %v5501_v62 = vadd.f32 %v5500_v44, %v5458_v8 }
 0x3f8   : > { %v5537_v10 = vpop.f32.mrf.mxu0 }
 0x3f9   : > { %v5580_v43 = vpop.f32.mrf.mxu1  ;;  %v5538_v51 = vadd.f32 %v5537_v10, %v5495_v25  ;;  %v6963_v10 = vld [vmem:[#allocation13] ss:$0 sm:$0xff] }
 0x3fa   : > { %v5539_v37 = vpop.f32.mrf.mxu0 }
 0x3fb   : > { %v5582_v38 = vpop.f32.mrf.mxu1  ;;  %v5540_v54 = vadd.f32 %v5539_v37, %v5497_v50  ;;  %v5581_v0 = vadd.f32 %v5580_v43, %v5538_v51 }
 0x3fc   : > { %v5541_v26 = vpop.f32.mrf.mxu0 }
 0x3fd   : > { %v5584_v12 = vpop.f32.mrf.mxu1  ;;  %v5542_v21 = vadd.f32 %v5541_v26, %v5499_v15  ;;  %v5583_v11 = vadd.f32 %v5582_v38, %v5540_v54 }
 0x3fe   : > { %v5543_v27 = vpop.f32.mrf.mxu0 }
 0x3ff   : > { %v5586_v19 = vpop.f32.mrf.mxu1  ;;  %v5544_v33 = vadd.f32 %v5543_v27, %v5501_v62  ;;  %v5585_v14 = vadd.f32 %v5584_v12, %v5542_v21 }
 0x401   : > { %v5587_v40 = vadd.f32 %v5586_v19, %v5544_v33 }
 0x438   : > { %v5623_v32 = vpop.f32.mrf.mxu0 }
 0x439   : > { %v5666_v6 = vpop.f32.mrf.mxu1  ;;  %v5624_v16 = vadd.f32 %v5623_v32, %v5581_v0 }
 0x43a   : > { %v5625_v46 = vpop.f32.mrf.mxu0 }
 0x43b   : > { %v5668_v47 = vpop.f32.mrf.mxu1  ;;  %v5667_v39 = vadd.f32 %v5666_v6, %v5624_v16  ;;  %v5626_v34 = vadd.f32 %v5625_v46, %v5583_v11 }
 0x43c   : > { %v5627_v35 = vpop.f32.mrf.mxu0 }
 0x43d   : > { %v5670_v57 = vpop.f32.mrf.mxu1  ;;  %v5669_v13 = vadd.f32 %v5668_v47, %v5626_v34  ;;  %v5628_v36 = vadd.f32 %v5627_v35, %v5585_v14  ;;  %v5699_v20 = vadd.f32 %v5688_v58, %v5667_v39 }
 0x43e   : > { %v5629_v31 = vpop.f32.mrf.mxu0 }
 0x43f   : > { %v5671_v22 = vadd.f32 %v5670_v57, %v5628_v36  ;;  %v5630_v45 = vadd.f32 %v5629_v31, %v5587_v40  ;;  %v5672_v48 = vpop.f32.mrf.mxu1  ;;  %v5700_v41 = vadd.f32 %v5692_v4, %v5669_v13  ;;  %v5707_v53 = vmax.f32 %v5699_v20, 0.0 }
 0x441   : > { %v5703_v52 = vadd.f32 %v5688_v58, %v5671_v22  ;;  %v5673_v28 = vadd.f32 %v5672_v48, %v5630_v45  ;;  %v5708_v56 = vmax.f32 %v5700_v41, 0.0 }
 0x443   : > { %v5711_v5 = vmax.f32 %v5703_v52, 0.0  ;;  %v5704_v55 = vadd.f32 %v5692_v4, %v5673_v28 }
 0x445   : > { %v5715_v61 = vpack.c.bf16 %v5711_v5, %v5707_v53  ;;  %v5712_v9 = vmax.f32 %v5704_v55, 0.0 }
 0x447   : > { %v5716_v42 = vpack.c.bf16 %v5712_v9, %v5708_v56 }
 0x449   : > { %6053 = vmatprep.mubr.bf16.mxu1 %v5716_v42 }
 0x44a   : > { %6054 = vmatmul.mubr.bf16.vlgmr.msra.gmra.mxu1 %v5715_v61 }
 0x458   : > { %v7025_v49 = vpop.f32.mrf.mxu0 }
 0x45a   : > { %v7026_v24 = vpop.f32.mrf.mxu0 }
 0x45b   : > { %v7027_v7 = vadd.f32 %v7026_v24, %v7025_v49 }
 0x45c   : > { %v7028_v44 = vpop.f32.mrf.mxu0 }
 0x45d   : > { %v6015_v3 = vadd.f32 %v7027_v7, %v6963_v10 }
 0x45e   : > { %v7029_v43 = vpop.f32.mrf.mxu0 }
 0x45f   : > { %v7030_v18 = vadd.f32 %v7029_v43, %v7028_v44 }
 0x461   : > { %v6018_v2 = vadd.f32 %v7030_v18, %v6963_v10 }
 0x50a   : > { %v7047_v59 = vpop.f32.mrf.mxu1 }
 0x50c   : > { %v7048_v60 = vpop.f32.mrf.mxu1 }
 0x50d   : > { %v7049_v17 = vadd.f32 %v7048_v60, %v7047_v59 }
 0x50e   : > { %v7050_v37 = vpop.f32.mrf.mxu1 }
 0x50f   : > { %v6056_v38 = vadd.f32 %v7049_v17, %v6015_v3 }
 0x510   : > { %v7051_v1 = vpop.f32.mrf.mxu1 }
 0x511   : > { %6062 = vst [vmem:[%s420_s2] sm:$0xff] %v6056_v38  ;;  %v7052_v23 = vadd.f32 %v7051_v1, %v7050_v37  ;;  %6071 = sbr.rel (!%p9148_p0) target bundleno = 1329 (0x531), region = 80 }
 0x513   : > { %v6059_v25 = vadd.f32 %v7052_v23, %v6018_v2 }
 0x515   : > { %6063 = vst [vmem:[%s420_s2 + $0x8] sm:$0xff] %v6059_v25 }
 0x516   : > { %s9161_s18 = smov (!%p6074_p9, %s6073_s18), 2 }
 0x517   : > { %s9056_s11 = sshll.u32 %s9161_s18, 7 }
 0x518   : > { %s6078_s30 = ssub.s32 256, %s9056_s11 }
 0x519   : > { %6079 = vsyncadd %s6065_s17, %s6078_s30  ;;  %p6999_p8 = scmp.ne.s32.totalorder %s9056_s11, 0  ;;  %s7008_s10 = sshll.u32 %s8588_s28, 8 }
 0x51a   : > { %s9066_s20 = scalar_lea.hbm %s9120_s7, %s7008_s10  ;;  %s6084_s19 = sshll.u32 %s420_s2, 4  ;;  %s9068_s19 = int_to_ptr.vmem [resolvable:$true] %s6084_s19 }
 0x51b   : > { %s8427_s29 = scalar_lea.vmem %s9068_s19, %s9056_s11  ;;  %s8524_s15 = smov [#allocation14]  }
 0x51c   : > { %p8428_p10 = scmp.ne.s32.totalorder %s9068_s19, %s8427_s29  ;;  %s8431_s8 = sshll.u32 %s8524_s15, 4  ;;  %s8432_s8 = int_to_ptr.vmem [resolvable:$false] %s8431_s8 }
 0x51d   : > { %s8433_s28 = scalar_lea.vmem %s8432_s8, 512  ;;  %p8434_p2 = scmp.lt.s32.totalorder %s9068_s19, %s8432_s8 }
 0x51e   : > { %p8429_p6 = pnand %p8428_p10, %p6999_p8  ;;  %p8435_p4 = scmp.lt.s32.totalorder %s8433_s28, %s8427_s29 }
 0x520   : > { %p8430_p12 = pneg %p8429_p6  ;;  %p8436_p13 = por %p8435_p4, %p8434_p2 }
 0x522   : > { %p8437_p5 = pnand %p8436_p13, %p8430_p12 }
 0x524   : > { %8440 = shalt.err (!%p8437_p5)
}
 0x525   : > { %s8441_s16 = scalar_lea.hbm %s9066_s20, %s9056_s11  ;;  %s8445_s2 = scalar_lea.hbm %s9120_s7, 384 }
 0x526   : > { %p8442_p1 = scmp.ne.s32.totalorder %s9066_s20, %s8441_s16  ;;  %p8446_p7 = scmp.lt.s32.totalorder %s9066_s20, %s9120_s7 }
 0x527   : > { %p8447_p0 = scmp.lt.s32.totalorder %s8445_s2, %s8441_s16 }
 0x528   : > { %p8443_p11 = pnand %p8442_p1, %p6999_p8 }
 0x529   : > { %p8448_p9 = por %p8447_p0, %p8446_p7 }
 0x52a   : > { %p8444_p3 = pneg %p8443_p11 }
 0x52c   : > { %p8449_p10 = pnand %p8448_p9, %p8444_p3 }
 0x52e   : > { %8452 = shalt.err (!%p8449_p10)
}
 0x52f   : > { %s8525_s30 = smov 128   ;;  %s8526_s10 = smov 8  }
 0x530   : > { %6090 = dma.vmem_to_hbm [thread:$0]  (%p6999_p8), %s9068_s19, %s9056_s11, %s9066_s20, %s6065_s17, %s8525_s30, %s8525_s30, %s8526_s10  }
 0x531 PF: > { %s6099_s13 = sand.u32 1, %s8495_s24   ;;  %p9149_p6 = scmp.ne.s32.totalorder %s9134_s14, 0 }
 0x532   : > { %p9150_p12 = scmp.ge.s32.totalorder %s8507_s27, 2  ;;  %s6100_s21 = scalar_lea.sflag [#allocation4], %s6099_s13 }
 0x534   : > { %p7096_p2 = pnand %p9150_p12, %p9149_p6 }
 0x536   : > { %p7097_p4 = pneg %p7096_p2 }
 0x538   : > { %8490 = dma.done.wait (%p7097_p4), %s6100_s21, 256  }
 0x539   : > { %8492 = vsyncadd (%p7097_p4), %s6100_s21, 4294967040  ;;  %s9151_s27 = sld [smem:[#allocation21_spill]]  ;;  %s9153_s24 = smov %s8499_s25 }
 0x53a   : > { %s9152_s29 = sld [smem:[#allocation22_spill]]  ;;  %s9154_s25 = smov %s8503_s26 }
 0x53f   : > { %p25_p13 = scmp.ge.s32.totalorder %s9151_s27, 4  }
 0x540   : > { %s9155_s26 = smov %s9152_s29 }
 0x541   :  { %27 = sbr.rel (!%p25_p13) target bundleno = 11 (0xb), region = 126 }
 0x546   :  { %6105 = vsyncpa [#allocation3], 1 }
 0x547   :  { %6107 = vsyncpa [#allocation3 + $0x1], 1 }
 0x548   :  { %6108 = vsyncpa [#allocation6], 1 }
 0x549   :  { %6110 = vsyncpa [#allocation6 + $0x1], 1 }
 0x54a   :  { %6111 = vsyncpa [#allocation9], 1 }
 0x54b   :  { %6112 = vsyncpa [#allocation12], 1 }
 0x54c   :  { %6113 = vsyncpa [#allocation4], 1 }
 0x54d   :  { %6115 = vsyncpa [#allocation4 + $0x1], 1 }

</bundles_post_ra>
